<compile_context>
chip_gen: v6e
topology: v6e:2x2x1
jax: 0.10.0
libtpu: 0.0.40
codegen_flags: <defaults>
</compile_context>

<pallas_src>
import functools

import numpy as np
import jax
import jax.numpy as jnp
from jax.experimental import pallas as pl
from jax.experimental.pallas import tpu as pltpu


POOL_K = 7   # F.max_pool2d kernel_size
POOL_S = 3   # F.max_pool2d stride


# ----------------------------------------------------------------------------
# Fused kernel body (runs once: grid=(1,), all operands are full-array blocks).
# ----------------------------------------------------------------------------
def _bi_spf_kernel(patches_ref, wext_ref, bext_ref,
                   w1_ref, b1_ref, wf_ref, bf_ref,
                   w2_ref, b2_ref, d2_ref,
                   wmx_ref, bmx_ref, w3_ref, b3_ref, w3b_ref, b3b_ref, sp_ref,
                   w4_ref, b4_ref, rres_ref,
                   outr_ref, outd_ref, *, dims):
    N, f, B, H, W, Ho, Wo, Hp, Wp = dims
    half = N // 2
    Mo = B * Ho * Wo              # flattened spatial size after conv2 (stride 2)
    Bs = B * Hp * Wp              # flattened spatial size after max-pool

    # --- ext conv (3x3 pad 1) + ReLU, both branches block-diagonal -----------
    # x = [relu(r_ext(rgb)); relu(d_ext(depth))]  == ESA input of the r branch.
    x = jnp.dot(wext_ref[...], patches_ref[...],
                preferred_element_type=jnp.float32) + bext_ref[...]
    x = jnp.maximum(x, 0.0)                                     # [N, M] f32
    x_bf = x.astype(jnp.bfloat16)

    # --- conv1 (1x1): d-branch weights pre-swapped to consume x_r ordering ---
    c1_ = jnp.dot(w1_ref[...], x_bf,
                  preferred_element_type=jnp.float32) + b1_ref[...]   # [2f, M]
    c1_bf = c1_.astype(jnp.bfloat16)

    # --- conv_f (1x1, block-diagonal over branches) ---------------------------
    cf = jnp.dot(wf_ref[...], c1_bf,
                 preferred_element_type=jnp.float32) + bf_ref[...]    # [2f, M]

    # --- conv2 (3x3, stride 2, no pad) ----------------------------------------
    # Per tap: channel-mix matmul (bf16) then a 0/1 spatial-selection matmul
    # (f32, exact) that picks the strided window positions.
    c1 = jnp.zeros((2 * f, Mo), jnp.float32)
    for t in range(9):
        tap = jnp.dot(w2_ref[t], c1_bf, preferred_element_type=jnp.float32)
        c1 = c1 + jnp.dot(tap, d2_ref[t], preferred_element_type=jnp.float32)
    c1 = c1 + b2_ref[...]                                              # [2f, Mo]

    # --- F.max_pool2d(kernel=7, stride=3) on the flattened (b, i, j) layout ---
    cols = []
    for b in range(B):
        for pi in range(Hp):
            for pj in range(Wp):
                win = None
                for r in range(POOL_K):
                    st = b * Ho * Wo + (pi * POOL_S + r) * Wo + pj * POOL_S
                    sl = c1[:, st:st + POOL_K]
                    win = sl if win is None else jnp.maximum(win, sl)
                cols.append(jnp.max(win, axis=1, keepdims=True))
    v_max = cols[0] if len(cols) == 1 else jnp.concatenate(cols, axis=1)  # [2f, Bs]

    # --- 3x3 pad-1 convs on the tiny pooled map (precomputed shift matrices) --
    def small_conv(v, w_ref, b_ref):
        vb = v.astype(jnp.bfloat16)
        acc = jnp.zeros((2 * f, Bs), jnp.float32)
        for t in range(9):
            tap = jnp.dot(w_ref[t], vb, preferred_element_type=jnp.float32)
            acc = acc + jnp.dot(tap, sp_ref[t], preferred_element_type=jnp.float32)
        return acc + b_ref[...]

    v_range = jnp.maximum(small_conv(v_max, wmx_ref, bmx_ref), 0.0)
    c3 = jnp.maximum(small_conv(v_range, w3_ref, b3_ref), 0.0)
    c3 = small_conv(c3, w3b_ref, b3b_ref)                              # [2f, Bs]

    # --- bilinear resize back to (H, W): one matmul with precomputed weights --
    c3_up = jnp.dot(c3, rres_ref[...], preferred_element_type=jnp.float32)  # [2f, M]

    # --- conv4 (1x1) -> sigmoid -> gate ----------------------------------------
    s = (c3_up + cf).astype(jnp.bfloat16)
    c4 = jnp.dot(w4_ref[...], s,
                 preferred_element_type=jnp.float32) + b4_ref[...]     # [2N, M]
    gate = jax.nn.sigmoid(c4)

    outr_ref[...] = x * gate[:N]
    # d-branch ESA input is the half-swapped channel ordering of x.
    x_d = pltpu.roll(x, shift=half, axis=0)
    outd_ref[...] = x_d * gate[N:]


def _full_spec(shape):
    nd = len(shape)
    return pl.BlockSpec(tuple(shape), lambda i, _nd=nd: (0,) * _nd)


def _bi_spf_call(inputs, dims):
    N, f, B, H, W, Ho, Wo, Hp, Wp = dims
    M = B * H * W
    out_sds = jax.ShapeDtypeStruct((N, M), jnp.float32)
    return pl.pallas_call(
        functools.partial(_bi_spf_kernel, dims=dims),
        out_shape=(out_sds, out_sds),
        grid=(1,),
        in_specs=[_full_spec(a.shape) for a in inputs],
        out_specs=(_full_spec((N, M)), _full_spec((N, M))),
        compiler_params=pltpu.CompilerParams(
            dimension_semantics=("arbitrary",)),
    )(*inputs)


# ----------------------------------------------------------------------------
# Host-side (trace-time) spatial operator constants and XLA glue
# ----------------------------------------------------------------------------
def _im2col_3x3_p1(x_cm):
    """x_cm: [C, B, H, W] f32 -> [9*C, B*H*W]  (K order: kh, kw, c)."""
    C, B, H, W = x_cm.shape
    xp = jnp.pad(x_cm, ((0, 0), (0, 0), (1, 1), (1, 1)))
    cols = [xp[:, :, i:i + H, j:j + W] for i in range(3) for j in range(3)]
    return jnp.stack(cols, axis=0).reshape(9 * C, B * H * W)


def _conv2_select_mats(B, H, W):
    """0/1 selection matrices for a 3x3 / stride-2 / pad-0 conv, per tap."""
    Ho = (H - 3) // 2 + 1
    Wo = (W - 3) // 2 + 1
    d = np.zeros((9, B * H * W, B * Ho * Wo), np.float32)
    for di in range(3):
        for dj in range(3):
            t = di * 3 + dj
            for b in range(B):
                for i in range(Ho):
                    for j in range(Wo):
                        d[t, b * H * W + (2 * i + di) * W + (2 * j + dj),
                          b * Ho * Wo + i * Wo + j] = 1.0
    return d, Ho, Wo


def _same_conv_shift_mats(B, Hs, Ws):
    """0/1 shift matrices for a 3x3 / stride-1 / pad-1 conv on an (Hs, Ws) map."""
    S = Hs * Ws
    sp = np.zeros((9, B * S, B * S), np.float32)
    for di in range(3):
        for dj in range(3):
            t = di * 3 + dj
            for b in range(B):
                for p in range(Hs):
                    for q in range(Ws):
                        ip, iq = p + di - 1, q + dj - 1
                        if 0 <= ip < Hs and 0 <= iq < Ws:
                            sp[t, b * S + ip * Ws + iq, b * S + p * Ws + q] = 1.0
    return sp


def _bilinear_resize_mat(B, Hs, Ws, Ho, Wo):
    """F.interpolate(mode='bilinear', align_corners=False) as a matrix."""
    def axis_weights(n_in, n_out):
        w = np.zeros((n_in, n_out), np.float32)
        scale = n_in / n_out
        for o in range(n_out):
            src = max((o + 0.5) * scale - 0.5, 0.0)
            i0 = int(np.floor(src))
            frac = src - i0
            i0c = min(max(i0, 0), n_in - 1)
            i1c = min(i0 + 1, n_in - 1)
            w[i0c, o] += 1.0 - frac
            w[i1c, o] += frac
        return w
    per_batch = np.kron(axis_weights(Hs, Ho), axis_weights(Ws, Wo))
    r = np.zeros((B * Hs * Ws, B * Ho * Wo), np.float32)
    for b in range(B):
        r[b * Hs * Ws:(b + 1) * Hs * Ws, b * Ho * Wo:(b + 1) * Ho * Wo] = per_batch
    return r


def bi_spf_forward(packed, rgb_nchw, depth_nchw):
    """Inputs / outputs NCHW (PyTorch convention)."""
    B, N, H, W = rgb_nchw.shape
    f = N // 4

    # Channels-major + im2col of the raw inputs for the ext conv (only XLA glue).
    # TODO(synk): move this patch construction / layout change into the kernel
    #             (shifted VMEM window reads) at realistic sizes.
    rgb_cm = jnp.transpose(rgb_nchw, (1, 0, 2, 3)).astype(jnp.float32)
    dep_cm = jnp.transpose(depth_nchw, (1, 0, 2, 3)).astype(jnp.float32)
    patches = jnp.concatenate(
        [_im2col_3x3_p1(rgb_cm), _im2col_3x3_p1(dep_cm)], axis=0
    ).astype(jnp.bfloat16)                                      # [2*9N, B*H*W]

    # Spatial operators, built with numpy at trace time (baked constants).
    d2_np, Ho, Wo = _conv2_select_mats(B, H, W)
    assert Ho >= POOL_K and Wo >= POOL_K, "spatial size too small for the 7x7 pool"
    Hp = (Ho - POOL_K) // POOL_S + 1
    Wp = (Wo - POOL_K) // POOL_S + 1
    sp_np = _same_conv_shift_mats(B, Hp, Wp)
    rres_np = _bilinear_resize_mat(B, Hp, Wp, H, W)

    dims = (N, f, B, H, W, Ho, Wo, Hp, Wp)
    inputs = [
        patches,
        packed["ext"]["w"], packed["ext"]["b"],
        packed["conv1"]["w"], packed["conv1"]["b"],
        packed["conv_f"]["w"], packed["conv_f"]["b"],
        packed["conv2"]["w"], packed["conv2"]["b"], jnp.asarray(d2_np),
        packed["conv_max"]["w"], packed["conv_max"]["b"],
        packed["conv3"]["w"], packed["conv3"]["b"],
        packed["conv3_"]["w"], packed["conv3_"]["b"], jnp.asarray(sp_np),
        packed["conv4"]["w"], packed["conv4"]["b"], jnp.asarray(rres_np),
    ]
    out_r_cm, out_d_cm = _bi_spf_call(inputs, dims)
    out_r = jnp.transpose(out_r_cm.reshape(N, B, H, W), (1, 0, 2, 3))
    out_d = jnp.transpose(out_d_cm.reshape(N, B, H, W), (1, 0, 2, 3))
    return out_r, out_d


# ----------------------------------------------------------------------------
# Parameter init (PyTorch shapes) + one-time packing (layout + bf16)
# ----------------------------------------------------------------------------
def _conv_params(key, cout, cin, k):
    kw_, kb = jax.random.split(key)
    fan_in = cin * k * k
    w = jax.random.normal(kw_, (cout, cin, k, k), jnp.float32) / jnp.sqrt(float(fan_in))
    b = 0.01 * jax.random.normal(kb, (cout,), jnp.float32)
    return {"w": w, "b": b}


def _esa_params(key, n_feats):
    f = n_feats // 4
    ks = jax.random.split(key, 7)
    return {
        "conv1":    _conv_params(ks[0], f, n_feats, 1),
        "conv_f":   _conv_params(ks[1], f, f, 1),
        "conv_max": _conv_params(ks[2], f, f, 3),
        "conv2":    _conv_params(ks[3], f, f, 3),
        "conv3":    _conv_params(ks[4], f, f, 3),
        "conv3_":   _conv_params(ks[5], f, f, 3),
        "conv4":    _conv_params(ks[6], n_feats, f, 1),
    }


def init_bi_spf_params(key, N):
    ks = jax.random.split(key, 4)
    return {
        "r_ext": _conv_params(ks[0], N // 2, N, 3),
        "d_ext": _conv_params(ks[1], N // 2, N, 3),
        "r_esa": _esa_params(ks[2], N),
        "d_esa": _esa_params(ks[3], N),
    }


def _w_flat(w):
    """[cout, cin, kh, kw] -> [cout, kh*kw*cin]  (K order kh, kw, cin)."""
    cout, cin, kh, kw = w.shape
    return jnp.transpose(w, (0, 2, 3, 1)).reshape(cout, kh * kw * cin)


def _block_diag(a, b):
    ra, ca = a.shape
    rb, cb = b.shape
    top = jnp.concatenate([a, jnp.zeros((ra, cb), a.dtype)], axis=1)
    bot = jnp.concatenate([jnp.zeros((rb, ca), b.dtype), b], axis=1)
    return jnp.concatenate([top, bot], axis=0)


def _bias(*bs):
    return jnp.concatenate([b.reshape(-1, 1) for b in bs], axis=0).astype(jnp.float32)


def _tap_blocks(wr, wd):
    """3x3 convs: per-tap block-diagonal channel-mix weights -> [9, 2*cout, 2*cin]."""
    blocks = [_block_diag(wr[:, :, di, dj], wd[:, :, di, dj])
              for di in range(3) for dj in range(3)]
    return jnp.stack(blocks, axis=0).astype(jnp.bfloat16)


def pack_bi_spf_params(params, N):
    """One-time weight packing (outside jit): branch fusion + bf16 cast."""
    half = N // 2
    r, d = params["r_esa"], params["d_esa"]

    # ext conv: block-diagonal over the stacked (rgb, depth) patch tensors.
    w_ext = _block_diag(_w_flat(params["r_ext"]["w"]),
                        _w_flat(params["d_ext"]["w"])).astype(jnp.bfloat16)

    # conv1: d-branch input halves swapped so both branches consume the SAME
    # activation ordering [relu(r_ext(rgb)); relu(d_ext(depth))].
    w1_r = r["conv1"]["w"][:, :, 0, 0]
    w1_d = d["conv1"]["w"][:, :, 0, 0]
    w1_d = jnp.concatenate([w1_d[:, half:], w1_d[:, :half]], axis=1)
    w1 = jnp.concatenate([w1_r, w1_d], axis=0).astype(jnp.bfloat16)

    wf = _block_diag(r["conv_f"]["w"][:, :, 0, 0],
                     d["conv_f"]["w"][:, :, 0, 0]).astype(jnp.bfloat16)
    w4 = _block_diag(r["conv4"]["w"][:, :, 0, 0],
                     d["conv4"]["w"][:, :, 0, 0]).astype(jnp.bfloat16)

    return {
        "ext":      {"w": w_ext, "b": _bias(params["r_ext"]["b"], params["d_ext"]["b"])},
        "conv1":    {"w": w1,    "b": _bias(r["conv1"]["b"], d["conv1"]["b"])},
        "conv_f":   {"w": wf,    "b": _bias(r["conv_f"]["b"], d["conv_f"]["b"])},
        "conv2":    {"w": _tap_blocks(r["conv2"]["w"], d["conv2"]["w"]),
                     "b": _bias(r["conv2"]["b"], d["conv2"]["b"])},
        "conv_max": {"w": _tap_blocks(r["conv_max"]["w"], d["conv_max"]["w"]),
                     "b": _bias(r["conv_max"]["b"], d["conv_max"]["b"])},
        "conv3":    {"w": _tap_blocks(r["conv3"]["w"], d["conv3"]["w"]),
                     "b": _bias(r["conv3"]["b"], d["conv3"]["b"])},
        "conv3_":   {"w": _tap_blocks(r["conv3_"]["w"], d["conv3_"]["w"]),
                     "b": _bias(r["conv3_"]["b"], d["conv3_"]["b"])},
        "conv4":    {"w": w4,    "b": _bias(r["conv4"]["b"], d["conv4"]["b"])},
    }


# ----------------------------------------------------------------------------
if __name__ == "__main__":
    N = 8                   # feature channels (N//2 = 4, ESA f = N//4 = 2)
    B, H, W = 2, 16, 16

    root = jax.random.PRNGKey(0)
    k_params, k_rgb, k_depth = jax.random.split(root, 3)

    params = init_bi_spf_params(k_params, N)
    packed = pack_bi_spf_params(params, N)        # packed once, outside jit
    rgb = jax.random.normal(k_rgb, (B, N, H, W), jnp.float32)      # NCHW
    depth = jax.random.normal(k_depth, (B, N, H, W), jnp.float32)

    fwd = jax.jit(bi_spf_forward)
    r_out, d_out = fwd(packed, rgb, depth)
    jax.block_until_ready((r_out, d_out))

    assert r_out.shape == (B, N, H, W) and d_out.shape == (B, N, H, W)
    assert bool(jnp.all(jnp.isfinite(r_out))) and bool(jnp.all(jnp.isfinite(d_out)))
    print("KERNEL_OK")
</pallas_src>

<mosaic_0001>
module attributes {stable_mosaic.version = 11 : i64} {
  func.func @_bi_spf_kernel(%arg0: i32, %arg1: memref<144x512xbf16, #tpu.memory_space<vmem>>, %arg2: memref<8x144xbf16, #tpu.memory_space<vmem>>, %arg3: memref<8x1xf32, #tpu.memory_space<vmem>>, %arg4: memref<4x8xbf16, #tpu.memory_space<vmem>>, %arg5: memref<4x1xf32, #tpu.memory_space<vmem>>, %arg6: memref<4x4xbf16, #tpu.memory_space<vmem>>, %arg7: memref<4x1xf32, #tpu.memory_space<vmem>>, %arg8: memref<9x4x4xbf16, #tpu.memory_space<vmem>>, %arg9: memref<4x1xf32, #tpu.memory_space<vmem>>, %arg10: memref<9x512x98xf32, #tpu.memory_space<vmem>>, %arg11: memref<9x4x4xbf16, #tpu.memory_space<vmem>>, %arg12: memref<4x1xf32, #tpu.memory_space<vmem>>, %arg13: memref<9x4x4xbf16, #tpu.memory_space<vmem>>, %arg14: memref<4x1xf32, #tpu.memory_space<vmem>>, %arg15: memref<9x4x4xbf16, #tpu.memory_space<vmem>>, %arg16: memref<4x1xf32, #tpu.memory_space<vmem>>, %arg17: memref<9x2x2xf32, #tpu.memory_space<vmem>>, %arg18: memref<16x4xbf16, #tpu.memory_space<vmem>>, %arg19: memref<16x1xf32, #tpu.memory_space<vmem>>, %arg20: memref<2x512xf32, #tpu.memory_space<vmem>>, %arg21: memref<8x512xf32, #tpu.memory_space<vmem>>, %arg22: memref<8x512xf32, #tpu.memory_space<vmem>>) attributes {dimension_semantics = [#tpu.dimension_semantics<arbitrary>], iteration_bounds = array<i64: 1>, scalar_prefetch = 0 : i64, scratch_operands = 0 : i64, tpu.core_type = #tpu.core_type<tc>, window_params = [{pipeline_mode = #tpu.pipeline_mode<synchronous>, transform_indices = @transform_0, window_bounds = array<i64: 144, 512>}, {pipeline_mode = #tpu.pipeline_mode<synchronous>, transform_indices = @transform_1, window_bounds = array<i64: 8, 144>}, {pipeline_mode = #tpu.pipeline_mode<synchronous>, transform_indices = @transform_2, window_bounds = array<i64: 8, 1>}, {pipeline_mode = #tpu.pipeline_mode<synchronous>, transform_indices = @transform_3, window_bounds = array<i64: 4, 8>}, {pipeline_mode = #tpu.pipeline_mode<synchronous>, transform_indices = @transform_4, window_bounds = array<i64: 4, 1>}, {pipeline_mode = #tpu.pipeline_mode<synchronous>, transform_indices = @transform_5, window_bounds = array<i64: 4, 4>}, {pipeline_mode = #tpu.pipeline_mode<synchronous>, transform_indices = @transform_6, window_bounds = array<i64: 4, 1>}, {pipeline_mode = #tpu.pipeline_mode<synchronous>, transform_indices = @transform_7, window_bounds = array<i64: 9, 4, 4>}, {pipeline_mode = #tpu.pipeline_mode<synchronous>, transform_indices = @transform_8, window_bounds = array<i64: 4, 1>}, {pipeline_mode = #tpu.pipeline_mode<synchronous>, transform_indices = @transform_9, window_bounds = array<i64: 9, 512, 98>}, {pipeline_mode = #tpu.pipeline_mode<synchronous>, transform_indices = @transform_10, window_bounds = array<i64: 9, 4, 4>}, {pipeline_mode = #tpu.pipeline_mode<synchronous>, transform_indices = @transform_11, window_bounds = array<i64: 4, 1>}, {pipeline_mode = #tpu.pipeline_mode<synchronous>, transform_indices = @transform_12, window_bounds = array<i64: 9, 4, 4>}, {pipeline_mode = #tpu.pipeline_mode<synchronous>, transform_indices = @transform_13, window_bounds = array<i64: 4, 1>}, {pipeline_mode = #tpu.pipeline_mode<synchronous>, transform_indices = @transform_14, window_bounds = array<i64: 9, 4, 4>}, {pipeline_mode = #tpu.pipeline_mode<synchronous>, transform_indices = @transform_15, window_bounds = array<i64: 4, 1>}, {pipeline_mode = #tpu.pipeline_mode<synchronous>, transform_indices = @transform_16, window_bounds = array<i64: 9, 2, 2>}, {pipeline_mode = #tpu.pipeline_mode<synchronous>, transform_indices = @transform_17, window_bounds = array<i64: 16, 4>}, {pipeline_mode = #tpu.pipeline_mode<synchronous>, transform_indices = @transform_18, window_bounds = array<i64: 16, 1>}, {pipeline_mode = #tpu.pipeline_mode<synchronous>, transform_indices = @transform_19, window_bounds = array<i64: 2, 512>}, {pipeline_mode = #tpu.pipeline_mode<synchronous>, transform_indices = @transform_20, window_bounds = array<i64: 8, 512>}, {pipeline_mode = #tpu.pipeline_mode<synchronous>, transform_indices = @transform_21, window_bounds = array<i64: 8, 512>}]} {
    %c0 = arith.constant 0 : index
    %c0_0 = arith.constant 0 : index
    %0 = vector.load %arg2[%c0, %c0_0] : memref<8x144xbf16, #tpu.memory_space<vmem>>, vector<8x144xbf16>
    %c0_1 = arith.constant 0 : index
    %c0_2 = arith.constant 0 : index
    %1 = vector.load %arg1[%c0_1, %c0_2] : memref<144x512xbf16, #tpu.memory_space<vmem>>, vector<144x512xbf16>
    %cst = arith.constant dense<0.000000e+00> : vector<8x512xf32>
    %2 = tpu.matmul %0, %1, %cst {dimension_numbers = #tpu.dot_dimension_numbers<[1], [0], [0], [1], [0, 0, 1, 1], [], []>} : vector<8x144xbf16>, vector<144x512xbf16>, vector<8x512xf32> -> vector<8x512xf32>
    %c0_3 = arith.constant 0 : index
    %c0_4 = arith.constant 0 : index
    %3 = vector.load %arg3[%c0_3, %c0_4] : memref<8x1xf32, #tpu.memory_space<vmem>>, vector<8x1xf32>
    %4 = vector.broadcast %3 : vector<8x1xf32> to vector<8x512xf32>
    %5 = arith.addf %2, %4 : vector<8x512xf32>
    %cst_5 = arith.constant 0.000000e+00 : f32
    %6 = vector.broadcast %cst_5 : f32 to vector<8x512xf32>
    %7 = arith.maximumf %5, %6 : vector<8x512xf32>
    %8 = arith.truncf %7 : vector<8x512xf32> to vector<8x512xbf16>
    %c0_6 = arith.constant 0 : index
    %c0_7 = arith.constant 0 : index
    %9 = vector.load %arg4[%c0_6, %c0_7] : memref<4x8xbf16, #tpu.memory_space<vmem>>, vector<4x8xbf16>
    %cst_8 = arith.constant dense<0.000000e+00> : vector<4x512xf32>
    %10 = tpu.matmul %9, %8, %cst_8 {dimension_numbers = #tpu.dot_dimension_numbers<[1], [0], [0], [1], [0, 0, 1, 1], [], []>} : vector<4x8xbf16>, vector<8x512xbf16>, vector<4x512xf32> -> vector<4x512xf32>
    %c0_9 = arith.constant 0 : index
    %c0_10 = arith.constant 0 : index
    %11 = vector.load %arg5[%c0_9, %c0_10] : memref<4x1xf32, #tpu.memory_space<vmem>>, vector<4x1xf32>
    %12 = vector.broadcast %11 : vector<4x1xf32> to vector<4x512xf32>
    %13 = arith.addf %10, %12 : vector<4x512xf32>
    %14 = arith.truncf %13 : vector<4x512xf32> to vector<4x512xbf16>
    %c0_11 = arith.constant 0 : index
    %c0_12 = arith.constant 0 : index
    %15 = vector.load %arg6[%c0_11, %c0_12] : memref<4x4xbf16, #tpu.memory_space<vmem>>, vector<4x4xbf16>
    %cst_13 = arith.constant dense<0.000000e+00> : vector<4x512xf32>
    %16 = tpu.matmul %15, %14, %cst_13 {dimension_numbers = #tpu.dot_dimension_numbers<[1], [0], [0], [1], [0, 0, 1, 1], [], []>} : vector<4x4xbf16>, vector<4x512xbf16>, vector<4x512xf32> -> vector<4x512xf32>
    %c0_14 = arith.constant 0 : index
    %c0_15 = arith.constant 0 : index
    %17 = vector.load %arg7[%c0_14, %c0_15] : memref<4x1xf32, #tpu.memory_space<vmem>>, vector<4x1xf32>
    %18 = vector.broadcast %17 : vector<4x1xf32> to vector<4x512xf32>
    %19 = arith.addf %16, %18 : vector<4x512xf32>
    %cst_16 = arith.constant 0.000000e+00 : f32
    %20 = vector.broadcast %cst_16 : f32 to vector<4x98xf32>
    %c0_17 = arith.constant 0 : index
    %c0_18 = arith.constant 0 : index
    %c0_19 = arith.constant 0 : index
    %21 = vector.load %arg8[%c0_17, %c0_18, %c0_19] : memref<9x4x4xbf16, #tpu.memory_space<vmem>>, vector<1x4x4xbf16>
    %22 = vector.shape_cast %21 : vector<1x4x4xbf16> to vector<4x4xbf16>
    %cst_20 = arith.constant dense<0.000000e+00> : vector<4x512xf32>
    %23 = tpu.matmul %22, %14, %cst_20 {dimension_numbers = #tpu.dot_dimension_numbers<[1], [0], [0], [1], [0, 0, 1, 1], [], []>} : vector<4x4xbf16>, vector<4x512xbf16>, vector<4x512xf32> -> vector<4x512xf32>
    %c0_21 = arith.constant 0 : index
    %c0_22 = arith.constant 0 : index
    %c0_23 = arith.constant 0 : index
    %24 = vector.load %arg10[%c0_21, %c0_22, %c0_23] : memref<9x512x98xf32, #tpu.memory_space<vmem>>, vector<1x512x98xf32>
    %25 = vector.shape_cast %24 : vector<1x512x98xf32> to vector<512x98xf32>
    %cst_24 = arith.constant dense<0.000000e+00> : vector<4x98xf32>
    %26 = tpu.matmul %23, %25, %cst_24 {dimension_numbers = #tpu.dot_dimension_numbers<[1], [0], [0], [1], [0, 0, 1, 1], [], []>} : vector<4x512xf32>, vector<512x98xf32>, vector<4x98xf32> -> vector<4x98xf32>
    %27 = arith.addf %20, %26 : vector<4x98xf32>
    %c1 = arith.constant 1 : index
    %c0_25 = arith.constant 0 : index
    %c0_26 = arith.constant 0 : index
    %28 = vector.load %arg8[%c1, %c0_25, %c0_26] : memref<9x4x4xbf16, #tpu.memory_space<vmem>>, vector<1x4x4xbf16>
    %29 = vector.shape_cast %28 : vector<1x4x4xbf16> to vector<4x4xbf16>
    %cst_27 = arith.constant dense<0.000000e+00> : vector<4x512xf32>
    %30 = tpu.matmul %29, %14, %cst_27 {dimension_numbers = #tpu.dot_dimension_numbers<[1], [0], [0], [1], [0, 0, 1, 1], [], []>} : vector<4x4xbf16>, vector<4x512xbf16>, vector<4x512xf32> -> vector<4x512xf32>
    %c1_28 = arith.constant 1 : index
    %c0_29 = arith.constant 0 : index
    %c0_30 = arith.constant 0 : index
    %31 = vector.load %arg10[%c1_28, %c0_29, %c0_30] : memref<9x512x98xf32, #tpu.memory_space<vmem>>, vector<1x512x98xf32>
    %32 = vector.shape_cast %31 : vector<1x512x98xf32> to vector<512x98xf32>
    %cst_31 = arith.constant dense<0.000000e+00> : vector<4x98xf32>
    %33 = tpu.matmul %30, %32, %cst_31 {dimension_numbers = #tpu.dot_dimension_numbers<[1], [0], [0], [1], [0, 0, 1, 1], [], []>} : vector<4x512xf32>, vector<512x98xf32>, vector<4x98xf32> -> vector<4x98xf32>
    %34 = arith.addf %27, %33 : vector<4x98xf32>
    %c2 = arith.constant 2 : index
    %c0_32 = arith.constant 0 : index
    %c0_33 = arith.constant 0 : index
    %35 = vector.load %arg8[%c2, %c0_32, %c0_33] : memref<9x4x4xbf16, #tpu.memory_space<vmem>>, vector<1x4x4xbf16>
    %36 = vector.shape_cast %35 : vector<1x4x4xbf16> to vector<4x4xbf16>
    %cst_34 = arith.constant dense<0.000000e+00> : vector<4x512xf32>
    %37 = tpu.matmul %36, %14, %cst_34 {dimension_numbers = #tpu.dot_dimension_numbers<[1], [0], [0], [1], [0, 0, 1, 1], [], []>} : vector<4x4xbf16>, vector<4x512xbf16>, vector<4x512xf32> -> vector<4x512xf32>
    %c2_35 = arith.constant 2 : index
    %c0_36 = arith.constant 0 : index
    %c0_37 = arith.constant 0 : index
    %38 = vector.load %arg10[%c2_35, %c0_36, %c0_37] : memref<9x512x98xf32, #tpu.memory_space<vmem>>, vector<1x512x98xf32>
    %39 = vector.shape_cast %38 : vector<1x512x98xf32> to vector<512x98xf32>
    %cst_38 = arith.constant dense<0.000000e+00> : vector<4x98xf32>
    %40 = tpu.matmul %37, %39, %cst_38 {dimension_numbers = #tpu.dot_dimension_numbers<[1], [0], [0], [1], [0, 0, 1, 1], [], []>} : vector<4x512xf32>, vector<512x98xf32>, vector<4x98xf32> -> vector<4x98xf32>
    %41 = arith.addf %34, %40 : vector<4x98xf32>
    %c3 = arith.constant 3 : index
    %c0_39 = arith.constant 0 : index
    %c0_40 = arith.constant 0 : index
    %42 = vector.load %arg8[%c3, %c0_39, %c0_40] : memref<9x4x4xbf16, #tpu.memory_space<vmem>>, vector<1x4x4xbf16>
    %43 = vector.shape_cast %42 : vector<1x4x4xbf16> to vector<4x4xbf16>
    %cst_41 = arith.constant dense<0.000000e+00> : vector<4x512xf32>
    %44 = tpu.matmul %43, %14, %cst_41 {dimension_numbers = #tpu.dot_dimension_numbers<[1], [0], [0], [1], [0, 0, 1, 1], [], []>} : vector<4x4xbf16>, vector<4x512xbf16>, vector<4x512xf32> -> vector<4x512xf32>
    %c3_42 = arith.constant 3 : index
    %c0_43 = arith.constant 0 : index
    %c0_44 = arith.constant 0 : index
    %45 = vector.load %arg10[%c3_42, %c0_43, %c0_44] : memref<9x512x98xf32, #tpu.memory_space<vmem>>, vector<1x512x98xf32>
    %46 = vector.shape_cast %45 : vector<1x512x98xf32> to vector<512x98xf32>
    %cst_45 = arith.constant dense<0.000000e+00> : vector<4x98xf32>
    %47 = tpu.matmul %44, %46, %cst_45 {dimension_numbers = #tpu.dot_dimension_numbers<[1], [0], [0], [1], [0, 0, 1, 1], [], []>} : vector<4x512xf32>, vector<512x98xf32>, vector<4x98xf32> -> vector<4x98xf32>
    %48 = arith.addf %41, %47 : vector<4x98xf32>
    %c4 = arith.constant 4 : index
    %c0_46 = arith.constant 0 : index
    %c0_47 = arith.constant 0 : index
    %49 = vector.load %arg8[%c4, %c0_46, %c0_47] : memref<9x4x4xbf16, #tpu.memory_space<vmem>>, vector<1x4x4xbf16>
    %50 = vector.shape_cast %49 : vector<1x4x4xbf16> to vector<4x4xbf16>
    %cst_48 = arith.constant dense<0.000000e+00> : vector<4x512xf32>
    %51 = tpu.matmul %50, %14, %cst_48 {dimension_numbers = #tpu.dot_dimension_numbers<[1], [0], [0], [1], [0, 0, 1, 1], [], []>} : vector<4x4xbf16>, vector<4x512xbf16>, vector<4x512xf32> -> vector<4x512xf32>
    %c4_49 = arith.constant 4 : index
    %c0_50 = arith.constant 0 : index
    %c0_51 = arith.constant 0 : index
    %52 = vector.load %arg10[%c4_49, %c0_50, %c0_51] : memref<9x512x98xf32, #tpu.memory_space<vmem>>, vector<1x512x98xf32>
    %53 = vector.shape_cast %52 : vector<1x512x98xf32> to vector<512x98xf32>
    %cst_52 = arith.constant dense<0.000000e+00> : vector<4x98xf32>
    %54 = tpu.matmul %51, %53, %cst_52 {dimension_numbers = #tpu.dot_dimension_numbers<[1], [0], [0], [1], [0, 0, 1, 1], [], []>} : vector<4x512xf32>, vector<512x98xf32>, vector<4x98xf32> -> vector<4x98xf32>
    %55 = arith.addf %48, %54 : vector<4x98xf32>
    %c5 = arith.constant 5 : index
    %c0_53 = arith.constant 0 : index
    %c0_54 = arith.constant 0 : index
    %56 = vector.load %arg8[%c5, %c0_53, %c0_54] : memref<9x4x4xbf16, #tpu.memory_space<vmem>>, vector<1x4x4xbf16>
    %57 = vector.shape_cast %56 : vector<1x4x4xbf16> to vector<4x4xbf16>
    %cst_55 = arith.constant dense<0.000000e+00> : vector<4x512xf32>
    %58 = tpu.matmul %57, %14, %cst_55 {dimension_numbers = #tpu.dot_dimension_numbers<[1], [0], [0], [1], [0, 0, 1, 1], [], []>} : vector<4x4xbf16>, vector<4x512xbf16>, vector<4x512xf32> -> vector<4x512xf32>
    %c5_56 = arith.constant 5 : index
    %c0_57 = arith.constant 0 : index
    %c0_58 = arith.constant 0 : index
    %59 = vector.load %arg10[%c5_56, %c0_57, %c0_58] : memref<9x512x98xf32, #tpu.memory_space<vmem>>, vector<1x512x98xf32>
    %60 = vector.shape_cast %59 : vector<1x512x98xf32> to vector<512x98xf32>
    %cst_59 = arith.constant dense<0.000000e+00> : vector<4x98xf32>
    %61 = tpu.matmul %58, %60, %cst_59 {dimension_numbers = #tpu.dot_dimension_numbers<[1], [0], [0], [1], [0, 0, 1, 1], [], []>} : vector<4x512xf32>, vector<512x98xf32>, vector<4x98xf32> -> vector<4x98xf32>
    %62 = arith.addf %55, %61 : vector<4x98xf32>
    %c6 = arith.constant 6 : index
    %c0_60 = arith.constant 0 : index
    %c0_61 = arith.constant 0 : index
    %63 = vector.load %arg8[%c6, %c0_60, %c0_61] : memref<9x4x4xbf16, #tpu.memory_space<vmem>>, vector<1x4x4xbf16>
    %64 = vector.shape_cast %63 : vector<1x4x4xbf16> to vector<4x4xbf16>
    %cst_62 = arith.constant dense<0.000000e+00> : vector<4x512xf32>
    %65 = tpu.matmul %64, %14, %cst_62 {dimension_numbers = #tpu.dot_dimension_numbers<[1], [0], [0], [1], [0, 0, 1, 1], [], []>} : vector<4x4xbf16>, vector<4x512xbf16>, vector<4x512xf32> -> vector<4x512xf32>
    %c6_63 = arith.constant 6 : index
    %c0_64 = arith.constant 0 : index
    %c0_65 = arith.constant 0 : index
    %66 = vector.load %arg10[%c6_63, %c0_64, %c0_65] : memref<9x512x98xf32, #tpu.memory_space<vmem>>, vector<1x512x98xf32>
    %67 = vector.shape_cast %66 : vector<1x512x98xf32> to vector<512x98xf32>
    %cst_66 = arith.constant dense<0.000000e+00> : vector<4x98xf32>
    %68 = tpu.matmul %65, %67, %cst_66 {dimension_numbers = #tpu.dot_dimension_numbers<[1], [0], [0], [1], [0, 0, 1, 1], [], []>} : vector<4x512xf32>, vector<512x98xf32>, vector<4x98xf32> -> vector<4x98xf32>
    %69 = arith.addf %62, %68 : vector<4x98xf32>
    %c7 = arith.constant 7 : index
    %c0_67 = arith.constant 0 : index
    %c0_68 = arith.constant 0 : index
    %70 = vector.load %arg8[%c7, %c0_67, %c0_68] : memref<9x4x4xbf16, #tpu.memory_space<vmem>>, vector<1x4x4xbf16>
    %71 = vector.shape_cast %70 : vector<1x4x4xbf16> to vector<4x4xbf16>
    %cst_69 = arith.constant dense<0.000000e+00> : vector<4x512xf32>
    %72 = tpu.matmul %71, %14, %cst_69 {dimension_numbers = #tpu.dot_dimension_numbers<[1], [0], [0], [1], [0, 0, 1, 1], [], []>} : vector<4x4xbf16>, vector<4x512xbf16>, vector<4x512xf32> -> vector<4x512xf32>
    %c7_70 = arith.constant 7 : index
    %c0_71 = arith.constant 0 : index
    %c0_72 = arith.constant 0 : index
    %73 = vector.load %arg10[%c7_70, %c0_71, %c0_72] : memref<9x512x98xf32, #tpu.memory_space<vmem>>, vector<1x512x98xf32>
    %74 = vector.shape_cast %73 : vector<1x512x98xf32> to vector<512x98xf32>
    %cst_73 = arith.constant dense<0.000000e+00> : vector<4x98xf32>
    %75 = tpu.matmul %72, %74, %cst_73 {dimension_numbers = #tpu.dot_dimension_numbers<[1], [0], [0], [1], [0, 0, 1, 1], [], []>} : vector<4x512xf32>, vector<512x98xf32>, vector<4x98xf32> -> vector<4x98xf32>
    %76 = arith.addf %69, %75 : vector<4x98xf32>
    %c8 = arith.constant 8 : index
    %c0_74 = arith.constant 0 : index
    %c0_75 = arith.constant 0 : index
    %77 = vector.load %arg8[%c8, %c0_74, %c0_75] : memref<9x4x4xbf16, #tpu.memory_space<vmem>>, vector<1x4x4xbf16>
    %78 = vector.shape_cast %77 : vector<1x4x4xbf16> to vector<4x4xbf16>
    %cst_76 = arith.constant dense<0.000000e+00> : vector<4x512xf32>
    %79 = tpu.matmul %78, %14, %cst_76 {dimension_numbers = #tpu.dot_dimension_numbers<[1], [0], [0], [1], [0, 0, 1, 1], [], []>} : vector<4x4xbf16>, vector<4x512xbf16>, vector<4x512xf32> -> vector<4x512xf32>
    %c8_77 = arith.constant 8 : index
    %c0_78 = arith.constant 0 : index
    %c0_79 = arith.constant 0 : index
    %80 = vector.load %arg10[%c8_77, %c0_78, %c0_79] : memref<9x512x98xf32, #tpu.memory_space<vmem>>, vector<1x512x98xf32>
    %81 = vector.shape_cast %80 : vector<1x512x98xf32> to vector<512x98xf32>
    %cst_80 = arith.constant dense<0.000000e+00> : vector<4x98xf32>
    %82 = tpu.matmul %79, %81, %cst_80 {dimension_numbers = #tpu.dot_dimension_numbers<[1], [0], [0], [1], [0, 0, 1, 1], [], []>} : vector<4x512xf32>, vector<512x98xf32>, vector<4x98xf32> -> vector<4x98xf32>
    %83 = arith.addf %76, %82 : vector<4x98xf32>
    %c0_81 = arith.constant 0 : index
    %c0_82 = arith.constant 0 : index
    %84 = vector.load %arg9[%c0_81, %c0_82] : memref<4x1xf32, #tpu.memory_space<vmem>>, vector<4x1xf32>
    %85 = vector.broadcast %84 : vector<4x1xf32> to vector<4x98xf32>
    %86 = arith.addf %83, %85 : vector<4x98xf32>
    %87 = vector.extract_strided_slice %86 {offsets = [0, 0], sizes = [4, 7], strides = [1, 1]} : vector<4x98xf32> to vector<4x7xf32>
    %88 = vector.extract_strided_slice %86 {offsets = [0, 7], sizes = [4, 7], strides = [1, 1]} : vector<4x98xf32> to vector<4x7xf32>
    %89 = arith.maximumf %87, %88 : vector<4x7xf32>
    %90 = vector.extract_strided_slice %86 {offsets = [0, 14], sizes = [4, 7], strides = [1, 1]} : vector<4x98xf32> to vector<4x7xf32>
    %91 = arith.maximumf %89, %90 : vector<4x7xf32>
    %92 = vector.extract_strided_slice %86 {offsets = [0, 21], sizes = [4, 7], strides = [1, 1]} : vector<4x98xf32> to vector<4x7xf32>
    %93 = arith.maximumf %91, %92 : vector<4x7xf32>
    %94 = vector.extract_strided_slice %86 {offsets = [0, 28], sizes = [4, 7], strides = [1, 1]} : vector<4x98xf32> to vector<4x7xf32>
    %95 = arith.maximumf %93, %94 : vector<4x7xf32>
    %96 = vector.extract_strided_slice %86 {offsets = [0, 35], sizes = [4, 7], strides = [1, 1]} : vector<4x98xf32> to vector<4x7xf32>
    %97 = arith.maximumf %95, %96 : vector<4x7xf32>
    %98 = vector.extract_strided_slice %86 {offsets = [0, 42], sizes = [4, 7], strides = [1, 1]} : vector<4x98xf32> to vector<4x7xf32>
    %99 = arith.maximumf %97, %98 : vector<4x7xf32>
    %cst_83 = arith.constant dense<0xFF800000> : vector<4xf32>
    %100 = vector.multi_reduction <maximumf>, %99, %cst_83 [1] : vector<4x7xf32> to vector<4xf32>
    %101 = vector.shape_cast %100 : vector<4xf32> to vector<4x1xf32>
    %102 = vector.extract_strided_slice %86 {offsets = [0, 49], sizes = [4, 7], strides = [1, 1]} : vector<4x98xf32> to vector<4x7xf32>
    %103 = vector.extract_strided_slice %86 {offsets = [0, 56], sizes = [4, 7], strides = [1, 1]} : vector<4x98xf32> to vector<4x7xf32>
    %104 = arith.maximumf %102, %103 : vector<4x7xf32>
    %105 = vector.extract_strided_slice %86 {offsets = [0, 63], sizes = [4, 7], strides = [1, 1]} : vector<4x98xf32> to vector<4x7xf32>
    %106 = arith.maximumf %104, %105 : vector<4x7xf32>
    %107 = vector.extract_strided_slice %86 {offsets = [0, 70], sizes = [4, 7], strides = [1, 1]} : vector<4x98xf32> to vector<4x7xf32>
    %108 = arith.maximumf %106, %107 : vector<4x7xf32>
    %109 = vector.extract_strided_slice %86 {offsets = [0, 77], sizes = [4, 7], strides = [1, 1]} : vector<4x98xf32> to vector<4x7xf32>
    %110 = arith.maximumf %108, %109 : vector<4x7xf32>
    %111 = vector.extract_strided_slice %86 {offsets = [0, 84], sizes = [4, 7], strides = [1, 1]} : vector<4x98xf32> to vector<4x7xf32>
    %112 = arith.maximumf %110, %111 : vector<4x7xf32>
    %113 = vector.extract_strided_slice %86 {offsets = [0, 91], sizes = [4, 7], strides = [1, 1]} : vector<4x98xf32> to vector<4x7xf32>
    %114 = arith.maximumf %112, %113 : vector<4x7xf32>
    %cst_84 = arith.constant dense<0xFF800000> : vector<4xf32>
    %115 = vector.multi_reduction <maximumf>, %114, %cst_84 [1] : vector<4x7xf32> to vector<4xf32>
    %116 = vector.shape_cast %115 : vector<4xf32> to vector<4x1xf32>
    %117 = tpu.concatenate %101, %116 in 1 : vector<4x1xf32>, vector<4x1xf32> -> vector<4x2xf32>
    %118 = arith.truncf %117 : vector<4x2xf32> to vector<4x2xbf16>
    %cst_85 = arith.constant 0.000000e+00 : f32
    %119 = vector.broadcast %cst_85 : f32 to vector<4x2xf32>
    %c0_86 = arith.constant 0 : index
    %c0_87 = arith.constant 0 : index
    %c0_88 = arith.constant 0 : index
    %120 = vector.load %arg11[%c0_86, %c0_87, %c0_88] : memref<9x4x4xbf16, #tpu.memory_space<vmem>>, vector<1x4x4xbf16>
    %121 = vector.shape_cast %120 : vector<1x4x4xbf16> to vector<4x4xbf16>
    %cst_89 = arith.constant dense<0.000000e+00> : vector<4x2xf32>
    %122 = tpu.matmul %121, %118, %cst_89 {dimension_numbers = #tpu.dot_dimension_numbers<[1], [0], [0], [1], [0, 0, 1, 1], [], []>} : vector<4x4xbf16>, vector<4x2xbf16>, vector<4x2xf32> -> vector<4x2xf32>
    %c0_90 = arith.constant 0 : index
    %c0_91 = arith.constant 0 : index
    %c0_92 = arith.constant 0 : index
    %123 = vector.load %arg17[%c0_90, %c0_91, %c0_92] : memref<9x2x2xf32, #tpu.memory_space<vmem>>, vector<1x2x2xf32>
    %124 = vector.shape_cast %123 : vector<1x2x2xf32> to vector<2x2xf32>
    %cst_93 = arith.constant dense<0.000000e+00> : vector<4x2xf32>
    %125 = tpu.matmul %122, %124, %cst_93 {dimension_numbers = #tpu.dot_dimension_numbers<[1], [0], [0], [1], [0, 0, 1, 1], [], []>} : vector<4x2xf32>, vector<2x2xf32>, vector<4x2xf32> -> vector<4x2xf32>
    %126 = arith.addf %119, %125 : vector<4x2xf32>
    %c1_94 = arith.constant 1 : index
    %c0_95 = arith.constant 0 : index
    %c0_96 = arith.constant 0 : index
    %127 = vector.load %arg11[%c1_94, %c0_95, %c0_96] : memref<9x4x4xbf16, #tpu.memory_space<vmem>>, vector<1x4x4xbf16>
    %128 = vector.shape_cast %127 : vector<1x4x4xbf16> to vector<4x4xbf16>
    %cst_97 = arith.constant dense<0.000000e+00> : vector<4x2xf32>
    %129 = tpu.matmul %128, %118, %cst_97 {dimension_numbers = #tpu.dot_dimension_numbers<[1], [0], [0], [1], [0, 0, 1, 1], [], []>} : vector<4x4xbf16>, vector<4x2xbf16>, vector<4x2xf32> -> vector<4x2xf32>
    %c1_98 = arith.constant 1 : index
    %c0_99 = arith.constant 0 : index
    %c0_100 = arith.constant 0 : index
    %130 = vector.load %arg17[%c1_98, %c0_99, %c0_100] : memref<9x2x2xf32, #tpu.memory_space<vmem>>, vector<1x2x2xf32>
    %131 = vector.shape_cast %130 : vector<1x2x2xf32> to vector<2x2xf32>
    %cst_101 = arith.constant dense<0.000000e+00> : vector<4x2xf32>
    %132 = tpu.matmul %129, %131, %cst_101 {dimension_numbers = #tpu.dot_dimension_numbers<[1], [0], [0], [1], [0, 0, 1, 1], [], []>} : vector<4x2xf32>, vector<2x2xf32>, vector<4x2xf32> -> vector<4x2xf32>
    %133 = arith.addf %126, %132 : vector<4x2xf32>
    %c2_102 = arith.constant 2 : index
    %c0_103 = arith.constant 0 : index
    %c0_104 = arith.constant 0 : index
    %134 = vector.load %arg11[%c2_102, %c0_103, %c0_104] : memref<9x4x4xbf16, #tpu.memory_space<vmem>>, vector<1x4x4xbf16>
    %135 = vector.shape_cast %134 : vector<1x4x4xbf16> to vector<4x4xbf16>
    %cst_105 = arith.constant dense<0.000000e+00> : vector<4x2xf32>
    %136 = tpu.matmul %135, %118, %cst_105 {dimension_numbers = #tpu.dot_dimension_numbers<[1], [0], [0], [1], [0, 0, 1, 1], [], []>} : vector<4x4xbf16>, vector<4x2xbf16>, vector<4x2xf32> -> vector<4x2xf32>
    %c2_106 = arith.constant 2 : index
    %c0_107 = arith.constant 0 : index
    %c0_108 = arith.constant 0 : index
    %137 = vector.load %arg17[%c2_106, %c0_107, %c0_108] : memref<9x2x2xf32, #tpu.memory_space<vmem>>, vector<1x2x2xf32>
    %138 = vector.shape_cast %137 : vector<1x2x2xf32> to vector<2x2xf32>
    %cst_109 = arith.constant dense<0.000000e+00> : vector<4x2xf32>
    %139 = tpu.matmul %136, %138, %cst_109 {dimension_numbers = #tpu.dot_dimension_numbers<[1], [0], [0], [1], [0, 0, 1, 1], [], []>} : vector<4x2xf32>, vector<2x2xf32>, vector<4x2xf32> -> vector<4x2xf32>
    %140 = arith.addf %133, %139 : vector<4x2xf32>
    %c3_110 = arith.constant 3 : index
    %c0_111 = arith.constant 0 : index
    %c0_112 = arith.constant 0 : index
    %141 = vector.load %arg11[%c3_110, %c0_111, %c0_112] : memref<9x4x4xbf16, #tpu.memory_space<vmem>>, vector<1x4x4xbf16>
    %142 = vector.shape_cast %141 : vector<1x4x4xbf16> to vector<4x4xbf16>
    %cst_113 = arith.constant dense<0.000000e+00> : vector<4x2xf32>
    %143 = tpu.matmul %142, %118, %cst_113 {dimension_numbers = #tpu.dot_dimension_numbers<[1], [0], [0], [1], [0, 0, 1, 1], [], []>} : vector<4x4xbf16>, vector<4x2xbf16>, vector<4x2xf32> -> vector<4x2xf32>
    %c3_114 = arith.constant 3 : index
    %c0_115 = arith.constant 0 : index
    %c0_116 = arith.constant 0 : index
    %144 = vector.load %arg17[%c3_114, %c0_115, %c0_116] : memref<9x2x2xf32, #tpu.memory_space<vmem>>, vector<1x2x2xf32>
    %145 = vector.shape_cast %144 : vector<1x2x2xf32> to vector<2x2xf32>
    %cst_117 = arith.constant dense<0.000000e+00> : vector<4x2xf32>
    %146 = tpu.matmul %143, %145, %cst_117 {dimension_numbers = #tpu.dot_dimension_numbers<[1], [0], [0], [1], [0, 0, 1, 1], [], []>} : vector<4x2xf32>, vector<2x2xf32>, vector<4x2xf32> -> vector<4x2xf32>
    %147 = arith.addf %140, %146 : vector<4x2xf32>
    %c4_118 = arith.constant 4 : index
    %c0_119 = arith.constant 0 : index
    %c0_120 = arith.constant 0 : index
    %148 = vector.load %arg11[%c4_118, %c0_119, %c0_120] : memref<9x4x4xbf16, #tpu.memory_space<vmem>>, vector<1x4x4xbf16>
    %149 = vector.shape_cast %148 : vector<1x4x4xbf16> to vector<4x4xbf16>
    %cst_121 = arith.constant dense<0.000000e+00> : vector<4x2xf32>
    %150 = tpu.matmul %149, %118, %cst_121 {dimension_numbers = #tpu.dot_dimension_numbers<[1], [0], [0], [1], [0, 0, 1, 1], [], []>} : vector<4x4xbf16>, vector<4x2xbf16>, vector<4x2xf32> -> vector<4x2xf32>
    %c4_122 = arith.constant 4 : index
    %c0_123 = arith.constant 0 : index
    %c0_124 = arith.constant 0 : index
    %151 = vector.load %arg17[%c4_122, %c0_123, %c0_124] : memref<9x2x2xf32, #tpu.memory_space<vmem>>, vector<1x2x2xf32>
    %152 = vector.shape_cast %151 : vector<1x2x2xf32> to vector<2x2xf32>
    %cst_125 = arith.constant dense<0.000000e+00> : vector<4x2xf32>
    %153 = tpu.matmul %150, %152, %cst_125 {dimension_numbers = #tpu.dot_dimension_numbers<[1], [0], [0], [1], [0, 0, 1, 1], [], []>} : vector<4x2xf32>, vector<2x2xf32>, vector<4x2xf32> -> vector<4x2xf32>
    %154 = arith.addf %147, %153 : vector<4x2xf32>
    %c5_126 = arith.constant 5 : index
    %c0_127 = arith.constant 0 : index
    %c0_128 = arith.constant 0 : index
    %155 = vector.load %arg11[%c5_126, %c0_127, %c0_128] : memref<9x4x4xbf16, #tpu.memory_space<vmem>>, vector<1x4x4xbf16>
    %156 = vector.shape_cast %155 : vector<1x4x4xbf16> to vector<4x4xbf16>
    %cst_129 = arith.constant dense<0.000000e+00> : vector<4x2xf32>
    %157 = tpu.matmul %156, %118, %cst_129 {dimension_numbers = #tpu.dot_dimension_numbers<[1], [0], [0], [1], [0, 0, 1, 1], [], []>} : vector<4x4xbf16>, vector<4x2xbf16>, vector<4x2xf32> -> vector<4x2xf32>
    %c5_130 = arith.constant 5 : index
    %c0_131 = arith.constant 0 : index
    %c0_132 = arith.constant 0 : index
    %158 = vector.load %arg17[%c5_130, %c0_131, %c0_132] : memref<9x2x2xf32, #tpu.memory_space<vmem>>, vector<1x2x2xf32>
    %159 = vector.shape_cast %158 : vector<1x2x2xf32> to vector<2x2xf32>
    %cst_133 = arith.constant dense<0.000000e+00> : vector<4x2xf32>
    %160 = tpu.matmul %157, %159, %cst_133 {dimension_numbers = #tpu.dot_dimension_numbers<[1], [0], [0], [1], [0, 0, 1, 1], [], []>} : vector<4x2xf32>, vector<2x2xf32>, vector<4x2xf32> -> vector<4x2xf32>
    %161 = arith.addf %154, %160 : vector<4x2xf32>
    %c6_134 = arith.constant 6 : index
    %c0_135 = arith.constant 0 : index
    %c0_136 = arith.constant 0 : index
    %162 = vector.load %arg11[%c6_134, %c0_135, %c0_136] : memref<9x4x4xbf16, #tpu.memory_space<vmem>>, vector<1x4x4xbf16>
    %163 = vector.shape_cast %162 : vector<1x4x4xbf16> to vector<4x4xbf16>
    %cst_137 = arith.constant dense<0.000000e+00> : vector<4x2xf32>
    %164 = tpu.matmul %163, %118, %cst_137 {dimension_numbers = #tpu.dot_dimension_numbers<[1], [0], [0], [1], [0, 0, 1, 1], [], []>} : vector<4x4xbf16>, vector<4x2xbf16>, vector<4x2xf32> -> vector<4x2xf32>
    %c6_138 = arith.constant 6 : index
    %c0_139 = arith.constant 0 : index
    %c0_140 = arith.constant 0 : index
    %165 = vector.load %arg17[%c6_138, %c0_139, %c0_140] : memref<9x2x2xf32, #tpu.memory_space<vmem>>, vector<1x2x2xf32>
    %166 = vector.shape_cast %165 : vector<1x2x2xf32> to vector<2x2xf32>
    %cst_141 = arith.constant dense<0.000000e+00> : vector<4x2xf32>
    %167 = tpu.matmul %164, %166, %cst_141 {dimension_numbers = #tpu.dot_dimension_numbers<[1], [0], [0], [1], [0, 0, 1, 1], [], []>} : vector<4x2xf32>, vector<2x2xf32>, vector<4x2xf32> -> vector<4x2xf32>
    %168 = arith.addf %161, %167 : vector<4x2xf32>
    %c7_142 = arith.constant 7 : index
    %c0_143 = arith.constant 0 : index
    %c0_144 = arith.constant 0 : index
    %169 = vector.load %arg11[%c7_142, %c0_143, %c0_144] : memref<9x4x4xbf16, #tpu.memory_space<vmem>>, vector<1x4x4xbf16>
    %170 = vector.shape_cast %169 : vector<1x4x4xbf16> to vector<4x4xbf16>
    %cst_145 = arith.constant dense<0.000000e+00> : vector<4x2xf32>
    %171 = tpu.matmul %170, %118, %cst_145 {dimension_numbers = #tpu.dot_dimension_numbers<[1], [0], [0], [1], [0, 0, 1, 1], [], []>} : vector<4x4xbf16>, vector<4x2xbf16>, vector<4x2xf32> -> vector<4x2xf32>
    %c7_146 = arith.constant 7 : index
    %c0_147 = arith.constant 0 : index
    %c0_148 = arith.constant 0 : index
    %172 = vector.load %arg17[%c7_146, %c0_147, %c0_148] : memref<9x2x2xf32, #tpu.memory_space<vmem>>, vector<1x2x2xf32>
    %173 = vector.shape_cast %172 : vector<1x2x2xf32> to vector<2x2xf32>
    %cst_149 = arith.constant dense<0.000000e+00> : vector<4x2xf32>
    %174 = tpu.matmul %171, %173, %cst_149 {dimension_numbers = #tpu.dot_dimension_numbers<[1], [0], [0], [1], [0, 0, 1, 1], [], []>} : vector<4x2xf32>, vector<2x2xf32>, vector<4x2xf32> -> vector<4x2xf32>
    %175 = arith.addf %168, %174 : vector<4x2xf32>
    %c8_150 = arith.constant 8 : index
    %c0_151 = arith.constant 0 : index
    %c0_152 = arith.constant 0 : index
    %176 = vector.load %arg11[%c8_150, %c0_151, %c0_152] : memref<9x4x4xbf16, #tpu.memory_space<vmem>>, vector<1x4x4xbf16>
    %177 = vector.shape_cast %176 : vector<1x4x4xbf16> to vector<4x4xbf16>
    %cst_153 = arith.constant dense<0.000000e+00> : vector<4x2xf32>
    %178 = tpu.matmul %177, %118, %cst_153 {dimension_numbers = #tpu.dot_dimension_numbers<[1], [0], [0], [1], [0, 0, 1, 1], [], []>} : vector<4x4xbf16>, vector<4x2xbf16>, vector<4x2xf32> -> vector<4x2xf32>
    %c8_154 = arith.constant 8 : index
    %c0_155 = arith.constant 0 : index
    %c0_156 = arith.constant 0 : index
    %179 = vector.load %arg17[%c8_154, %c0_155, %c0_156] : memref<9x2x2xf32, #tpu.memory_space<vmem>>, vector<1x2x2xf32>
    %180 = vector.shape_cast %179 : vector<1x2x2xf32> to vector<2x2xf32>
    %cst_157 = arith.constant dense<0.000000e+00> : vector<4x2xf32>
    %181 = tpu.matmul %178, %180, %cst_157 {dimension_numbers = #tpu.dot_dimension_numbers<[1], [0], [0], [1], [0, 0, 1, 1], [], []>} : vector<4x2xf32>, vector<2x2xf32>, vector<4x2xf32> -> vector<4x2xf32>
    %182 = arith.addf %175, %181 : vector<4x2xf32>
    %c0_158 = arith.constant 0 : index
    %c0_159 = arith.constant 0 : index
    %183 = vector.load %arg12[%c0_158, %c0_159] : memref<4x1xf32, #tpu.memory_space<vmem>>, vector<4x1xf32>
    %184 = vector.broadcast %183 : vector<4x1xf32> to vector<4x2xf32>
    %185 = arith.addf %182, %184 : vector<4x2xf32>
    %cst_160 = arith.constant 0.000000e+00 : f32
    %186 = vector.broadcast %cst_160 : f32 to vector<4x2xf32>
    %187 = arith.maximumf %185, %186 : vector<4x2xf32>
    %188 = arith.truncf %187 : vector<4x2xf32> to vector<4x2xbf16>
    %cst_161 = arith.constant 0.000000e+00 : f32
    %189 = vector.broadcast %cst_161 : f32 to vector<4x2xf32>
    %c0_162 = arith.constant 0 : index
    %c0_163 = arith.constant 0 : index
    %c0_164 = arith.constant 0 : index
    %190 = vector.load %arg13[%c0_162, %c0_163, %c0_164] : memref<9x4x4xbf16, #tpu.memory_space<vmem>>, vector<1x4x4xbf16>
    %191 = vector.shape_cast %190 : vector<1x4x4xbf16> to vector<4x4xbf16>
    %cst_165 = arith.constant dense<0.000000e+00> : vector<4x2xf32>
    %192 = tpu.matmul %191, %188, %cst_165 {dimension_numbers = #tpu.dot_dimension_numbers<[1], [0], [0], [1], [0, 0, 1, 1], [], []>} : vector<4x4xbf16>, vector<4x2xbf16>, vector<4x2xf32> -> vector<4x2xf32>
    %c0_166 = arith.constant 0 : index
    %c0_167 = arith.constant 0 : index
    %c0_168 = arith.constant 0 : index
    %193 = vector.load %arg17[%c0_166, %c0_167, %c0_168] : memref<9x2x2xf32, #tpu.memory_space<vmem>>, vector<1x2x2xf32>
    %194 = vector.shape_cast %193 : vector<1x2x2xf32> to vector<2x2xf32>
    %cst_169 = arith.constant dense<0.000000e+00> : vector<4x2xf32>
    %195 = tpu.matmul %192, %194, %cst_169 {dimension_numbers = #tpu.dot_dimension_numbers<[1], [0], [0], [1], [0, 0, 1, 1], [], []>} : vector<4x2xf32>, vector<2x2xf32>, vector<4x2xf32> -> vector<4x2xf32>
    %196 = arith.addf %189, %195 : vector<4x2xf32>
    %c1_170 = arith.constant 1 : index
    %c0_171 = arith.constant 0 : index
    %c0_172 = arith.constant 0 : index
    %197 = vector.load %arg13[%c1_170, %c0_171, %c0_172] : memref<9x4x4xbf16, #tpu.memory_space<vmem>>, vector<1x4x4xbf16>
    %198 = vector.shape_cast %197 : vector<1x4x4xbf16> to vector<4x4xbf16>
    %cst_173 = arith.constant dense<0.000000e+00> : vector<4x2xf32>
    %199 = tpu.matmul %198, %188, %cst_173 {dimension_numbers = #tpu.dot_dimension_numbers<[1], [0], [0], [1], [0, 0, 1, 1], [], []>} : vector<4x4xbf16>, vector<4x2xbf16>, vector<4x2xf32> -> vector<4x2xf32>
    %c1_174 = arith.constant 1 : index
    %c0_175 = arith.constant 0 : index
    %c0_176 = arith.constant 0 : index
    %200 = vector.load %arg17[%c1_174, %c0_175, %c0_176] : memref<9x2x2xf32, #tpu.memory_space<vmem>>, vector<1x2x2xf32>
    %201 = vector.shape_cast %200 : vector<1x2x2xf32> to vector<2x2xf32>
    %cst_177 = arith.constant dense<0.000000e+00> : vector<4x2xf32>
    %202 = tpu.matmul %199, %201, %cst_177 {dimension_numbers = #tpu.dot_dimension_numbers<[1], [0], [0], [1], [0, 0, 1, 1], [], []>} : vector<4x2xf32>, vector<2x2xf32>, vector<4x2xf32> -> vector<4x2xf32>
    %203 = arith.addf %196, %202 : vector<4x2xf32>
    %c2_178 = arith.constant 2 : index
    %c0_179 = arith.constant 0 : index
    %c0_180 = arith.constant 0 : index
    %204 = vector.load %arg13[%c2_178, %c0_179, %c0_180] : memref<9x4x4xbf16, #tpu.memory_space<vmem>>, vector<1x4x4xbf16>
    %205 = vector.shape_cast %204 : vector<1x4x4xbf16> to vector<4x4xbf16>
    %cst_181 = arith.constant dense<0.000000e+00> : vector<4x2xf32>
    %206 = tpu.matmul %205, %188, %cst_181 {dimension_numbers = #tpu.dot_dimension_numbers<[1], [0], [0], [1], [0, 0, 1, 1], [], []>} : vector<4x4xbf16>, vector<4x2xbf16>, vector<4x2xf32> -> vector<4x2xf32>
    %c2_182 = arith.constant 2 : index
    %c0_183 = arith.constant 0 : index
    %c0_184 = arith.constant 0 : index
    %207 = vector.load %arg17[%c2_182, %c0_183, %c0_184] : memref<9x2x2xf32, #tpu.memory_space<vmem>>, vector<1x2x2xf32>
    %208 = vector.shape_cast %207 : vector<1x2x2xf32> to vector<2x2xf32>
    %cst_185 = arith.constant dense<0.000000e+00> : vector<4x2xf32>
    %209 = tpu.matmul %206, %208, %cst_185 {dimension_numbers = #tpu.dot_dimension_numbers<[1], [0], [0], [1], [0, 0, 1, 1], [], []>} : vector<4x2xf32>, vector<2x2xf32>, vector<4x2xf32> -> vector<4x2xf32>
    %210 = arith.addf %203, %209 : vector<4x2xf32>
    %c3_186 = arith.constant 3 : index
    %c0_187 = arith.constant 0 : index
    %c0_188 = arith.constant 0 : index
    %211 = vector.load %arg13[%c3_186, %c0_187, %c0_188] : memref<9x4x4xbf16, #tpu.memory_space<vmem>>, vector<1x4x4xbf16>
    %212 = vector.shape_cast %211 : vector<1x4x4xbf16> to vector<4x4xbf16>
    %cst_189 = arith.constant dense<0.000000e+00> : vector<4x2xf32>
    %213 = tpu.matmul %212, %188, %cst_189 {dimension_numbers = #tpu.dot_dimension_numbers<[1], [0], [0], [1], [0, 0, 1, 1], [], []>} : vector<4x4xbf16>, vector<4x2xbf16>, vector<4x2xf32> -> vector<4x2xf32>
    %c3_190 = arith.constant 3 : index
    %c0_191 = arith.constant 0 : index
    %c0_192 = arith.constant 0 : index
    %214 = vector.load %arg17[%c3_190, %c0_191, %c0_192] : memref<9x2x2xf32, #tpu.memory_space<vmem>>, vector<1x2x2xf32>
    %215 = vector.shape_cast %214 : vector<1x2x2xf32> to vector<2x2xf32>
    %cst_193 = arith.constant dense<0.000000e+00> : vector<4x2xf32>
    %216 = tpu.matmul %213, %215, %cst_193 {dimension_numbers = #tpu.dot_dimension_numbers<[1], [0], [0], [1], [0, 0, 1, 1], [], []>} : vector<4x2xf32>, vector<2x2xf32>, vector<4x2xf32> -> vector<4x2xf32>
    %217 = arith.addf %210, %216 : vector<4x2xf32>
    %c4_194 = arith.constant 4 : index
    %c0_195 = arith.constant 0 : index
    %c0_196 = arith.constant 0 : index
    %218 = vector.load %arg13[%c4_194, %c0_195, %c0_196] : memref<9x4x4xbf16, #tpu.memory_space<vmem>>, vector<1x4x4xbf16>
    %219 = vector.shape_cast %218 : vector<1x4x4xbf16> to vector<4x4xbf16>
    %cst_197 = arith.constant dense<0.000000e+00> : vector<4x2xf32>
    %220 = tpu.matmul %219, %188, %cst_197 {dimension_numbers = #tpu.dot_dimension_numbers<[1], [0], [0], [1], [0, 0, 1, 1], [], []>} : vector<4x4xbf16>, vector<4x2xbf16>, vector<4x2xf32> -> vector<4x2xf32>
    %c4_198 = arith.constant 4 : index
    %c0_199 = arith.constant 0 : index
    %c0_200 = arith.constant 0 : index
    %221 = vector.load %arg17[%c4_198, %c0_199, %c0_200] : memref<9x2x2xf32, #tpu.memory_space<vmem>>, vector<1x2x2xf32>
    %222 = vector.shape_cast %221 : vector<1x2x2xf32> to vector<2x2xf32>
    %cst_201 = arith.constant dense<0.000000e+00> : vector<4x2xf32>
    %223 = tpu.matmul %220, %222, %cst_201 {dimension_numbers = #tpu.dot_dimension_numbers<[1], [0], [0], [1], [0, 0, 1, 1], [], []>} : vector<4x2xf32>, vector<2x2xf32>, vector<4x2xf32> -> vector<4x2xf32>
    %224 = arith.addf %217, %223 : vector<4x2xf32>
    %c5_202 = arith.constant 5 : index
    %c0_203 = arith.constant 0 : index
    %c0_204 = arith.constant 0 : index
    %225 = vector.load %arg13[%c5_202, %c0_203, %c0_204] : memref<9x4x4xbf16, #tpu.memory_space<vmem>>, vector<1x4x4xbf16>
    %226 = vector.shape_cast %225 : vector<1x4x4xbf16> to vector<4x4xbf16>
    %cst_205 = arith.constant dense<0.000000e+00> : vector<4x2xf32>
    %227 = tpu.matmul %226, %188, %cst_205 {dimension_numbers = #tpu.dot_dimension_numbers<[1], [0], [0], [1], [0, 0, 1, 1], [], []>} : vector<4x4xbf16>, vector<4x2xbf16>, vector<4x2xf32> -> vector<4x2xf32>
    %c5_206 = arith.constant 5 : index
    %c0_207 = arith.constant 0 : index
    %c0_208 = arith.constant 0 : index
    %228 = vector.load %arg17[%c5_206, %c0_207, %c0_208] : memref<9x2x2xf32, #tpu.memory_space<vmem>>, vector<1x2x2xf32>
    %229 = vector.shape_cast %228 : vector<1x2x2xf32> to vector<2x2xf32>
    %cst_209 = arith.constant dense<0.000000e+00> : vector<4x2xf32>
    %230 = tpu.matmul %227, %229, %cst_209 {dimension_numbers = #tpu.dot_dimension_numbers<[1], [0], [0], [1], [0, 0, 1, 1], [], []>} : vector<4x2xf32>, vector<2x2xf32>, vector<4x2xf32> -> vector<4x2xf32>
    %231 = arith.addf %224, %230 : vector<4x2xf32>
    %c6_210 = arith.constant 6 : index
    %c0_211 = arith.constant 0 : index
    %c0_212 = arith.constant 0 : index
    %232 = vector.load %arg13[%c6_210, %c0_211, %c0_212] : memref<9x4x4xbf16, #tpu.memory_space<vmem>>, vector<1x4x4xbf16>
    %233 = vector.shape_cast %232 : vector<1x4x4xbf16> to vector<4x4xbf16>
    %cst_213 = arith.constant dense<0.000000e+00> : vector<4x2xf32>
    %234 = tpu.matmul %233, %188, %cst_213 {dimension_numbers = #tpu.dot_dimension_numbers<[1], [0], [0], [1], [0, 0, 1, 1], [], []>} : vector<4x4xbf16>, vector<4x2xbf16>, vector<4x2xf32> -> vector<4x2xf32>
    %c6_214 = arith.constant 6 : index
    %c0_215 = arith.constant 0 : index
    %c0_216 = arith.constant 0 : index
    %235 = vector.load %arg17[%c6_214, %c0_215, %c0_216] : memref<9x2x2xf32, #tpu.memory_space<vmem>>, vector<1x2x2xf32>
    %236 = vector.shape_cast %235 : vector<1x2x2xf32> to vector<2x2xf32>
    %cst_217 = arith.constant dense<0.000000e+00> : vector<4x2xf32>
    %237 = tpu.matmul %234, %236, %cst_217 {dimension_numbers = #tpu.dot_dimension_numbers<[1], [0], [0], [1], [0, 0, 1, 1], [], []>} : vector<4x2xf32>, vector<2x2xf32>, vector<4x2xf32> -> vector<4x2xf32>
    %238 = arith.addf %231, %237 : vector<4x2xf32>
    %c7_218 = arith.constant 7 : index
    %c0_219 = arith.constant 0 : index
    %c0_220 = arith.constant 0 : index
    %239 = vector.load %arg13[%c7_218, %c0_219, %c0_220] : memref<9x4x4xbf16, #tpu.memory_space<vmem>>, vector<1x4x4xbf16>
    %240 = vector.shape_cast %239 : vector<1x4x4xbf16> to vector<4x4xbf16>
    %cst_221 = arith.constant dense<0.000000e+00> : vector<4x2xf32>
    %241 = tpu.matmul %240, %188, %cst_221 {dimension_numbers = #tpu.dot_dimension_numbers<[1], [0], [0], [1], [0, 0, 1, 1], [], []>} : vector<4x4xbf16>, vector<4x2xbf16>, vector<4x2xf32> -> vector<4x2xf32>
    %c7_222 = arith.constant 7 : index
    %c0_223 = arith.constant 0 : index
    %c0_224 = arith.constant 0 : index
    %242 = vector.load %arg17[%c7_222, %c0_223, %c0_224] : memref<9x2x2xf32, #tpu.memory_space<vmem>>, vector<1x2x2xf32>
    %243 = vector.shape_cast %242 : vector<1x2x2xf32> to vector<2x2xf32>
    %cst_225 = arith.constant dense<0.000000e+00> : vector<4x2xf32>
    %244 = tpu.matmul %241, %243, %cst_225 {dimension_numbers = #tpu.dot_dimension_numbers<[1], [0], [0], [1], [0, 0, 1, 1], [], []>} : vector<4x2xf32>, vector<2x2xf32>, vector<4x2xf32> -> vector<4x2xf32>
    %245 = arith.addf %238, %244 : vector<4x2xf32>
    %c8_226 = arith.constant 8 : index
    %c0_227 = arith.constant 0 : index
    %c0_228 = arith.constant 0 : index
    %246 = vector.load %arg13[%c8_226, %c0_227, %c0_228] : memref<9x4x4xbf16, #tpu.memory_space<vmem>>, vector<1x4x4xbf16>
    %247 = vector.shape_cast %246 : vector<1x4x4xbf16> to vector<4x4xbf16>
    %cst_229 = arith.constant dense<0.000000e+00> : vector<4x2xf32>
    %248 = tpu.matmul %247, %188, %cst_229 {dimension_numbers = #tpu.dot_dimension_numbers<[1], [0], [0], [1], [0, 0, 1, 1], [], []>} : vector<4x4xbf16>, vector<4x2xbf16>, vector<4x2xf32> -> vector<4x2xf32>
    %c8_230 = arith.constant 8 : index
    %c0_231 = arith.constant 0 : index
    %c0_232 = arith.constant 0 : index
    %249 = vector.load %arg17[%c8_230, %c0_231, %c0_232] : memref<9x2x2xf32, #tpu.memory_space<vmem>>, vector<1x2x2xf32>
    %250 = vector.shape_cast %249 : vector<1x2x2xf32> to vector<2x2xf32>
    %cst_233 = arith.constant dense<0.000000e+00> : vector<4x2xf32>
    %251 = tpu.matmul %248, %250, %cst_233 {dimension_numbers = #tpu.dot_dimension_numbers<[1], [0], [0], [1], [0, 0, 1, 1], [], []>} : vector<4x2xf32>, vector<2x2xf32>, vector<4x2xf32> -> vector<4x2xf32>
    %252 = arith.addf %245, %251 : vector<4x2xf32>
    %c0_234 = arith.constant 0 : index
    %c0_235 = arith.constant 0 : index
    %253 = vector.load %arg14[%c0_234, %c0_235] : memref<4x1xf32, #tpu.memory_space<vmem>>, vector<4x1xf32>
    %254 = vector.broadcast %253 : vector<4x1xf32> to vector<4x2xf32>
    %255 = arith.addf %252, %254 : vector<4x2xf32>
    %cst_236 = arith.constant 0.000000e+00 : f32
    %256 = vector.broadcast %cst_236 : f32 to vector<4x2xf32>
    %257 = arith.maximumf %255, %256 : vector<4x2xf32>
    %258 = arith.truncf %257 : vector<4x2xf32> to vector<4x2xbf16>
    %cst_237 = arith.constant 0.000000e+00 : f32
    %259 = vector.broadcast %cst_237 : f32 to vector<4x2xf32>
    %c0_238 = arith.constant 0 : index
    %c0_239 = arith.constant 0 : index
    %c0_240 = arith.constant 0 : index
    %260 = vector.load %arg15[%c0_238, %c0_239, %c0_240] : memref<9x4x4xbf16, #tpu.memory_space<vmem>>, vector<1x4x4xbf16>
    %261 = vector.shape_cast %260 : vector<1x4x4xbf16> to vector<4x4xbf16>
    %cst_241 = arith.constant dense<0.000000e+00> : vector<4x2xf32>
    %262 = tpu.matmul %261, %258, %cst_241 {dimension_numbers = #tpu.dot_dimension_numbers<[1], [0], [0], [1], [0, 0, 1, 1], [], []>} : vector<4x4xbf16>, vector<4x2xbf16>, vector<4x2xf32> -> vector<4x2xf32>
    %c0_242 = arith.constant 0 : index
    %c0_243 = arith.constant 0 : index
    %c0_244 = arith.constant 0 : index
    %263 = vector.load %arg17[%c0_242, %c0_243, %c0_244] : memref<9x2x2xf32, #tpu.memory_space<vmem>>, vector<1x2x2xf32>
    %264 = vector.shape_cast %263 : vector<1x2x2xf32> to vector<2x2xf32>
    %cst_245 = arith.constant dense<0.000000e+00> : vector<4x2xf32>
    %265 = tpu.matmul %262, %264, %cst_245 {dimension_numbers = #tpu.dot_dimension_numbers<[1], [0], [0], [1], [0, 0, 1, 1], [], []>} : vector<4x2xf32>, vector<2x2xf32>, vector<4x2xf32> -> vector<4x2xf32>
    %266 = arith.addf %259, %265 : vector<4x2xf32>
    %c1_246 = arith.constant 1 : index
    %c0_247 = arith.constant 0 : index
    %c0_248 = arith.constant 0 : index
    %267 = vector.load %arg15[%c1_246, %c0_247, %c0_248] : memref<9x4x4xbf16, #tpu.memory_space<vmem>>, vector<1x4x4xbf16>
    %268 = vector.shape_cast %267 : vector<1x4x4xbf16> to vector<4x4xbf16>
    %cst_249 = arith.constant dense<0.000000e+00> : vector<4x2xf32>
    %269 = tpu.matmul %268, %258, %cst_249 {dimension_numbers = #tpu.dot_dimension_numbers<[1], [0], [0], [1], [0, 0, 1, 1], [], []>} : vector<4x4xbf16>, vector<4x2xbf16>, vector<4x2xf32> -> vector<4x2xf32>
    %c1_250 = arith.constant 1 : index
    %c0_251 = arith.constant 0 : index
    %c0_252 = arith.constant 0 : index
    %270 = vector.load %arg17[%c1_250, %c0_251, %c0_252] : memref<9x2x2xf32, #tpu.memory_space<vmem>>, vector<1x2x2xf32>
    %271 = vector.shape_cast %270 : vector<1x2x2xf32> to vector<2x2xf32>
    %cst_253 = arith.constant dense<0.000000e+00> : vector<4x2xf32>
    %272 = tpu.matmul %269, %271, %cst_253 {dimension_numbers = #tpu.dot_dimension_numbers<[1], [0], [0], [1], [0, 0, 1, 1], [], []>} : vector<4x2xf32>, vector<2x2xf32>, vector<4x2xf32> -> vector<4x2xf32>
    %273 = arith.addf %266, %272 : vector<4x2xf32>
    %c2_254 = arith.constant 2 : index
    %c0_255 = arith.constant 0 : index
    %c0_256 = arith.constant 0 : index
    %274 = vector.load %arg15[%c2_254, %c0_255, %c0_256] : memref<9x4x4xbf16, #tpu.memory_space<vmem>>, vector<1x4x4xbf16>
    %275 = vector.shape_cast %274 : vector<1x4x4xbf16> to vector<4x4xbf16>
    %cst_257 = arith.constant dense<0.000000e+00> : vector<4x2xf32>
    %276 = tpu.matmul %275, %258, %cst_257 {dimension_numbers = #tpu.dot_dimension_numbers<[1], [0], [0], [1], [0, 0, 1, 1], [], []>} : vector<4x4xbf16>, vector<4x2xbf16>, vector<4x2xf32> -> vector<4x2xf32>
    %c2_258 = arith.constant 2 : index
    %c0_259 = arith.constant 0 : index
    %c0_260 = arith.constant 0 : index
    %277 = vector.load %arg17[%c2_258, %c0_259, %c0_260] : memref<9x2x2xf32, #tpu.memory_space<vmem>>, vector<1x2x2xf32>
    %278 = vector.shape_cast %277 : vector<1x2x2xf32> to vector<2x2xf32>
    %cst_261 = arith.constant dense<0.000000e+00> : vector<4x2xf32>
    %279 = tpu.matmul %276, %278, %cst_261 {dimension_numbers = #tpu.dot_dimension_numbers<[1], [0], [0], [1], [0, 0, 1, 1], [], []>} : vector<4x2xf32>, vector<2x2xf32>, vector<4x2xf32> -> vector<4x2xf32>
    %280 = arith.addf %273, %279 : vector<4x2xf32>
    %c3_262 = arith.constant 3 : index
    %c0_263 = arith.constant 0 : index
    %c0_264 = arith.constant 0 : index
    %281 = vector.load %arg15[%c3_262, %c0_263, %c0_264] : memref<9x4x4xbf16, #tpu.memory_space<vmem>>, vector<1x4x4xbf16>
    %282 = vector.shape_cast %281 : vector<1x4x4xbf16> to vector<4x4xbf16>
    %cst_265 = arith.constant dense<0.000000e+00> : vector<4x2xf32>
    %283 = tpu.matmul %282, %258, %cst_265 {dimension_numbers = #tpu.dot_dimension_numbers<[1], [0], [0], [1], [0, 0, 1, 1], [], []>} : vector<4x4xbf16>, vector<4x2xbf16>, vector<4x2xf32> -> vector<4x2xf32>
    %c3_266 = arith.constant 3 : index
    %c0_267 = arith.constant 0 : index
    %c0_268 = arith.constant 0 : index
    %284 = vector.load %arg17[%c3_266, %c0_267, %c0_268] : memref<9x2x2xf32, #tpu.memory_space<vmem>>, vector<1x2x2xf32>
    %285 = vector.shape_cast %284 : vector<1x2x2xf32> to vector<2x2xf32>
    %cst_269 = arith.constant dense<0.000000e+00> : vector<4x2xf32>
    %286 = tpu.matmul %283, %285, %cst_269 {dimension_numbers = #tpu.dot_dimension_numbers<[1], [0], [0], [1], [0, 0, 1, 1], [], []>} : vector<4x2xf32>, vector<2x2xf32>, vector<4x2xf32> -> vector<4x2xf32>
    %287 = arith.addf %280, %286 : vector<4x2xf32>
    %c4_270 = arith.constant 4 : index
    %c0_271 = arith.constant 0 : index
    %c0_272 = arith.constant 0 : index
    %288 = vector.load %arg15[%c4_270, %c0_271, %c0_272] : memref<9x4x4xbf16, #tpu.memory_space<vmem>>, vector<1x4x4xbf16>
    %289 = vector.shape_cast %288 : vector<1x4x4xbf16> to vector<4x4xbf16>
    %cst_273 = arith.constant dense<0.000000e+00> : vector<4x2xf32>
    %290 = tpu.matmul %289, %258, %cst_273 {dimension_numbers = #tpu.dot_dimension_numbers<[1], [0], [0], [1], [0, 0, 1, 1], [], []>} : vector<4x4xbf16>, vector<4x2xbf16>, vector<4x2xf32> -> vector<4x2xf32>
    %c4_274 = arith.constant 4 : index
    %c0_275 = arith.constant 0 : index
    %c0_276 = arith.constant 0 : index
    %291 = vector.load %arg17[%c4_274, %c0_275, %c0_276] : memref<9x2x2xf32, #tpu.memory_space<vmem>>, vector<1x2x2xf32>
    %292 = vector.shape_cast %291 : vector<1x2x2xf32> to vector<2x2xf32>
    %cst_277 = arith.constant dense<0.000000e+00> : vector<4x2xf32>
    %293 = tpu.matmul %290, %292, %cst_277 {dimension_numbers = #tpu.dot_dimension_numbers<[1], [0], [0], [1], [0, 0, 1, 1], [], []>} : vector<4x2xf32>, vector<2x2xf32>, vector<4x2xf32> -> vector<4x2xf32>
    %294 = arith.addf %287, %293 : vector<4x2xf32>
    %c5_278 = arith.constant 5 : index
    %c0_279 = arith.constant 0 : index
    %c0_280 = arith.constant 0 : index
    %295 = vector.load %arg15[%c5_278, %c0_279, %c0_280] : memref<9x4x4xbf16, #tpu.memory_space<vmem>>, vector<1x4x4xbf16>
    %296 = vector.shape_cast %295 : vector<1x4x4xbf16> to vector<4x4xbf16>
    %cst_281 = arith.constant dense<0.000000e+00> : vector<4x2xf32>
    %297 = tpu.matmul %296, %258, %cst_281 {dimension_numbers = #tpu.dot_dimension_numbers<[1], [0], [0], [1], [0, 0, 1, 1], [], []>} : vector<4x4xbf16>, vector<4x2xbf16>, vector<4x2xf32> -> vector<4x2xf32>
    %c5_282 = arith.constant 5 : index
    %c0_283 = arith.constant 0 : index
    %c0_284 = arith.constant 0 : index
    %298 = vector.load %arg17[%c5_282, %c0_283, %c0_284] : memref<9x2x2xf32, #tpu.memory_space<vmem>>, vector<1x2x2xf32>
    %299 = vector.shape_cast %298 : vector<1x2x2xf32> to vector<2x2xf32>
    %cst_285 = arith.constant dense<0.000000e+00> : vector<4x2xf32>
    %300 = tpu.matmul %297, %299, %cst_285 {dimension_numbers = #tpu.dot_dimension_numbers<[1], [0], [0], [1], [0, 0, 1, 1], [], []>} : vector<4x2xf32>, vector<2x2xf32>, vector<4x2xf32> -> vector<4x2xf32>
    %301 = arith.addf %294, %300 : vector<4x2xf32>
    %c6_286 = arith.constant 6 : index
    %c0_287 = arith.constant 0 : index
    %c0_288 = arith.constant 0 : index
    %302 = vector.load %arg15[%c6_286, %c0_287, %c0_288] : memref<9x4x4xbf16, #tpu.memory_space<vmem>>, vector<1x4x4xbf16>
    %303 = vector.shape_cast %302 : vector<1x4x4xbf16> to vector<4x4xbf16>
    %cst_289 = arith.constant dense<0.000000e+00> : vector<4x2xf32>
    %304 = tpu.matmul %303, %258, %cst_289 {dimension_numbers = #tpu.dot_dimension_numbers<[1], [0], [0], [1], [0, 0, 1, 1], [], []>} : vector<4x4xbf16>, vector<4x2xbf16>, vector<4x2xf32> -> vector<4x2xf32>
    %c6_290 = arith.constant 6 : index
    %c0_291 = arith.constant 0 : index
    %c0_292 = arith.constant 0 : index
    %305 = vector.load %arg17[%c6_290, %c0_291, %c0_292] : memref<9x2x2xf32, #tpu.memory_space<vmem>>, vector<1x2x2xf32>
    %306 = vector.shape_cast %305 : vector<1x2x2xf32> to vector<2x2xf32>
    %cst_293 = arith.constant dense<0.000000e+00> : vector<4x2xf32>
    %307 = tpu.matmul %304, %306, %cst_293 {dimension_numbers = #tpu.dot_dimension_numbers<[1], [0], [0], [1], [0, 0, 1, 1], [], []>} : vector<4x2xf32>, vector<2x2xf32>, vector<4x2xf32> -> vector<4x2xf32>
    %308 = arith.addf %301, %307 : vector<4x2xf32>
    %c7_294 = arith.constant 7 : index
    %c0_295 = arith.constant 0 : index
    %c0_296 = arith.constant 0 : index
    %309 = vector.load %arg15[%c7_294, %c0_295, %c0_296] : memref<9x4x4xbf16, #tpu.memory_space<vmem>>, vector<1x4x4xbf16>
    %310 = vector.shape_cast %309 : vector<1x4x4xbf16> to vector<4x4xbf16>
    %cst_297 = arith.constant dense<0.000000e+00> : vector<4x2xf32>
    %311 = tpu.matmul %310, %258, %cst_297 {dimension_numbers = #tpu.dot_dimension_numbers<[1], [0], [0], [1], [0, 0, 1, 1], [], []>} : vector<4x4xbf16>, vector<4x2xbf16>, vector<4x2xf32> -> vector<4x2xf32>
    %c7_298 = arith.constant 7 : index
    %c0_299 = arith.constant 0 : index
    %c0_300 = arith.constant 0 : index
    %312 = vector.load %arg17[%c7_298, %c0_299, %c0_300] : memref<9x2x2xf32, #tpu.memory_space<vmem>>, vector<1x2x2xf32>
    %313 = vector.shape_cast %312 : vector<1x2x2xf32> to vector<2x2xf32>
    %cst_301 = arith.constant dense<0.000000e+00> : vector<4x2xf32>
    %314 = tpu.matmul %311, %313, %cst_301 {dimension_numbers = #tpu.dot_dimension_numbers<[1], [0], [0], [1], [0, 0, 1, 1], [], []>} : vector<4x2xf32>, vector<2x2xf32>, vector<4x2xf32> -> vector<4x2xf32>
    %315 = arith.addf %308, %314 : vector<4x2xf32>
    %c8_302 = arith.constant 8 : index
    %c0_303 = arith.constant 0 : index
    %c0_304 = arith.constant 0 : index
    %316 = vector.load %arg15[%c8_302, %c0_303, %c0_304] : memref<9x4x4xbf16, #tpu.memory_space<vmem>>, vector<1x4x4xbf16>
    %317 = vector.shape_cast %316 : vector<1x4x4xbf16> to vector<4x4xbf16>
    %cst_305 = arith.constant dense<0.000000e+00> : vector<4x2xf32>
    %318 = tpu.matmul %317, %258, %cst_305 {dimension_numbers = #tpu.dot_dimension_numbers<[1], [0], [0], [1], [0, 0, 1, 1], [], []>} : vector<4x4xbf16>, vector<4x2xbf16>, vector<4x2xf32> -> vector<4x2xf32>
    %c8_306 = arith.constant 8 : index
    %c0_307 = arith.constant 0 : index
    %c0_308 = arith.constant 0 : index
    %319 = vector.load %arg17[%c8_306, %c0_307, %c0_308] : memref<9x2x2xf32, #tpu.memory_space<vmem>>, vector<1x2x2xf32>
    %320 = vector.shape_cast %319 : vector<1x2x2xf32> to vector<2x2xf32>
    %cst_309 = arith.constant dense<0.000000e+00> : vector<4x2xf32>
    %321 = tpu.matmul %318, %320, %cst_309 {dimension_numbers = #tpu.dot_dimension_numbers<[1], [0], [0], [1], [0, 0, 1, 1], [], []>} : vector<4x2xf32>, vector<2x2xf32>, vector<4x2xf32> -> vector<4x2xf32>
    %322 = arith.addf %315, %321 : vector<4x2xf32>
    %c0_310 = arith.constant 0 : index
    %c0_311 = arith.constant 0 : index
    %323 = vector.load %arg16[%c0_310, %c0_311] : memref<4x1xf32, #tpu.memory_space<vmem>>, vector<4x1xf32>
    %324 = vector.broadcast %323 : vector<4x1xf32> to vector<4x2xf32>
    %325 = arith.addf %322, %324 : vector<4x2xf32>
    %c0_312 = arith.constant 0 : index
    %c0_313 = arith.constant 0 : index
    %326 = vector.load %arg20[%c0_312, %c0_313] : memref<2x512xf32, #tpu.memory_space<vmem>>, vector<2x512xf32>
    %cst_314 = arith.constant dense<0.000000e+00> : vector<4x512xf32>
    %327 = tpu.matmul %325, %326, %cst_314 {dimension_numbers = #tpu.dot_dimension_numbers<[1], [0], [0], [1], [0, 0, 1, 1], [], []>} : vector<4x2xf32>, vector<2x512xf32>, vector<4x512xf32> -> vector<4x512xf32>
    %328 = arith.addf %327, %19 : vector<4x512xf32>
    %329 = arith.truncf %328 : vector<4x512xf32> to vector<4x512xbf16>
    %c0_315 = arith.constant 0 : index
    %c0_316 = arith.constant 0 : index
    %330 = vector.load %arg18[%c0_315, %c0_316] : memref<16x4xbf16, #tpu.memory_space<vmem>>, vector<16x4xbf16>
    %cst_317 = arith.constant dense<0.000000e+00> : vector<16x512xf32>
    %331 = tpu.matmul %330, %329, %cst_317 {dimension_numbers = #tpu.dot_dimension_numbers<[1], [0], [0], [1], [0, 0, 1, 1], [], []>} : vector<16x4xbf16>, vector<4x512xbf16>, vector<16x512xf32> -> vector<16x512xf32>
    %c0_318 = arith.constant 0 : index
    %c0_319 = arith.constant 0 : index
    %332 = vector.load %arg19[%c0_318, %c0_319] : memref<16x1xf32, #tpu.memory_space<vmem>>, vector<16x1xf32>
    %333 = vector.broadcast %332 : vector<16x1xf32> to vector<16x512xf32>
    %334 = arith.addf %331, %333 : vector<16x512xf32>
    %335 = arith.negf %334 : vector<16x512xf32>
    %336 = math.exp %335 : vector<16x512xf32>
    %cst_320 = arith.constant 1.000000e+00 : f32
    %337 = vector.broadcast %cst_320 : f32 to vector<16x512xf32>
    %338 = arith.addf %337, %336 : vector<16x512xf32>
    %339 = arith.divf %337, %338 : vector<16x512xf32>
    %340 = vector.extract_strided_slice %339 {offsets = [0, 0], sizes = [8, 512], strides = [1, 1]} : vector<16x512xf32> to vector<8x512xf32>
    %341 = arith.mulf %7, %340 : vector<8x512xf32>
    %c0_321 = arith.constant 0 : index
    %c0_322 = arith.constant 0 : index
    %342 = vector.load %arg21[%c0_321, %c0_322] : memref<8x512xf32, #tpu.memory_space<vmem>>, vector<8x512xf32>
    tpu.vector_store %arg21[%c0_321, %c0_322], %341 {strides = array<i32>} : memref<8x512xf32, #tpu.memory_space<vmem>>, vector<8x512xf32>,
    %c4_i32 = arith.constant 4 : i32
    %343 = tpu.dynamic_rotate %7 by %c4_i32 dim 0 : vector<8x512xf32>, i32 -> vector<8x512xf32>
    %344 = vector.extract_strided_slice %339 {offsets = [8, 0], sizes = [8, 512], strides = [1, 1]} : vector<16x512xf32> to vector<8x512xf32>
    %345 = arith.mulf %343, %344 : vector<8x512xf32>
    %c0_323 = arith.constant 0 : index
    %c0_324 = arith.constant 0 : index
    %346 = vector.load %arg22[%c0_323, %c0_324] : memref<8x512xf32, #tpu.memory_space<vmem>>, vector<8x512xf32>
    tpu.vector_store %arg22[%c0_323, %c0_324], %345 {strides = array<i32>} : memref<8x512xf32, #tpu.memory_space<vmem>>, vector<8x512xf32>,
    return
  }
  func.func @transform_0(%arg0: i32) -> (i32, i32) {
    %c0_i32 = arith.constant 0 : i32
    %c0_i32_0 = arith.constant 0 : i32
    %c0_i32_1 = arith.constant 0 : i32
    return %c0_i32, %c0_i32_0 : i32, i32
  }
  func.func @transform_1(%arg0: i32) -> (i32, i32) {
    %c0_i32 = arith.constant 0 : i32
    %c0_i32_0 = arith.constant 0 : i32
    %c0_i32_1 = arith.constant 0 : i32
    return %c0_i32, %c0_i32_0 : i32, i32
  }
  func.func @transform_2(%arg0: i32) -> (i32, i32) {
    %c0_i32 = arith.constant 0 : i32
    %c0_i32_0 = arith.constant 0 : i32
    %c0_i32_1 = arith.constant 0 : i32
    return %c0_i32, %c0_i32_0 : i32, i32
  }
  func.func @transform_3(%arg0: i32) -> (i32, i32) {
    %c0_i32 = arith.constant 0 : i32
    %c0_i32_0 = arith.constant 0 : i32
    %c0_i32_1 = arith.constant 0 : i32
    return %c0_i32, %c0_i32_0 : i32, i32
  }
  func.func @transform_4(%arg0: i32) -> (i32, i32) {
    %c0_i32 = arith.constant 0 : i32
    %c0_i32_0 = arith.constant 0 : i32
    %c0_i32_1 = arith.constant 0 : i32
    return %c0_i32, %c0_i32_0 : i32, i32
  }
  func.func @transform_5(%arg0: i32) -> (i32, i32) {
    %c0_i32 = arith.constant 0 : i32
    %c0_i32_0 = arith.constant 0 : i32
    %c0_i32_1 = arith.constant 0 : i32
    return %c0_i32, %c0_i32_0 : i32, i32
  }
  func.func @transform_6(%arg0: i32) -> (i32, i32) {
    %c0_i32 = arith.constant 0 : i32
    %c0_i32_0 = arith.constant 0 : i32
    %c0_i32_1 = arith.constant 0 : i32
    return %c0_i32, %c0_i32_0 : i32, i32
  }
  func.func @transform_7(%arg0: i32) -> (i32, i32, i32) {
    %c0_i32 = arith.constant 0 : i32
    %c0_i32_0 = arith.constant 0 : i32
    %c0_i32_1 = arith.constant 0 : i32
    %c0_i32_2 = arith.constant 0 : i32
    return %c0_i32, %c0_i32_0, %c0_i32_1 : i32, i32, i32
  }
  func.func @transform_8(%arg0: i32) -> (i32, i32) {
    %c0_i32 = arith.constant 0 : i32
    %c0_i32_0 = arith.constant 0 : i32
    %c0_i32_1 = arith.constant 0 : i32
    return %c0_i32, %c0_i32_0 : i32, i32
  }
  func.func @transform_9(%arg0: i32) -> (i32, i32, i32) {
    %c0_i32 = arith.constant 0 : i32
    %c0_i32_0 = arith.constant 0 : i32
    %c0_i32_1 = arith.constant 0 : i32
    %c0_i32_2 = arith.constant 0 : i32
    return %c0_i32, %c0_i32_0, %c0_i32_1 : i32, i32, i32
  }
  func.func @transform_10(%arg0: i32) -> (i32, i32, i32) {
    %c0_i32 = arith.constant 0 : i32
    %c0_i32_0 = arith.constant 0 : i32
    %c0_i32_1 = arith.constant 0 : i32
    %c0_i32_2 = arith.constant 0 : i32
    return %c0_i32, %c0_i32_0, %c0_i32_1 : i32, i32, i32
  }
  func.func @transform_11(%arg0: i32) -> (i32, i32) {
    %c0_i32 = arith.constant 0 : i32
    %c0_i32_0 = arith.constant 0 : i32
    %c0_i32_1 = arith.constant 0 : i32
    return %c0_i32, %c0_i32_0 : i32, i32
  }
  func.func @transform_12(%arg0: i32) -> (i32, i32, i32) {
    %c0_i32 = arith.constant 0 : i32
    %c0_i32_0 = arith.constant 0 : i32
    %c0_i32_1 = arith.constant 0 : i32
    %c0_i32_2 = arith.constant 0 : i32
    return %c0_i32, %c0_i32_0, %c0_i32_1 : i32, i32, i32
  }
  func.func @transform_13(%arg0: i32) -> (i32, i32) {
    %c0_i32 = arith.constant 0 : i32
    %c0_i32_0 = arith.constant 0 : i32
    %c0_i32_1 = arith.constant 0 : i32
    return %c0_i32, %c0_i32_0 : i32, i32
  }
  func.func @transform_14(%arg0: i32) -> (i32, i32, i32) {
    %c0_i32 = arith.constant 0 : i32
    %c0_i32_0 = arith.constant 0 : i32
    %c0_i32_1 = arith.constant 0 : i32
    %c0_i32_2 = arith.constant 0 : i32
    return %c0_i32, %c0_i32_0, %c0_i32_1 : i32, i32, i32
  }
  func.func @transform_15(%arg0: i32) -> (i32, i32) {
    %c0_i32 = arith.constant 0 : i32
    %c0_i32_0 = arith.constant 0 : i32
    %c0_i32_1 = arith.constant 0 : i32
    return %c0_i32, %c0_i32_0 : i32, i32
  }
  func.func @transform_16(%arg0: i32) -> (i32, i32, i32) {
    %c0_i32 = arith.constant 0 : i32
    %c0_i32_0 = arith.constant 0 : i32
    %c0_i32_1 = arith.constant 0 : i32
    %c0_i32_2 = arith.constant 0 : i32
    return %c0_i32, %c0_i32_0, %c0_i32_1 : i32, i32, i32
  }
  func.func @transform_17(%arg0: i32) -> (i32, i32) {
    %c0_i32 = arith.constant 0 : i32
    %c0_i32_0 = arith.constant 0 : i32
    %c0_i32_1 = arith.constant 0 : i32
    return %c0_i32, %c0_i32_0 : i32, i32
  }
  func.func @transform_18(%arg0: i32) -> (i32, i32) {
    %c0_i32 = arith.constant 0 : i32
    %c0_i32_0 = arith.constant 0 : i32
    %c0_i32_1 = arith.constant 0 : i32
    return %c0_i32, %c0_i32_0 : i32, i32
  }
  func.func @transform_19(%arg0: i32) -> (i32, i32) {
    %c0_i32 = arith.constant 0 : i32
    %c0_i32_0 = arith.constant 0 : i32
    %c0_i32_1 = arith.constant 0 : i32
    return %c0_i32, %c0_i32_0 : i32, i32
  }
  func.func @transform_20(%arg0: i32) -> (i32, i32) {
    %c0_i32 = arith.constant 0 : i32
    %c0_i32_0 = arith.constant 0 : i32
    %c0_i32_1 = arith.constant 0 : i32
    return %c0_i32, %c0_i32_0 : i32, i32
  }
  func.func @transform_21(%arg0: i32) -> (i32, i32) {
    %c0_i32 = arith.constant 0 : i32
    %c0_i32_0 = arith.constant 0 : i32
    %c0_i32_1 = arith.constant 0 : i32
    return %c0_i32, %c0_i32_0 : i32, i32
  }
}

</mosaic_0001>

<bundles_post_ra>
// kernel: bi_spf_forward.1
= control target key start
LH: loop header
LB: loop body
LE: loop exit
PB: predicated region body
PF: predicated region fallthrough
CT: control target
= control target key end

     0   :  { %v8811_v1 = vmov 0   ;;  %vm297_vm0 = vcmask 130048   ;;  %vm402_vm1 = vcmask 1043456   ;;  %vm398_vm2 = vcmask 64512   ;;  %s8815_s23 = smov 107   ;;  %s8817_s24 = smov 93   ;;  %s11482_s0 = inlined_call_operand.vmem [shape: bf16[144,512], index: 0, kind: input, shape index: {}]   ;;  %s11483_s1 = inlined_call_operand.vmem [shape: bf16[8,144], index: 1, kind: input, shape index: {}]   ;;  %s11484_s2 = inlined_call_operand.vmem [shape: f32[8,1], index: 2, kind: input, shape index: {}]   ;;  %s11485_s4 = inlined_call_operand.vmem [shape: f32[4,1], index: 4, kind: input, shape index: {}]   ;;  %s11486_s3 = inlined_call_operand.vmem [shape: bf16[4,8], index: 3, kind: input, shape index: {}]   ;;  %s11487_s5 = inlined_call_operand.vmem [shape: bf16[4,4], index: 5, kind: input, shape index: {}]   ;;  %s11488_s7 = inlined_call_operand.vmem [shape: bf16[9,4,4], index: 7, kind: input, shape index: {}]   ;;  %s11489_s9 = inlined_call_operand.vmem [shape: f32[9,512,98], index: 9, kind: input, shape index: {}]   ;;  %s11490_s8 = inlined_call_operand.vmem [shape: f32[4,1], index: 8, kind: input, shape index: {}]   ;;  %s11491_s13 = inlined_call_operand.vmem [shape: f32[4,1], index: 13, kind: input, shape index: {}]   ;;  %s11492_s15 = inlined_call_operand.vmem [shape: f32[4,1], index: 15, kind: input, shape index: {}]   ;;  %s11493_s11 = inlined_call_operand.vmem [shape: f32[4,1], index: 11, kind: input, shape index: {}]   ;;  %s11494_s18 = inlined_call_operand.vmem [shape: f32[16,1], index: 18, kind: input, shape index: {}]   ;;  %s11495_s6 = inlined_call_operand.vmem [shape: f32[4,1], index: 6, kind: input, shape index: {}]   ;;  %s11496_s10 = inlined_call_operand.vmem [shape: bf16[9,4,4], index: 10, kind: input, shape index: {}]   ;;  %s11497_s16 = inlined_call_operand.vmem [shape: f32[9,2,2], index: 16, kind: input, shape index: {}]   ;;  %s11498_s12 = inlined_call_operand.vmem [shape: bf16[9,4,4], index: 12, kind: input, shape index: {}]   ;;  %s11499_s14 = inlined_call_operand.vmem [shape: bf16[9,4,4], index: 14, kind: input, shape index: {}]   ;;  %s11500_s19 = inlined_call_operand.vmem [shape: f32[2,512], index: 19, kind: input, shape index: {}]   ;;  %s11501_s17 = inlined_call_operand.vmem [shape: bf16[16,4], index: 17, kind: input, shape index: {}]   ;;  %s11502_s20 = inlined_call_operand.vmem [shape: f32[8,512], index: 20, kind: output, shape index: {0}]   ;;  %s11503_s21 = inlined_call_operand.vmem [shape: f32[8,512], index: 21, kind: output, shape index: {1}]  }
   0x1   :  { %11505 = sst [smem:[#allocation2_spill]] %s11482_s0  ;;  %8719 = vset.pattern.permute.xlu0 %v8811_v1  ;;  %8720 = vset.pattern.permute.xlu1 %v8811_v1  ;;  %vm512_vm3 = vcmask 1041408   ;;  %vm508_vm4 = vcmask 31744   ;;  %vm3276_vm5 = vcmask 454024   ;;  %vm3272_vm6 = vcmask 52224  }
   0x2   :  { %11506 = sst [smem:[#allocation3_spill]] %s11483_s1  ;;  %vm8819_vm7 = vmmov 0   ;;  %vm3280_vm8 = vcmask 7168   ;;  %vm3378_vm9 = vcmask 15360  }
   0x3   :  { %11507 = sst [smem:[#allocation4_spill]] %s11484_s2 }
   0x4   :  { %11508 = sst [smem:[#allocation5_spill]] %s11485_s4 }
   0x5   :  { %11509 = sst [smem:[#allocation6_spill]] %s11486_s3 }
   0x6   :  { %11510 = sst [smem:[#allocation7_spill]] %s11487_s5 }
   0x7   :  { %s11511_s26 = sld [smem:[#allocation2_spill]] }
   0x8   :  { %s11512_s27 = sld [smem:[#allocation3_spill]] }
   0x9   :  { %s11513_s29 = sld [smem:[#allocation4_spill]] }
   0xa   :  { %s11514_s1 = sld [smem:[#allocation5_spill]] }
   0xb   :  { %s11516_s25 = sld [smem:[#allocation7_spill]] }
   0xd   :  { %v8721_v0 = vld [vmem:[%s11511_s26 + $0xe4] ss:$16 sps:$4 sm:$0xff]   ;;  %v8723_v2 = vld [vmem:[%s11511_s26 + $0xec] ss:$16 sps:$4 sm:$0xff]   ;;  %v8725_v3 = vld [vmem:[%s11511_s26 + $0xe0] ss:$16 sps:$4 sm:$0xff]  }
   0xe   :  { %301 = vmatprep.subr.bf16.mxu0 %v8721_v0  ;;  %v8726_v4 = vld [vmem:[%s11511_s26 + $0xe8] ss:$16 sps:$4 sm:$0xff]   ;;  %342 = vmatprep.subr.bf16.mxu1 %v8723_v2  ;;  %v8727_v5 = vld [vmem:[%s11511_s26 + $0xc4] ss:$16 sps:$4 sm:$0xff]   ;;  %v8729_v6 = vld [vmem:[%s11511_s26 + $0xcc] ss:$16 sps:$4 sm:$0xff]  }
   0xf   :  { %302 = vmatpush1.bf16.msra.mxu0 %v8725_v3  ;;  %343 = vmatpush1.bf16.msra.mxu1 %v8726_v4  ;;  %v8731_v7 = vld [vmem:[%s11511_s26 + $0xc0] ss:$16 sps:$4 sm:$0xff]   ;;  %v8732_v8 = vld [vmem:[%s11511_s26 + $0xc8] ss:$16 sps:$4 sm:$0xff]   ;;  %v8733_v9 = vld [vmem:[%s11511_s26 + $0xa4] ss:$16 sps:$4 sm:$0xff]  }
  0x10   :  { %303 = vmatprep.subr.bf16.mxu0 %v8727_v5  ;;  %344 = vmatprep.subr.bf16.mxu1 %v8729_v6  ;;  %v8735_v10 = vld [vmem:[%s11511_s26 + $0xac] ss:$16 sps:$4 sm:$0xff]   ;;  %v8737_v11 = vld [vmem:[%s11511_s26 + $0xa0] ss:$16 sps:$4 sm:$0xff]   ;;  %v8738_v12 = vld [vmem:[%s11511_s26 + $0xa8] ss:$16 sps:$4 sm:$0xff]  }
  0x11   :  { %v8739_v13 = vld [vmem:[%s11511_s26 + $0x84] ss:$16 sps:$4 sm:$0xff]   ;;  %v8741_v14 = vld [vmem:[%s11511_s26 + $0x8c] ss:$16 sps:$4 sm:$0xff]   ;;  %v8743_v15 = vld [vmem:[%s11511_s26 + $0x80] ss:$16 sps:$4 sm:$0xff]  }
  0x12   :  { %v8744_v16 = vld [vmem:[%s11511_s26 + $0x88] ss:$16 sps:$4 sm:$0xff]   ;;  %v8745_v17 = vld [vmem:[%s11511_s26 + $0x64] ss:$16 sps:$4 sm:$0xff]   ;;  %v8747_v18 = vld [vmem:[%s11511_s26 + $0x6c] ss:$16 sps:$4 sm:$0xff]  }
  0x13   :  { %304 = vmatpush1.bf16.msra.mxu0 %v8731_v7  ;;  %345 = vmatpush1.bf16.msra.mxu1 %v8732_v8  ;;  %v8749_v19 = vld [vmem:[%s11511_s26 + $0x60] ss:$16 sps:$4 sm:$0xff]   ;;  %v8750_v20 = vld [vmem:[%s11511_s26 + $0x68] ss:$16 sps:$4 sm:$0xff]   ;;  %v8751_v21 = vld [vmem:[%s11511_s26 + $0x44] ss:$16 sps:$4 sm:$0xff]  }
  0x14   :  { %305 = vmatprep.subr.bf16.mxu0 %v8733_v9  ;;  %346 = vmatprep.subr.bf16.mxu1 %v8735_v10  ;;  %v8753_v22 = vld [vmem:[%s11511_s26 + $0x4c] ss:$16 sps:$4 sm:$0xff]   ;;  %v8755_v23 = vld [vmem:[%s11511_s26 + $0x40] ss:$16 sps:$4 sm:$0xff]   ;;  %v8756_v24 = vld [vmem:[%s11511_s26 + $0x48] ss:$16 sps:$4 sm:$0xff]  }
  0x15   :  { %v8757_v25 = vld [vmem:[%s11511_s26 + $0x24] ss:$16 sps:$4 sm:$0xff]   ;;  %v8759_v26 = vld [vmem:[%s11511_s26 + $0x2c] ss:$16 sps:$4 sm:$0xff]   ;;  %v8761_v27 = vld [vmem:[%s11511_s26 + $0x20] ss:$16 sps:$4 sm:$0xff]  }
  0x16   :  { %v8762_v28 = vld [vmem:[%s11511_s26 + $0x28] ss:$16 sps:$4 sm:$0xff]   ;;  %v68_v29 = vld [vmem:[%s11512_s27] sm:$0xff]  ;;  %v8765_v32 = vld [vmem:[%s11511_s26 + $0xc] ss:$16 sps:$4 sm:$0xff]  }
  0x17   :  { %306 = vmatpush1.bf16.msra.mxu0 %v8737_v11  ;;  %347 = vmatpush1.bf16.msra.mxu1 %v8738_v12  ;;  %v105_v30 = vld [vmem:[%s11513_s29] sm:$0xff]  ;;  %v6939_v33 = vcombine.high %v68_v29, %v68_v29  ;;  %v8768_v36 = vld [vmem:[%s11511_s26 + $0x8] ss:$16 sps:$4 sm:$0xff]   ;;  %v8771_v38 = vld [vmem:[%s11511_s26 + $0x10c] ss:$16 sps:$4 sm:$0xff]   ;;  %v6938_v41 = vcombine.low %v68_v29, %v68_v29 }
  0x18   :  { %307 = vmatprep.subr.bf16.mxu0 %v8739_v13  ;;  %348 = vmatprep.subr.bf16.mxu1 %v8741_v14  ;;  %v8763_v31 = vld [vmem:[%s11511_s26 + $0x4] ss:$16 sps:$4 sm:$0xff]   ;;  %v392_v34 = vld [vmem:[%s11514_s1] sm:$0xf]  ;;  %v8774_v40 = vld [vmem:[%s11511_s26 + $0x108] ss:$16 sps:$4 sm:$0xff]  }
  0x19   :  { %108 = vperm.xlu0 %8719, %v105_v30   ;;  %6976 = vmatprep.mubr.msk.bf16.mxu0 %vm297_vm0, %v6939_v33  ;;  %v8767_v35 = vld [vmem:[%s11511_s26] ss:$16 sps:$4 sm:$0xff]   ;;  %v8769_v37 = vld [vmem:[%s11511_s26 + $0x104] ss:$16 sps:$4 sm:$0xff]   ;;  %s11515_s1 = sld [smem:[#allocation6_spill]] }
  0x1a   :  { %6977 = vmatprep.mubr.msk.bf16.mxu1 %vm297_vm0, %v6939_v33  ;;  %v8773_v39 = vld [vmem:[%s11511_s26 + $0x100] ss:$16 sps:$4 sm:$0xff]   ;;  %v7024_v33 = vld [vmem:[%s11489_s9 + $0x2e8] sm:$0xff]  ;;  %s8814_s26 = smov 100  }
  0x1b   :  { %308 = vmatpush1.bf16.msra.mxu0 %v8743_v15  ;;  %349 = vmatpush1.bf16.msra.mxu1 %v8744_v16  ;;  %v7025_v29 = vld [vmem:[%s11489_s9 + $0x2f0] sm:$0xff] }
  0x1c   :  { %309 = vmatprep.subr.bf16.mxu0 %v8745_v17  ;;  %350 = vmatprep.subr.bf16.mxu1 %v8747_v18  ;;  %v7057_v30 = vld [vmem:[%s11489_s9 + $0x3f0] sm:$0xff] }
  0x1d   :  { %395 = vperm.xlu0 %8719, %v392_v34   ;;  %v7056_v34 = vld [vmem:[%s11489_s9 + $0x3e8] sm:$0xff] }
  0x1f   :  { %310 = vmatpush1.bf16.msra.mxu0 %v8749_v19  ;;  %351 = vmatpush1.bf16.msra.mxu1 %v8750_v20  ;;  %v391_v2 = vld [vmem:[%s11515_s1] sm:$0x3]  ;;  %s8816_s1 = smov 86  }
  0x20   :  { %311 = vmatprep.subr.bf16.mxu0 %v8751_v21  ;;  %352 = vmatprep.subr.bf16.mxu1 %v8753_v22  ;;  %v501_v22 = vld [vmem:[%s11516_s25] sm:$0x3] }
  0x23   :  { %312 = vmatpush1.bf16.msra.mxu0 %v8755_v23  ;;  %353 = vmatpush1.bf16.msra.mxu1 %v8756_v24  ;;  %v607_v23 = vld [vmem:[%s11488_s7] sm:$0x3]  ;;  %v7026_v24 = vld [vmem:[%s11489_s9 + $0x2f8] sm:$0xff] }
  0x24   :  { %313 = vmatprep.subr.bf16.mxu0 %v8757_v25  ;;  %354 = vmatprep.subr.bf16.mxu1 %v8759_v26  ;;  %v7058_v25 = vld [vmem:[%s11489_s9 + $0x3f8] sm:$0xff]  ;;  %v6990_v26 = vld [vmem:[%s11488_s7 + $0x2] sm:$0x3] }
  0x27   :  { %314 = vmatpush1.bf16.msra.mxu0 %v8761_v27  ;;  %355 = vmatpush1.bf16.msra.mxu1 %v8762_v28  ;;  %v7010_v27 = vld [vmem:[%s11489_s9 + $0x278] sm:$0xff] }
  0x28   :  { %315 = vmatprep.subr.bf16.mxu0 %v8763_v31  ;;  %356 = vmatprep.subr.bf16.mxu1 %v8765_v32  ;;  %v7042_v28 = vld [vmem:[%s11489_s9 + $0x378] sm:$0xff]  ;;  %v7009_v31 = vld [vmem:[%s11489_s9 + $0x270] sm:$0xff] }
  0x29   :  { %v7041_v32 = vld [vmem:[%s11489_s9 + $0x370] sm:$0xff] }
  0x2b   :  { %316 = vmatpush1.bf16.msra.mxu0 %v8767_v35  ;;  %357 = vmatpush1.bf16.msra.mxu1 %v8768_v36  ;;  %v7008_v35 = vld [vmem:[%s11489_s9 + $0x268] sm:$0xff] }
  0x2c   :  { %331 = vmatprep.subr.bf16.mxu0 %v8769_v37  ;;  %372 = vmatprep.subr.bf16.mxu1 %v8771_v38  ;;  %v7040_v36 = vld [vmem:[%s11489_s9 + $0x368] sm:$0xff]  ;;  %v7023_v37 = vld [vmem:[%s11489_s9 + $0x2e0] sm:$0xff] }
  0x2d   :  { %v7055_v38 = vld [vmem:[%s11489_s9 + $0x3e0] sm:$0xff] }
  0x2f   :  { %332 = vmatpush2.bf16.msra.mxu0 %v8773_v39  ;;  %373 = vmatpush2.bf16.msra.mxu1 %v8774_v40  ;;  %v7007_v39 = vld [vmem:[%s11489_s9 + $0x260] sm:$0xff] }
  0x30   :  { %v7039_v40 = vld [vmem:[%s11489_s9 + $0x360] sm:$0xff] }
  0x32   :  { %334 = vmatmul.mubr.bf16.vlgmr.msra.gmra.mxu0 %v6938_v41  ;;  %375 = vmatmul.mubr.bf16.vlgmr.msra.gmra.mxu1 %v6938_v41  ;;  %v7022_v41 = vld [vmem:[%s11489_s9 + $0x2d8] sm:$0xff] }
  0x33   :  { %447 = vmatprep.mubr.bf16.mxu0 %v8811_v1  ;;  %488 = vmatprep.mubr.bf16.mxu1 %v8811_v1 }
  0x94   :  { %v109_v42 = vpop.permute.xlu0 %108 }
  0x98   :  { %v396_v3 = vpop.permute.xlu0 %395 }
  0xf2   :  { %v335_v43 = vpop.f32.mrf.mxu0  ;;  %v376_v44 = vpop.f32.mrf.mxu1 }
  0xf3   :  { %v336_v45 = vadd.f32 %v335_v43, %v109_v42  ;;  %v377_v46 = vadd.f32 %v376_v44, %v109_v42  ;;  %v7006_v43 = vld [vmem:[%s11489_s9 + $0x258] sm:$0xff] }
  0xf4   :  { %v337_v47 = vpop.f32.mrf.mxu0  ;;  %v378_v48 = vpop.f32.mrf.mxu1  ;;  %v7038_v44 = vld [vmem:[%s11489_s9 + $0x358] sm:$0xff] }
  0xf5   :  { %v9052_v49 = vmax.f32 %v336_v45, 0.0  ;;  %v9054_v50 = vmax.f32 %v377_v46, 0.0  ;;  %v338_v51 = vadd.f32 %v337_v47, %v109_v42  ;;  %v379_v52 = vadd.f32 %v378_v48, %v109_v42  ;;  %v7054_v42 = vld [vmem:[%s11489_s9 + $0x3d8] sm:$0xff]  ;;  %v7021_v45 = vld [vmem:[%s11489_s9 + $0x2d0] sm:$0xff] }
  0xf6   :  { %v339_v53 = vpop.f32.mrf.mxu0  ;;  %v380_v54 = vpop.f32.mrf.mxu1  ;;  %v7053_v46 = vld [vmem:[%s11489_s9 + $0x3d0] sm:$0xff] }
  0xf7   :  { %v9056_v55 = vmax.f32 %v338_v51, 0.0  ;;  %v9058_v56 = vmax.f32 %v379_v52, 0.0  ;;  %v387_v59 = vpack.c.bf16 %v9052_v49, %v9052_v49  ;;  %v389_v60 = vpack.c.bf16 %v9054_v50, %v9054_v50  ;;  %v7005_v47 = vld [vmem:[%s11489_s9 + $0x250] sm:$0xff]  ;;  %v7020_v51 = vld [vmem:[%s11489_s9 + $0x2c8] sm:$0xff] }
  0xf8   :  { %v340_v57 = vpop.f32.mrf.mxu0  ;;  %v381_v58 = vpop.f32.mrf.mxu1  ;;  %v7037_v48 = vld [vmem:[%s11489_s9 + $0x350] sm:$0xff]  ;;  %v7052_v52 = vld [vmem:[%s11489_s9 + $0x3c8] sm:$0xff] }
  0xf9   :  { %v388_v61 = vpack.c.bf16 %v9056_v55, %v9056_v55  ;;  %v390_v62 = vpack.c.bf16 %v9058_v56, %v9058_v56  ;;  %v404_v63 = vsel %vm402_vm1, %v387_v59, 0  ;;  %v410_v0 = vsel %vm402_vm1, %v389_v60, 0  ;;  %v7004_v53 = vld [vmem:[%s11489_s9 + $0x248] sm:$0xff]  ;;  %v7019_v57 = vld [vmem:[%s11489_s9 + $0x2c0] sm:$0xff] }
  0xfa   :  { %v7036_v54 = vld [vmem:[%s11489_s9 + $0x348] sm:$0xff]  ;;  %v7051_v58 = vld [vmem:[%s11489_s9 + $0x3c0] sm:$0xff] }
  0xfb   :  { %6978 = vmatprep.subr.msk.bf16.mxu0 %vm402_vm1, %v388_v61  ;;  %6980 = vmatprep.subr.msk.bf16.mxu1 %vm402_vm1, %v390_v62  ;;  %v7003_v59 = vld [vmem:[%s11489_s9 + $0x240] sm:$0xff]  ;;  %v7018_v61 = vld [vmem:[%s11489_s9 + $0x2b8] sm:$0xff] }
  0xfc   :  { %430 = vmatpush1.bf16.msra.mxu0 %v404_v63  ;;  %471 = vmatpush1.bf16.msra.mxu1 %v410_v0  ;;  %v7035_v60 = vld [vmem:[%s11489_s9 + $0x340] sm:$0xff]  ;;  %v7050_v62 = vld [vmem:[%s11489_s9 + $0x3b8] sm:$0xff] }
  0xfd   :  { %v7002_v63 = vld [vmem:[%s11489_s9 + $0x238] sm:$0xff] }
  0xfe   :  { %v7034_v0 = vld [vmem:[%s11489_s9 + $0x338] sm:$0xff] }
  0xff   :  { %6979 = vmatmul.mubr.msk.bf16.vlgmr.msra.gmra.mxu0 %vm398_vm2, %v391_v2  ;;  %6981 = vmatmul.mubr.msk.bf16.vlgmr.msra.gmra.mxu1 %vm398_vm2, %v391_v2  ;;  %v7017_v2 = vld [vmem:[%s11489_s9 + $0x2b0] sm:$0xff] }
 0x100   :  { %557 = vmatprep.mubr.bf16.mxu0 %v8811_v1  ;;  %598 = vmatprep.mubr.bf16.mxu1 %v8811_v1 }
 0x1bf   :  { %v449_v4 = vpop.f32.mrf.mxu0  ;;  %v490_v5 = vpop.f32.mrf.mxu1 }
 0x1c0   :  { %v450_v6 = vadd.f32 %v449_v4, %v396_v3  ;;  %v491_v7 = vadd.f32 %v490_v5, %v396_v3  ;;  %v7001_v4 = vld [vmem:[%s11489_s9 + $0x230] sm:$0xff] }
 0x1c1   :  { %v451_v8 = vpop.f32.mrf.mxu0  ;;  %v492_v9 = vpop.f32.mrf.mxu1  ;;  %v7033_v5 = vld [vmem:[%s11489_s9 + $0x330] sm:$0xff] }
 0x1c2   :  { %v497_v10 = vpack.c.bf16 %v450_v6, %v450_v6  ;;  %v499_v11 = vpack.c.bf16 %v491_v7, %v491_v7  ;;  %v452_v12 = vadd.f32 %v451_v8, %v396_v3  ;;  %v493_v13 = vadd.f32 %v492_v9, %v396_v3  ;;  %v7049_v3 = vld [vmem:[%s11489_s9 + $0x3b0] sm:$0xff]  ;;  %v7016_v6 = vld [vmem:[%s11489_s9 + $0x2a8] sm:$0xff] }
 0x1c3   :  { %v453_v14 = vpop.f32.mrf.mxu0  ;;  %v494_v15 = vpop.f32.mrf.mxu1  ;;  %v7048_v7 = vld [vmem:[%s11489_s9 + $0x3a8] sm:$0xff] }
 0x1c4   :  { %v9073_v16 = vpack.c.bf16 %v452_v12, %v452_v12  ;;  %v9075_v17 = vpack.c.bf16 %v493_v13, %v493_v13  ;;  %v9078_v20 = vsel %vm512_vm3, %v497_v10, 0  ;;  %v9081_v21 = vsel %vm512_vm3, %v499_v11, 0  ;;  %v7000_v8 = vld [vmem:[%s11489_s9 + $0x228] sm:$0xff]  ;;  %v7015_v10 = vld [vmem:[%s11489_s9 + $0x2a0] sm:$0xff]  ;;  %v7014_v14 = vld [vmem:[%s11489_s9 + $0x298] sm:$0xff] }
 0x1c5   :  { %v454_v18 = vpop.f32.mrf.mxu0  ;;  %v495_v19 = vpop.f32.mrf.mxu1  ;;  %v7032_v9 = vld [vmem:[%s11489_s9 + $0x328] sm:$0xff]  ;;  %v7047_v11 = vld [vmem:[%s11489_s9 + $0x3a0] sm:$0xff]  ;;  %v7046_v15 = vld [vmem:[%s11489_s9 + $0x398] sm:$0xff] }
 0x1c6   :  { %6982 = vmatprep.subr.msk.bf16.mxu0 %vm512_vm3, %v9073_v16  ;;  %6984 = vmatprep.subr.msk.bf16.mxu1 %vm512_vm3, %v9075_v17  ;;  %v6999_v12 = vld [vmem:[%s11489_s9 + $0x220] sm:$0xff]  ;;  %v6998_v18 = vld [vmem:[%s11489_s9 + $0x218] sm:$0xff] }
 0x1c7   :  { %540 = vmatpush1.bf16.msra.mxu0 %v9078_v20  ;;  %581 = vmatpush1.bf16.msra.mxu1 %v9081_v21  ;;  %v7031_v13 = vld [vmem:[%s11489_s9 + $0x320] sm:$0xff]  ;;  %v7030_v19 = vld [vmem:[%s11489_s9 + $0x318] sm:$0xff] }
 0x1c8   :  { %6986 = vmatprep.subr.msk.bf16.mxu0 %vm512_vm3, %v9073_v16  ;;  %6988 = vmatprep.subr.msk.bf16.mxu1 %vm512_vm3, %v9075_v17 }
 0x1ca   :  { %6983 = vmatmul.mubr.msk.bf16.vlgmr.msra.gmra.mxu0 %vm508_vm4, %v501_v22  ;;  %6985 = vmatmul.mubr.msk.bf16.vlgmr.msra.gmra.mxu1 %vm508_vm4, %v501_v22  ;;  %v7013_v22 = vld [vmem:[%s11489_s9 + $0x290] sm:$0xff] }
 0x1cb   :  { %626 = vmatpush1.bf16.msra.mxu0 %v9078_v20  ;;  %667 = vmatpush1.bf16.msra.mxu1 %v9081_v21 }
 0x1cc   :  { %6991 = vmatprep.subr.msk.bf16.mxu0 %vm512_vm3, %v9073_v16  ;;  %6993 = vmatprep.subr.msk.bf16.mxu1 %vm512_vm3, %v9075_v17 }
 0x1cd   :  { %643 = vmatprep.mubr.bf16.mxu0 %v8811_v1  ;;  %684 = vmatprep.mubr.bf16.mxu1 %v8811_v1 }
 0x1d2   :  { %6987 = vmatmul.mubr.msk.bf16.vlgmr.msra.gmra.mxu0 %vm508_vm4, %v607_v23  ;;  %6989 = vmatmul.mubr.msk.bf16.vlgmr.msra.gmra.mxu1 %vm508_vm4, %v607_v23  ;;  %v7045_v23 = vld [vmem:[%s11489_s9 + $0x390] sm:$0xff] }
 0x1d3   :  { %777 = vmatpush1.bf16.msra.mxu0 %v9078_v20  ;;  %818 = vmatpush1.bf16.msra.mxu1 %v9081_v21 }
 0x1d4   :  { %794 = vmatprep.mubr.bf16.mxu0 %v8811_v1  ;;  %835 = vmatprep.mubr.bf16.mxu1 %v8811_v1 }
 0x1d5   :  { %7674 = vmatprep.subr.mxu0 %v7026_v24  ;;  %7709 = vmatprep.subr.mxu1 %v7058_v25  ;;  %v6997_v24 = vld [vmem:[%s11489_s9 + $0x210] sm:$0xff] }
 0x1d6   :  { %v7029_v25 = vld [vmem:[%s11489_s9 + $0x310] sm:$0xff] }
 0x1da   :  { %6992 = vmatmul.mubr.msk.bf16.vlgmr.msra.gmra.mxu0 %vm508_vm4, %v6990_v26  ;;  %6994 = vmatmul.mubr.msk.bf16.vlgmr.msra.gmra.mxu1 %vm508_vm4, %v6990_v26  ;;  %v7012_v26 = vld [vmem:[%s11489_s9 + $0x288] sm:$0xff] }
 0x1db   :  { %7675 = vmatpush3.msra.mxu0 %v7010_v27  ;;  %7710 = vmatpush3.msra.mxu1 %v7042_v28  ;;  %v7044_v27 = vld [vmem:[%s11489_s9 + $0x388] sm:$0xff] }
 0x1dc   :  { %7676 = vmatprep.subr.mxu0 %v7025_v29  ;;  %7711 = vmatprep.subr.mxu1 %v7057_v30  ;;  %v6996_v28 = vld [vmem:[%s11489_s9 + $0x208] sm:$0xff]  ;;  %v7011_v30 = vld [vmem:[%s11489_s9 + $0x280] sm:$0xff] }
 0x1dd   :  { %7677 = vmatpush3.msra.mxu0 %v7009_v31  ;;  %7712 = vmatpush3.msra.mxu1 %v7041_v32  ;;  %v7028_v29 = vld [vmem:[%s11489_s9 + $0x308] sm:$0xff]  ;;  %v7043_v31 = vld [vmem:[%s11489_s9 + $0x380] sm:$0xff] }
 0x1de   :  { %7678 = vmatprep.subr.mxu0 %v7024_v33  ;;  %7713 = vmatprep.subr.mxu1 %v7056_v34  ;;  %v6995_v32 = vld [vmem:[%s11489_s9 + $0x200] sm:$0xff]  ;;  %v724_v34 = vld [vmem:[%s11489_s9 + $0xf8] sm:$0xff] }
 0x1df   :  { %7679 = vmatpush3.msra.mxu0 %v7008_v35  ;;  %7714 = vmatpush3.msra.mxu1 %v7040_v36  ;;  %v7027_v33 = vld [vmem:[%s11489_s9 + $0x300] sm:$0xff]  ;;  %v756_v35 = vld [vmem:[%s11489_s9 + $0x1f8] sm:$0xff] }
 0x1e0   :  { %7680 = vmatprep.subr.mxu0 %v7023_v37  ;;  %7715 = vmatprep.subr.mxu1 %v7055_v38 }
 0x1e1   :  { %7681 = vmatpush3.msra.mxu0 %v7007_v39  ;;  %7716 = vmatpush3.msra.mxu1 %v7039_v40 }
 0x1e2   :  { %7682 = vmatprep.subr.mxu0 %v7022_v41  ;;  %7717 = vmatprep.subr.mxu1 %v7054_v42 }
 0x1e3   :  { %7683 = vmatpush3.msra.mxu0 %v7006_v43  ;;  %7718 = vmatpush3.msra.mxu1 %v7038_v44 }
 0x1e4   :  { %7684 = vmatprep.subr.mxu0 %v7021_v45  ;;  %7719 = vmatprep.subr.mxu1 %v7053_v46 }
 0x1e5   :  { %7685 = vmatpush3.msra.mxu0 %v7005_v47  ;;  %7720 = vmatpush3.msra.mxu1 %v7037_v48 }
 0x1e6   :  { %7686 = vmatprep.subr.mxu0 %v7020_v51  ;;  %7721 = vmatprep.subr.mxu1 %v7052_v52 }
 0x1e7   :  { %7687 = vmatpush3.msra.mxu0 %v7004_v53  ;;  %7722 = vmatpush3.msra.mxu1 %v7036_v54 }
 0x1e8   :  { %7688 = vmatprep.subr.mxu0 %v7019_v57  ;;  %7723 = vmatprep.subr.mxu1 %v7051_v58 }
 0x1e9   :  { %7689 = vmatpush3.msra.mxu0 %v7003_v59  ;;  %7724 = vmatpush3.msra.mxu1 %v7035_v60  ;;  %v708_v60 = vld [vmem:[%s11489_s9 + $0x78] sm:$0xff] }
 0x1ea   :  { %7690 = vmatprep.subr.mxu0 %v7018_v61  ;;  %7725 = vmatprep.subr.mxu1 %v7050_v62  ;;  %v740_v61 = vld [vmem:[%s11489_s9 + $0x178] sm:$0xff]  ;;  %v723_v62 = vld [vmem:[%s11489_s9 + $0xf0] sm:$0xff] }
 0x1eb   :  { %7691 = vmatpush3.msra.mxu0 %v7002_v63  ;;  %7726 = vmatpush3.msra.mxu1 %v7034_v0 }
 0x1ec   :  { %7692 = vmatprep.subr.mxu0 %v7017_v2  ;;  %7727 = vmatprep.subr.mxu1 %v7049_v3  ;;  %v755_v2 = vld [vmem:[%s11489_s9 + $0x1f0] sm:$0xff] }
 0x1ed   :  { %7693 = vmatpush3.msra.mxu0 %v7001_v4  ;;  %7728 = vmatpush3.msra.mxu1 %v7033_v5  ;;  %v707_v3 = vld [vmem:[%s11489_s9 + $0x70] sm:$0xff] }
 0x1ee   :  { %7694 = vmatprep.subr.mxu0 %v7016_v6  ;;  %7729 = vmatprep.subr.mxu1 %v7048_v7  ;;  %v739_v4 = vld [vmem:[%s11489_s9 + $0x170] sm:$0xff]  ;;  %v722_v7 = vld [vmem:[%s11489_s9 + $0xe8] sm:$0xff] }
 0x1ef   :  { %7695 = vmatpush3.msra.mxu0 %v7000_v8  ;;  %7730 = vmatpush3.msra.mxu1 %v7032_v9  ;;  %v754_v8 = vld [vmem:[%s11489_s9 + $0x1e8] sm:$0xff] }
 0x1f0   :  { %7696 = vmatprep.subr.mxu0 %v7015_v10  ;;  %7731 = vmatprep.subr.mxu1 %v7047_v11  ;;  %v706_v9 = vld [vmem:[%s11489_s9 + $0x68] sm:$0xff]  ;;  %v721_v11 = vld [vmem:[%s11489_s9 + $0xe0] sm:$0xff] }
 0x1f1   :  { %7697 = vmatpush3.msra.mxu0 %v6999_v12  ;;  %7732 = vmatpush3.msra.mxu1 %v7031_v13  ;;  %v738_v10 = vld [vmem:[%s11489_s9 + $0x168] sm:$0xff]  ;;  %v753_v12 = vld [vmem:[%s11489_s9 + $0x1e0] sm:$0xff] }
 0x1f2   :  { %7698 = vmatprep.subr.mxu0 %v7014_v14  ;;  %7733 = vmatprep.subr.mxu1 %v7046_v15  ;;  %v705_v13 = vld [vmem:[%s11489_s9 + $0x60] sm:$0xff]  ;;  %v720_v15 = vld [vmem:[%s11489_s9 + $0xd8] sm:$0xff] }
 0x1f3   :  { %7699 = vmatpush3.msra.mxu0 %v6998_v18  ;;  %7734 = vmatpush3.msra.mxu1 %v7030_v19  ;;  %v737_v14 = vld [vmem:[%s11489_s9 + $0x160] sm:$0xff]  ;;  %v752_v18 = vld [vmem:[%s11489_s9 + $0x1d8] sm:$0xff] }
 0x1f4   :  { %7700 = vmatprep.subr.mxu0 %v7013_v22  ;;  %7735 = vmatprep.subr.mxu1 %v7045_v23  ;;  %v704_v19 = vld [vmem:[%s11489_s9 + $0x58] sm:$0xff]  ;;  %v719_v23 = vld [vmem:[%s11489_s9 + $0xd0] sm:$0xff] }
 0x1f5   :  { %7701 = vmatpush3.msra.mxu0 %v6997_v24  ;;  %7736 = vmatpush3.msra.mxu1 %v7029_v25  ;;  %v736_v22 = vld [vmem:[%s11489_s9 + $0x158] sm:$0xff]  ;;  %v751_v24 = vld [vmem:[%s11489_s9 + $0x1d0] sm:$0xff] }
 0x1f6   :  { %7702 = vmatprep.subr.mxu0 %v7012_v26  ;;  %7737 = vmatprep.subr.mxu1 %v7044_v27  ;;  %v703_v25 = vld [vmem:[%s11489_s9 + $0x50] sm:$0xff]  ;;  %v718_v27 = vld [vmem:[%s11489_s9 + $0xc8] sm:$0xff] }
 0x1f7   :  { %7703 = vmatpush3.msra.mxu0 %v6996_v28  ;;  %7738 = vmatpush3.msra.mxu1 %v7028_v29  ;;  %v735_v26 = vld [vmem:[%s11489_s9 + $0x150] sm:$0xff]  ;;  %v750_v28 = vld [vmem:[%s11489_s9 + $0x1c8] sm:$0xff] }
 0x1f8   :  { %7704 = vmatprep.subr.mxu0 %v7011_v30  ;;  %7739 = vmatprep.subr.mxu1 %v7043_v31  ;;  %v702_v29 = vld [vmem:[%s11489_s9 + $0x48] sm:$0xff]  ;;  %v717_v31 = vld [vmem:[%s11489_s9 + $0xc0] sm:$0xff] }
 0x1f9   :  { %7705 = vmatpush3.msra.mxu0 %v6995_v32  ;;  %7740 = vmatpush3.msra.mxu1 %v7027_v33  ;;  %v734_v30 = vld [vmem:[%s11489_s9 + $0x148] sm:$0xff]  ;;  %v749_v32 = vld [vmem:[%s11489_s9 + $0x1c0] sm:$0xff] }
 0x1fa   :  { %7744 = vmatprep.subr.mxu0 %v724_v34  ;;  %7779 = vmatprep.subr.mxu1 %v756_v35  ;;  %v701_v33 = vld [vmem:[%s11489_s9 + $0x40] sm:$0xff]  ;;  %v716_v35 = vld [vmem:[%s11489_s9 + $0xb8] sm:$0xff] }
 0x1fb   :  { %v733_v34 = vld [vmem:[%s11489_s9 + $0x140] sm:$0xff] }
 0x28a   :  { %v9318_v36 = vpop.f32.mrf.mxu0  ;;  %v9320_v37 = vpop.f32.mrf.mxu1 }
 0x28c   :  { %v9322_v38 = vpop.f32.mrf.mxu0  ;;  %v9324_v39 = vpop.f32.mrf.mxu1 }
 0x28e   :  { %v563_v40 = vpop.f32.mrf.mxu0  ;;  %v604_v41 = vpop.f32.mrf.mxu1 }
 0x28f   :  { %v748_v40 = vld [vmem:[%s11489_s9 + $0x1b8] sm:$0xff] }
 0x290   :  { %v564_v42 = vpop.f32.mrf.mxu0  ;;  %v605_v43 = vpop.f32.mrf.mxu1  ;;  %v700_v41 = vld [vmem:[%s11489_s9 + $0x38] sm:$0xff] }
 0x291   :  { %v732_v42 = vld [vmem:[%s11489_s9 + $0x138] sm:$0xff]  ;;  %v715_v43 = vld [vmem:[%s11489_s9 + $0xb0] sm:$0xff] }
 0x292   :  { %v9326_v44 = vpop.f32.mrf.mxu0  ;;  %v9328_v45 = vpop.f32.mrf.mxu1 }
 0x294   :  { %v647_v46 = vpop.f32.mrf.mxu0  ;;  %v688_v47 = vpop.f32.mrf.mxu1 }
 0x296   :  { %v649_v48 = vpop.f32.mrf.mxu0  ;;  %v690_v51 = vpop.f32.mrf.mxu1 }
 0x297   :  { %v731_v48 = vld [vmem:[%s11489_s9 + $0x130] sm:$0xff]  ;;  %v714_v51 = vld [vmem:[%s11489_s9 + $0xa8] sm:$0xff] }
 0x298   :  { %v650_v52 = vpop.f32.mrf.mxu0  ;;  %v691_v53 = vpop.f32.mrf.mxu1 }
 0x299   :  { %v746_v52 = vld [vmem:[%s11489_s9 + $0x1a8] sm:$0xff] }
 0x29a   :  { %v796_v54 = vpop.f32.mrf.mxu0  ;;  %v837_v57 = vpop.f32.mrf.mxu1  ;;  %v698_v53 = vld [vmem:[%s11489_s9 + $0x28] sm:$0xff] }
 0x29c   :  { %v798_v58 = vpop.f32.mrf.mxu0  ;;  %v839_v59 = vpop.f32.mrf.mxu1 }
 0x29d   :  { %973 = vmatprep.mubr.f32.mxu0 %v798_v58  ;;  %1043 = vmatprep.mubr.f32.mxu1 %v839_v59  ;;  %v745_v58 = vld [vmem:[%s11489_s9 + $0x1a0] sm:$0xff] }
 0x29e   :  { %v800_v63 = vpop.f32.mrf.mxu0  ;;  %v841_v0 = vpop.f32.mrf.mxu1  ;;  %974 = vmatmul.mubr.f32.vlgmr.msra.gmra.mxu0 %v796_v54  ;;  %1044 = vmatmul.mubr.f32.vlgmr.msra.gmra.mxu1 %v837_v57  ;;  %v730_v54 = vld [vmem:[%s11489_s9 + $0x128] sm:$0xff]  ;;  %v713_v57 = vld [vmem:[%s11489_s9 + $0xa0] sm:$0xff] }
 0x29f   :  { %7745 = vmatpush3.msra.mxu0 %v708_v60  ;;  %7780 = vmatpush3.msra.mxu1 %v740_v61  ;;  %v697_v59 = vld [vmem:[%s11489_s9 + $0x20] sm:$0xff]  ;;  %v712_v61 = vld [vmem:[%s11489_s9 + $0x98] sm:$0xff] }
 0x2a0   :  { %7746 = vmatprep.subr.mxu0 %v723_v62  ;;  %1113 = vmatprep.mubr.f32.mxu0 %v647_v46  ;;  %v801_v5 = vpop.f32.mrf.mxu0  ;;  %v842_v6 = vpop.f32.mrf.mxu1  ;;  %v747_v46 = vld [vmem:[%s11489_s9 + $0x1b0] sm:$0xff]  ;;  %v729_v60 = vld [vmem:[%s11489_s9 + $0x120] sm:$0xff]  ;;  %v744_v62 = vld [vmem:[%s11489_s9 + $0x198] sm:$0xff] }
 0x2a1   :  { %7781 = vmatprep.subr.mxu1 %v755_v2  ;;  %1183 = vmatprep.mubr.f32.mxu1 %v688_v47  ;;  %v699_v47 = vld [vmem:[%s11489_s9 + $0x30] sm:$0xff]  ;;  %v696_v63 = vld [vmem:[%s11489_s9 + $0x18] sm:$0xff]  ;;  %v710_v6 = vld [vmem:[%s11489_s9 + $0x88] sm:$0xff] }
 0x2a2   :  { %7747 = vmatpush3.msra.mxu0 %v707_v3  ;;  %7782 = vmatpush3.msra.mxu1 %v739_v4  ;;  %v728_v0 = vld [vmem:[%s11489_s9 + $0x118] sm:$0xff]  ;;  %v711_v2 = vld [vmem:[%s11489_s9 + $0x90] sm:$0xff] }
 0x2a3   :  { %7748 = vmatprep.subr.mxu0 %v722_v7  ;;  %7783 = vmatprep.subr.mxu1 %v754_v8  ;;  %v743_v3 = vld [vmem:[%s11489_s9 + $0x190] sm:$0xff]  ;;  %v742_v7 = vld [vmem:[%s11489_s9 + $0x188] sm:$0xff] }
 0x2a4   :  { %7749 = vmatpush3.msra.mxu0 %v706_v9  ;;  %7784 = vmatpush3.msra.mxu1 %v738_v10  ;;  %v695_v4 = vld [vmem:[%s11489_s9 + $0x10] sm:$0xff]  ;;  %v694_v8 = vld [vmem:[%s11489_s9 + $0x8] sm:$0xff]  ;;  %v709_v10 = vld [vmem:[%s11489_s9 + $0x80] sm:$0xff] }
 0x2a5   :  { %7750 = vmatprep.subr.mxu0 %v721_v11  ;;  %7785 = vmatprep.subr.mxu1 %v753_v12  ;;  %v727_v5 = vld [vmem:[%s11489_s9 + $0x110] sm:$0xff]  ;;  %v726_v9 = vld [vmem:[%s11489_s9 + $0x108] sm:$0xff]  ;;  %v741_v11 = vld [vmem:[%s11489_s9 + $0x180] sm:$0xff] }
 0x2a6   :  { %7751 = vmatpush3.msra.mxu0 %v705_v13  ;;  %7786 = vmatpush3.msra.mxu1 %v737_v14  ;;  %v693_v12 = vld [vmem:[%s11489_s9] sm:$0xff]  ;;  %v7095_v14 = vld [vmem:[%s11489_s9 + $0x4f8] sm:$0xff] }
 0x2a7   :  { %7752 = vmatprep.subr.mxu0 %v720_v15  ;;  %7787 = vmatprep.subr.mxu1 %v752_v18  ;;  %v725_v13 = vld [vmem:[%s11489_s9 + $0x100] sm:$0xff]  ;;  %v7127_v15 = vld [vmem:[%s11489_s9 + $0x5f8] sm:$0xff] }
 0x2a8   :  { %7753 = vmatpush3.msra.mxu0 %v704_v19  ;;  %7788 = vmatpush3.msra.mxu1 %v736_v22  ;;  %v7111_v18 = vld [vmem:[%s11489_s9 + $0x578] sm:$0xff]  ;;  %v7094_v19 = vld [vmem:[%s11489_s9 + $0x4f0] sm:$0xff] }
 0x2a9   :  { %7754 = vmatprep.subr.mxu0 %v719_v23  ;;  %7789 = vmatprep.subr.mxu1 %v751_v24  ;;  %v7126_v22 = vld [vmem:[%s11489_s9 + $0x5f0] sm:$0xff] }
 0x2aa   :  { %7755 = vmatpush3.msra.mxu0 %v703_v25  ;;  %7790 = vmatpush3.msra.mxu1 %v735_v26  ;;  %v7078_v23 = vld [vmem:[%s11489_s9 + $0x470] sm:$0xff]  ;;  %v7093_v25 = vld [vmem:[%s11489_s9 + $0x4e8] sm:$0xff] }
 0x2ab   :  { %7756 = vmatprep.subr.mxu0 %v718_v27  ;;  %7791 = vmatprep.subr.mxu1 %v750_v28  ;;  %v7110_v24 = vld [vmem:[%s11489_s9 + $0x570] sm:$0xff]  ;;  %v7125_v26 = vld [vmem:[%s11489_s9 + $0x5e8] sm:$0xff] }
 0x2ac   :  { %7757 = vmatpush3.msra.mxu0 %v702_v29  ;;  %7792 = vmatpush3.msra.mxu1 %v734_v30  ;;  %v7077_v27 = vld [vmem:[%s11489_s9 + $0x468] sm:$0xff]  ;;  %v7092_v29 = vld [vmem:[%s11489_s9 + $0x4e0] sm:$0xff] }
 0x2ad   :  { %7758 = vmatprep.subr.mxu0 %v717_v31  ;;  %7793 = vmatprep.subr.mxu1 %v749_v32  ;;  %v7109_v28 = vld [vmem:[%s11489_s9 + $0x568] sm:$0xff]  ;;  %v7124_v30 = vld [vmem:[%s11489_s9 + $0x5e0] sm:$0xff] }
 0x2ae   :  { %7759 = vmatpush3.msra.mxu0 %v701_v33  ;;  %7794 = vmatpush3.msra.mxu1 %v733_v34  ;;  %v7076_v31 = vld [vmem:[%s11489_s9 + $0x460] sm:$0xff]  ;;  %v7091_v33 = vld [vmem:[%s11489_s9 + $0x4d8] sm:$0xff] }
 0x2af   :  { %7760 = vmatprep.subr.mxu0 %v716_v35  ;;  %7795 = vmatprep.subr.mxu1 %v748_v40  ;;  %v7108_v32 = vld [vmem:[%s11489_s9 + $0x560] sm:$0xff]  ;;  %v7123_v34 = vld [vmem:[%s11489_s9 + $0x5d8] sm:$0xff] }
 0x2b0   :  { %7761 = vmatpush3.msra.mxu0 %v700_v41  ;;  %7796 = vmatpush3.msra.mxu1 %v732_v42  ;;  %v7075_v35 = vld [vmem:[%s11489_s9 + $0x458] sm:$0xff]  ;;  %v7090_v41 = vld [vmem:[%s11489_s9 + $0x4d0] sm:$0xff] }
 0x2b1   :  { %7762 = vmatprep.subr.mxu0 %v715_v43  ;;  %7797 = vmatprep.subr.mxu1 %v747_v46  ;;  %v7107_v40 = vld [vmem:[%s11489_s9 + $0x558] sm:$0xff]  ;;  %v7122_v42 = vld [vmem:[%s11489_s9 + $0x5d0] sm:$0xff] }
 0x2b2   :  { %7763 = vmatpush3.msra.mxu0 %v699_v47  ;;  %7798 = vmatpush3.msra.mxu1 %v731_v48  ;;  %v7074_v43 = vld [vmem:[%s11489_s9 + $0x450] sm:$0xff]  ;;  %v7089_v47 = vld [vmem:[%s11489_s9 + $0x4c8] sm:$0xff] }
 0x2b3   :  { %7764 = vmatprep.subr.mxu0 %v714_v51  ;;  %7799 = vmatprep.subr.mxu1 %v746_v52  ;;  %v7106_v46 = vld [vmem:[%s11489_s9 + $0x550] sm:$0xff]  ;;  %v7121_v48 = vld [vmem:[%s11489_s9 + $0x5c8] sm:$0xff] }
 0x2b4   :  { %7765 = vmatpush3.msra.mxu0 %v698_v53  ;;  %7800 = vmatpush3.msra.mxu1 %v730_v54  ;;  %v7073_v51 = vld [vmem:[%s11489_s9 + $0x448] sm:$0xff]  ;;  %v7088_v53 = vld [vmem:[%s11489_s9 + $0x4c0] sm:$0xff] }
 0x2b5   :  { %7766 = vmatprep.subr.mxu0 %v713_v57  ;;  %7801 = vmatprep.subr.mxu1 %v745_v58  ;;  %v7105_v52 = vld [vmem:[%s11489_s9 + $0x548] sm:$0xff]  ;;  %v7120_v54 = vld [vmem:[%s11489_s9 + $0x5c0] sm:$0xff] }
 0x2b6   :  { %7767 = vmatpush3.msra.mxu0 %v697_v59  ;;  %7802 = vmatpush3.msra.mxu1 %v729_v60  ;;  %v7072_v57 = vld [vmem:[%s11489_s9 + $0x440] sm:$0xff]  ;;  %v7087_v59 = vld [vmem:[%s11489_s9 + $0x4b8] sm:$0xff] }
 0x2b7   :  { %7768 = vmatprep.subr.mxu0 %v712_v61  ;;  %7803 = vmatprep.subr.mxu1 %v744_v62  ;;  %v7104_v58 = vld [vmem:[%s11489_s9 + $0x540] sm:$0xff]  ;;  %v7119_v60 = vld [vmem:[%s11489_s9 + $0x5b8] sm:$0xff] }
 0x2b8   :  { %7769 = vmatpush3.msra.mxu0 %v696_v63  ;;  %7804 = vmatpush3.msra.mxu1 %v728_v0  ;;  %v7071_v61 = vld [vmem:[%s11489_s9 + $0x438] sm:$0xff]  ;;  %v7086_v63 = vld [vmem:[%s11489_s9 + $0x4b0] sm:$0xff] }
 0x2b9   :  { %7770 = vmatprep.subr.mxu0 %v711_v2  ;;  %7805 = vmatprep.subr.mxu1 %v743_v3  ;;  %v7103_v62 = vld [vmem:[%s11489_s9 + $0x538] sm:$0xff]  ;;  %v7118_v0 = vld [vmem:[%s11489_s9 + $0x5b0] sm:$0xff] }
 0x2ba   :  { %7771 = vmatpush3.msra.mxu0 %v695_v4  ;;  %7806 = vmatpush3.msra.mxu1 %v727_v5  ;;  %v7070_v2 = vld [vmem:[%s11489_s9 + $0x430] sm:$0xff]  ;;  %v7085_v4 = vld [vmem:[%s11489_s9 + $0x4a8] sm:$0xff] }
 0x2bb   :  { %7772 = vmatprep.subr.mxu0 %v710_v6  ;;  %7807 = vmatprep.subr.mxu1 %v742_v7  ;;  %v7102_v3 = vld [vmem:[%s11489_s9 + $0x530] sm:$0xff]  ;;  %v7117_v5 = vld [vmem:[%s11489_s9 + $0x5a8] sm:$0xff] }
 0x2bc   :  { %7773 = vmatpush3.msra.mxu0 %v694_v8  ;;  %7808 = vmatpush3.msra.mxu1 %v726_v9  ;;  %v7069_v6 = vld [vmem:[%s11489_s9 + $0x428] sm:$0xff]  ;;  %v7084_v8 = vld [vmem:[%s11489_s9 + $0x4a0] sm:$0xff] }
 0x2bd   :  { %7774 = vmatprep.subr.mxu0 %v709_v10  ;;  %7809 = vmatprep.subr.mxu1 %v741_v11  ;;  %v7101_v7 = vld [vmem:[%s11489_s9 + $0x528] sm:$0xff]  ;;  %v7116_v9 = vld [vmem:[%s11489_s9 + $0x5a0] sm:$0xff] }
 0x2be   :  { %7775 = vmatpush3.msra.mxu0 %v693_v12  ;;  %7810 = vmatpush3.msra.mxu1 %v725_v13  ;;  %v7068_v10 = vld [vmem:[%s11489_s9 + $0x420] sm:$0xff]  ;;  %v7083_v12 = vld [vmem:[%s11489_s9 + $0x498] sm:$0xff] }
 0x2bf   :  { %1114 = vmatmul.mubr.f32.vlgmr.msra.gmra.mxu0 %v9326_v44  ;;  %1184 = vmatmul.mubr.f32.vlgmr.msra.gmra.mxu1 %v9328_v45  ;;  %v7059_v44 = vld [vmem:[%s11488_s7 + $0x4] sm:$0x3]  ;;  %v7079_v45 = vld [vmem:[%s11489_s9 + $0x478] sm:$0xff] }
 0x2c0   :  { %7060 = vmatprep.subr.msk.bf16.mxu0 %vm512_vm3, %v9073_v16  ;;  %7062 = vmatprep.subr.msk.bf16.mxu1 %vm512_vm3, %v9075_v17  ;;  %v7100_v11 = vld [vmem:[%s11489_s9 + $0x520] sm:$0xff]  ;;  %v7115_v13 = vld [vmem:[%s11489_s9 + $0x598] sm:$0xff] }
 0x2c1   :  { %1209 = vmatpush1.bf16.msra.mxu0 %v9078_v20  ;;  %1250 = vmatpush1.bf16.msra.mxu1 %v9081_v21 }
 0x2c2   :  { %1226 = vmatprep.mubr.bf16.mxu0 %v8811_v1  ;;  %1267 = vmatprep.mubr.bf16.mxu1 %v8811_v1 }
 0x2c3   :  { %7814 = vmatprep.subr.mxu0 %v7095_v14  ;;  %7849 = vmatprep.subr.mxu1 %v7127_v15  ;;  %v7067_v14 = vld [vmem:[%s11489_s9 + $0x418] sm:$0xff] }
 0x2c4   :  { %7061 = vmatmul.mubr.msk.bf16.vlgmr.msra.gmra.mxu0 %vm508_vm4, %v7059_v44  ;;  %7063 = vmatmul.mubr.msk.bf16.vlgmr.msra.gmra.mxu1 %vm508_vm4, %v7059_v44  ;;  %v7099_v15 = vld [vmem:[%s11489_s9 + $0x518] sm:$0xff]  ;;  %v7082_v44 = vld [vmem:[%s11489_s9 + $0x490] sm:$0xff] }
 0x2c5   :  { %7815 = vmatpush3.msra.mxu0 %v7079_v45  ;;  %7850 = vmatpush3.msra.mxu1 %v7111_v18  ;;  %v7114_v45 = vld [vmem:[%s11489_s9 + $0x590] sm:$0xff] }
 0x2c6   :  { %7816 = vmatprep.subr.mxu0 %v7094_v19  ;;  %7851 = vmatprep.subr.mxu1 %v7126_v22  ;;  %v7066_v18 = vld [vmem:[%s11489_s9 + $0x410] sm:$0xff]  ;;  %v7081_v22 = vld [vmem:[%s11489_s9 + $0x488] sm:$0xff] }
 0x2c7   :  { %7817 = vmatpush3.msra.mxu0 %v7078_v23  ;;  %7852 = vmatpush3.msra.mxu1 %v7110_v24  ;;  %v7098_v19 = vld [vmem:[%s11489_s9 + $0x510] sm:$0xff]  ;;  %v7113_v23 = vld [vmem:[%s11489_s9 + $0x588] sm:$0xff] }
 0x2c8   :  { %7818 = vmatprep.subr.mxu0 %v7093_v25  ;;  %7853 = vmatprep.subr.mxu1 %v7125_v26  ;;  %v7065_v24 = vld [vmem:[%s11489_s9 + $0x408] sm:$0xff]  ;;  %v7080_v26 = vld [vmem:[%s11489_s9 + $0x480] sm:$0xff] }
 0x2c9   :  { %7819 = vmatpush3.msra.mxu0 %v7077_v27  ;;  %7854 = vmatpush3.msra.mxu1 %v7109_v28  ;;  %v7097_v25 = vld [vmem:[%s11489_s9 + $0x508] sm:$0xff]  ;;  %v7112_v27 = vld [vmem:[%s11489_s9 + $0x580] sm:$0xff] }
 0x2ca   :  { %7820 = vmatprep.subr.mxu0 %v7092_v29  ;;  %7855 = vmatprep.subr.mxu1 %v7124_v30  ;;  %v7064_v28 = vld [vmem:[%s11489_s9 + $0x400] sm:$0xff] }
 0x2cb   :  { %7821 = vmatpush3.msra.mxu0 %v7076_v31  ;;  %7856 = vmatpush3.msra.mxu1 %v7108_v32  ;;  %v7096_v29 = vld [vmem:[%s11489_s9 + $0x500] sm:$0xff] }
 0x2cc   :  { %7822 = vmatprep.subr.mxu0 %v7091_v33  ;;  %7857 = vmatprep.subr.mxu1 %v7123_v34 }
 0x2cd   :  { %7823 = vmatpush3.msra.mxu0 %v7075_v35  ;;  %7858 = vmatpush3.msra.mxu1 %v7107_v40 }
 0x2ce   :  { %7824 = vmatprep.subr.mxu0 %v7090_v41  ;;  %7859 = vmatprep.subr.mxu1 %v7122_v42 }
 0x2cf   :  { %7825 = vmatpush3.msra.mxu0 %v7074_v43  ;;  %7860 = vmatpush3.msra.mxu1 %v7106_v46 }
 0x2d0   :  { %7826 = vmatprep.subr.mxu0 %v7089_v47  ;;  %7861 = vmatprep.subr.mxu1 %v7121_v48 }
 0x2d1   :  { %7827 = vmatpush3.msra.mxu0 %v7073_v51  ;;  %7862 = vmatpush3.msra.mxu1 %v7105_v52 }
 0x2d2   :  { %7828 = vmatprep.subr.mxu0 %v7088_v53  ;;  %7863 = vmatprep.subr.mxu1 %v7120_v54 }
 0x2d3   :  { %7829 = vmatpush3.msra.mxu0 %v7072_v57  ;;  %7864 = vmatpush3.msra.mxu1 %v7104_v58 }
 0x2d4   :  { %7830 = vmatprep.subr.mxu0 %v7087_v59  ;;  %7865 = vmatprep.subr.mxu1 %v7119_v60 }
 0x2d5   :  { %7831 = vmatpush3.msra.mxu0 %v7071_v61  ;;  %7866 = vmatpush3.msra.mxu1 %v7103_v62  ;;  %v7164_v61 = vld [vmem:[%s11489_s9 + $0x6f8] sm:$0xff] }
 0x2d6   :  { %7832 = vmatprep.subr.mxu0 %v7086_v63  ;;  %7867 = vmatprep.subr.mxu1 %v7118_v0  ;;  %v7196_v62 = vld [vmem:[%s11489_s9 + $0x7f8] sm:$0xff]  ;;  %v7128_v63 = vld [vmem:[%s11488_s7 + $0x6] sm:$0x3] }
 0x2d7   :  { %7833 = vmatpush3.msra.mxu0 %v7070_v2  ;;  %7868 = vmatpush3.msra.mxu1 %v7102_v3  ;;  %v7148_v3 = vld [vmem:[%s11489_s9 + $0x678] sm:$0xff] }
 0x2d8   :  { %7834 = vmatprep.subr.mxu0 %v7085_v4  ;;  %7869 = vmatprep.subr.mxu1 %v7117_v5  ;;  %v7180_v4 = vld [vmem:[%s11489_s9 + $0x778] sm:$0xff]  ;;  %v7163_v5 = vld [vmem:[%s11489_s9 + $0x6f0] sm:$0xff] }
 0x2d9   :  { %7835 = vmatpush3.msra.mxu0 %v7069_v6  ;;  %7870 = vmatpush3.msra.mxu1 %v7101_v7  ;;  %v7195_v6 = vld [vmem:[%s11489_s9 + $0x7f0] sm:$0xff] }
 0x2da   :  { %7836 = vmatprep.subr.mxu0 %v7084_v8  ;;  %7871 = vmatprep.subr.mxu1 %v7116_v9  ;;  %v7147_v7 = vld [vmem:[%s11489_s9 + $0x670] sm:$0xff]  ;;  %v7162_v9 = vld [vmem:[%s11489_s9 + $0x6e8] sm:$0xff] }
 0x2db   :  { %7837 = vmatpush3.msra.mxu0 %v7068_v10  ;;  %7872 = vmatpush3.msra.mxu1 %v7100_v11  ;;  %v7179_v8 = vld [vmem:[%s11489_s9 + $0x770] sm:$0xff]  ;;  %v7194_v10 = vld [vmem:[%s11489_s9 + $0x7e8] sm:$0xff] }
 0x2dc   :  { %7838 = vmatprep.subr.mxu0 %v7083_v12  ;;  %7873 = vmatprep.subr.mxu1 %v7115_v13  ;;  %v7146_v11 = vld [vmem:[%s11489_s9 + $0x668] sm:$0xff]  ;;  %v7161_v13 = vld [vmem:[%s11489_s9 + $0x6e0] sm:$0xff] }
 0x2dd   :  { %7839 = vmatpush3.msra.mxu0 %v7067_v14  ;;  %7874 = vmatpush3.msra.mxu1 %v7099_v15  ;;  %v7178_v12 = vld [vmem:[%s11489_s9 + $0x768] sm:$0xff]  ;;  %v7193_v14 = vld [vmem:[%s11489_s9 + $0x7e0] sm:$0xff] }
 0x2de   :  { %7840 = vmatprep.subr.mxu0 %v7082_v44  ;;  %7875 = vmatprep.subr.mxu1 %v7114_v45  ;;  %v7145_v15 = vld [vmem:[%s11489_s9 + $0x660] sm:$0xff]  ;;  %v7160_v45 = vld [vmem:[%s11489_s9 + $0x6d8] sm:$0xff] }
 0x2df   :  { %7841 = vmatpush3.msra.mxu0 %v7066_v18  ;;  %7876 = vmatpush3.msra.mxu1 %v7098_v19  ;;  %v7177_v44 = vld [vmem:[%s11489_s9 + $0x760] sm:$0xff]  ;;  %v7192_v18 = vld [vmem:[%s11489_s9 + $0x7d8] sm:$0xff] }
 0x2e0   :  { %7842 = vmatprep.subr.mxu0 %v7081_v22  ;;  %7877 = vmatprep.subr.mxu1 %v7113_v23  ;;  %v7144_v19 = vld [vmem:[%s11489_s9 + $0x658] sm:$0xff]  ;;  %v7159_v23 = vld [vmem:[%s11489_s9 + $0x6d0] sm:$0xff] }
 0x2e1   :  { %7843 = vmatpush3.msra.mxu0 %v7065_v24  ;;  %7878 = vmatpush3.msra.mxu1 %v7097_v25  ;;  %v7176_v22 = vld [vmem:[%s11489_s9 + $0x758] sm:$0xff]  ;;  %v7191_v24 = vld [vmem:[%s11489_s9 + $0x7d0] sm:$0xff] }
 0x2e2   :  { %7844 = vmatprep.subr.mxu0 %v7080_v26  ;;  %7879 = vmatprep.subr.mxu1 %v7112_v27  ;;  %v7143_v25 = vld [vmem:[%s11489_s9 + $0x650] sm:$0xff]  ;;  %v7158_v27 = vld [vmem:[%s11489_s9 + $0x6c8] sm:$0xff] }
 0x2e3   :  { %7845 = vmatpush3.msra.mxu0 %v7064_v28  ;;  %7880 = vmatpush3.msra.mxu1 %v7096_v29  ;;  %v7175_v26 = vld [vmem:[%s11489_s9 + $0x750] sm:$0xff]  ;;  %v7190_v28 = vld [vmem:[%s11489_s9 + $0x7c8] sm:$0xff] }
 0x2e4   :  { %7129 = vmatprep.subr.msk.bf16.mxu0 %vm512_vm3, %v9073_v16  ;;  %7131 = vmatprep.subr.msk.bf16.mxu1 %vm512_vm3, %v9075_v17  ;;  %v7142_v29 = vld [vmem:[%s11489_s9 + $0x648] sm:$0xff] }
 0x35e   :  { %v7706_v30 = vpop.f32.mrf.mxu0  ;;  %v7741_v31 = vpop.f32.mrf.mxu1 }
 0x360   :  { %v7707_v32 = vpop.f32.mrf.mxu0  ;;  %v7742_v33 = vpop.f32.mrf.mxu1 }
 0x361   :  { %v7708_v34 = vadd.f32 %v7707_v32, %v7706_v30  ;;  %v7743_v35 = vadd.f32 %v7742_v33, %v7741_v31  ;;  %v7174_v30 = vld [vmem:[%s11489_s9 + $0x748] sm:$0xff]  ;;  %v7157_v31 = vld [vmem:[%s11489_s9 + $0x6c0] sm:$0xff] }
 0x362   :  { %v7189_v32 = vld [vmem:[%s11489_s9 + $0x7c0] sm:$0xff] }
 0x363   :  { %v1046_v40 = vadd.f32 %v7743_v35, %v7708_v34  ;;  %v7141_v33 = vld [vmem:[%s11489_s9 + $0x640] sm:$0xff]  ;;  %v7156_v35 = vld [vmem:[%s11489_s9 + $0x6b8] sm:$0xff] }
 0x364   :  { %v7173_v34 = vld [vmem:[%s11489_s9 + $0x740] sm:$0xff] }
 0x37f   :  { %v7776_v41 = vpop.f32.mrf.mxu0  ;;  %v7811_v42 = vpop.f32.mrf.mxu1 }
 0x381   :  { %v7777_v43 = vpop.f32.mrf.mxu0  ;;  %v7812_v46 = vpop.f32.mrf.mxu1 }
 0x382   :  { %v7778_v47 = vadd.f32 %v7777_v43, %v7776_v41  ;;  %v7813_v48 = vadd.f32 %v7812_v46, %v7811_v42  ;;  %v7140_v41 = vld [vmem:[%s11489_s9 + $0x638] sm:$0xff]  ;;  %v7155_v43 = vld [vmem:[%s11489_s9 + $0x6b0] sm:$0xff] }
 0x383   :  { %v7172_v42 = vld [vmem:[%s11489_s9 + $0x738] sm:$0xff]  ;;  %v7187_v46 = vld [vmem:[%s11489_s9 + $0x7b0] sm:$0xff] }
 0x384   :  { %v1116_v51 = vadd.f32 %v7778_v47, %v1046_v40  ;;  %v1228_v52 = vpop.f32.mrf.mxu0  ;;  %v1269_v53 = vpop.f32.mrf.mxu1  ;;  %v7188_v40 = vld [vmem:[%s11489_s9 + $0x7b8] sm:$0xff]  ;;  %v7139_v47 = vld [vmem:[%s11489_s9 + $0x630] sm:$0xff] }
 0x386   :  { %v9727_v54 = vadd.f32 %v7813_v48, %v1116_v51  ;;  %v1230_v57 = vpop.f32.mrf.mxu0  ;;  %v1271_v58 = vpop.f32.mrf.mxu1  ;;  %v7171_v48 = vld [vmem:[%s11489_s9 + $0x730] sm:$0xff]  ;;  %v7154_v51 = vld [vmem:[%s11489_s9 + $0x6a8] sm:$0xff] }
 0x387   :  { %1405 = vmatprep.mubr.f32.mxu0 %v1230_v57  ;;  %1475 = vmatprep.mubr.f32.mxu1 %v1271_v58  ;;  %v7170_v57 = vld [vmem:[%s11489_s9 + $0x728] sm:$0xff]  ;;  %v7153_v58 = vld [vmem:[%s11489_s9 + $0x6a0] sm:$0xff] }
 0x388   :  { %v1232_v59 = vpop.f32.mrf.mxu0  ;;  %v1273_v60 = vpop.f32.mrf.mxu1  ;;  %1406 = vmatmul.mubr.f32.vlgmr.msra.gmra.mxu0 %v1228_v52  ;;  %1476 = vmatmul.mubr.f32.vlgmr.msra.gmra.mxu1 %v1269_v53  ;;  %v7186_v52 = vld [vmem:[%s11489_s9 + $0x7a8] sm:$0xff] }
 0x389   :  { %1502 = vmatpush1.bf16.msra.mxu0 %v9078_v20  ;;  %1543 = vmatpush1.bf16.msra.mxu1 %v9081_v21  ;;  %v7138_v53 = vld [vmem:[%s11489_s9 + $0x628] sm:$0xff]  ;;  %v7185_v59 = vld [vmem:[%s11489_s9 + $0x7a0] sm:$0xff] }
 0x38a   :  { %v1233_v0 = vpop.f32.mrf.mxu0  ;;  %v1274_v2 = vpop.f32.mrf.mxu1  ;;  %1519 = vmatprep.mubr.bf16.mxu0 %v8811_v1  ;;  %1560 = vmatprep.mubr.bf16.mxu1 %v8811_v1  ;;  %v7137_v60 = vld [vmem:[%s11489_s9 + $0x620] sm:$0xff] }
 0x38b   :  { %7884 = vmatprep.subr.mxu0 %v7164_v61  ;;  %7919 = vmatprep.subr.mxu1 %v7196_v62  ;;  %v7169_v61 = vld [vmem:[%s11489_s9 + $0x720] sm:$0xff]  ;;  %v7152_v62 = vld [vmem:[%s11489_s9 + $0x698] sm:$0xff] }
 0x38c   :  { %7130 = vmatmul.mubr.msk.bf16.vlgmr.msra.gmra.mxu0 %vm508_vm4, %v7128_v63  ;;  %7132 = vmatmul.mubr.msk.bf16.vlgmr.msra.gmra.mxu1 %vm508_vm4, %v7128_v63  ;;  %v7184_v63 = vld [vmem:[%s11489_s9 + $0x798] sm:$0xff] }
 0x38d   :  { %7885 = vmatpush3.msra.mxu0 %v7148_v3  ;;  %7920 = vmatpush3.msra.mxu1 %v7180_v4  ;;  %v7136_v0 = vld [vmem:[%s11489_s9 + $0x618] sm:$0xff]  ;;  %v7151_v3 = vld [vmem:[%s11489_s9 + $0x690] sm:$0xff] }
 0x38e   :  { %7886 = vmatprep.subr.mxu0 %v7163_v5  ;;  %7921 = vmatprep.subr.mxu1 %v7195_v6  ;;  %v7168_v2 = vld [vmem:[%s11489_s9 + $0x718] sm:$0xff]  ;;  %v7183_v4 = vld [vmem:[%s11489_s9 + $0x790] sm:$0xff] }
 0x38f   :  { %7887 = vmatpush3.msra.mxu0 %v7147_v7  ;;  %7922 = vmatpush3.msra.mxu1 %v7179_v8  ;;  %v7135_v5 = vld [vmem:[%s11489_s9 + $0x610] sm:$0xff]  ;;  %v7150_v7 = vld [vmem:[%s11489_s9 + $0x688] sm:$0xff] }
 0x390   :  { %7888 = vmatprep.subr.mxu0 %v7162_v9  ;;  %7923 = vmatprep.subr.mxu1 %v7194_v10  ;;  %v7167_v6 = vld [vmem:[%s11489_s9 + $0x710] sm:$0xff]  ;;  %v7182_v8 = vld [vmem:[%s11489_s9 + $0x788] sm:$0xff] }
 0x391   :  { %7889 = vmatpush3.msra.mxu0 %v7146_v11  ;;  %7924 = vmatpush3.msra.mxu1 %v7178_v12  ;;  %v7134_v9 = vld [vmem:[%s11489_s9 + $0x608] sm:$0xff]  ;;  %v7149_v11 = vld [vmem:[%s11489_s9 + $0x680] sm:$0xff] }
 0x392   :  { %7890 = vmatprep.subr.mxu0 %v7161_v13  ;;  %7925 = vmatprep.subr.mxu1 %v7193_v14  ;;  %v7166_v10 = vld [vmem:[%s11489_s9 + $0x708] sm:$0xff]  ;;  %v7181_v12 = vld [vmem:[%s11489_s9 + $0x780] sm:$0xff] }
 0x393   :  { %7891 = vmatpush3.msra.mxu0 %v7145_v15  ;;  %7926 = vmatpush3.msra.mxu1 %v7177_v44  ;;  %v7133_v13 = vld [vmem:[%s11489_s9 + $0x600] sm:$0xff] }
 0x394   :  { %7892 = vmatprep.subr.mxu0 %v7160_v45  ;;  %7927 = vmatprep.subr.mxu1 %v7192_v18  ;;  %v7165_v14 = vld [vmem:[%s11489_s9 + $0x700] sm:$0xff] }
 0x395   :  { %7893 = vmatpush3.msra.mxu0 %v7144_v19  ;;  %7928 = vmatpush3.msra.mxu1 %v7176_v22 }
 0x396   :  { %7894 = vmatprep.subr.mxu0 %v7159_v23  ;;  %7929 = vmatprep.subr.mxu1 %v7191_v24 }
 0x397   :  { %7895 = vmatpush3.msra.mxu0 %v7143_v25  ;;  %7930 = vmatpush3.msra.mxu1 %v7175_v26 }
 0x398   :  { %7896 = vmatprep.subr.mxu0 %v7158_v27  ;;  %7931 = vmatprep.subr.mxu1 %v7190_v28 }
 0x399   :  { %7897 = vmatpush3.msra.mxu0 %v7142_v29  ;;  %7932 = vmatpush3.msra.mxu1 %v7174_v30 }
 0x39a   :  { %7898 = vmatprep.subr.mxu0 %v7157_v31  ;;  %7933 = vmatprep.subr.mxu1 %v7189_v32  ;;  %v7233_v31 = vld [vmem:[%s11489_s9 + $0x8f8] sm:$0xff] }
 0x39b   :  { %7899 = vmatpush3.msra.mxu0 %v7141_v33  ;;  %7934 = vmatpush3.msra.mxu1 %v7173_v34  ;;  %v7265_v32 = vld [vmem:[%s11489_s9 + $0x9f8] sm:$0xff] }
 0x39c   :  { %7900 = vmatprep.subr.mxu0 %v7156_v35  ;;  %7935 = vmatprep.subr.mxu1 %v7188_v40  ;;  %v7217_v35 = vld [vmem:[%s11489_s9 + $0x878] sm:$0xff] }
 0x39d   :  { %7901 = vmatpush3.msra.mxu0 %v7140_v41  ;;  %7936 = vmatpush3.msra.mxu1 %v7172_v42  ;;  %v7249_v40 = vld [vmem:[%s11489_s9 + $0x978] sm:$0xff]  ;;  %v7232_v41 = vld [vmem:[%s11489_s9 + $0x8f0] sm:$0xff] }
 0x39e   :  { %7902 = vmatprep.subr.mxu0 %v7155_v43  ;;  %7937 = vmatprep.subr.mxu1 %v7187_v46  ;;  %v7264_v42 = vld [vmem:[%s11489_s9 + $0x9f0] sm:$0xff] }
 0x39f   :  { %7903 = vmatpush3.msra.mxu0 %v7139_v47  ;;  %7938 = vmatpush3.msra.mxu1 %v7171_v48  ;;  %v7216_v43 = vld [vmem:[%s11489_s9 + $0x870] sm:$0xff]  ;;  %v7231_v47 = vld [vmem:[%s11489_s9 + $0x8e8] sm:$0xff] }
 0x3a0   :  { %7904 = vmatprep.subr.mxu0 %v7154_v51  ;;  %7939 = vmatprep.subr.mxu1 %v7186_v52  ;;  %v7248_v46 = vld [vmem:[%s11489_s9 + $0x970] sm:$0xff]  ;;  %v7263_v48 = vld [vmem:[%s11489_s9 + $0x9e8] sm:$0xff] }
 0x3a1   :  { %7905 = vmatpush3.msra.mxu0 %v7138_v53  ;;  %7940 = vmatpush3.msra.mxu1 %v7170_v57  ;;  %v7215_v51 = vld [vmem:[%s11489_s9 + $0x868] sm:$0xff]  ;;  %v7230_v53 = vld [vmem:[%s11489_s9 + $0x8e0] sm:$0xff] }
 0x3a2   :  { %7906 = vmatprep.subr.mxu0 %v7153_v58  ;;  %7941 = vmatprep.subr.mxu1 %v7185_v59  ;;  %v7247_v52 = vld [vmem:[%s11489_s9 + $0x968] sm:$0xff]  ;;  %v7262_v57 = vld [vmem:[%s11489_s9 + $0x9e0] sm:$0xff] }
 0x3a3   :  { %7907 = vmatpush3.msra.mxu0 %v7137_v60  ;;  %7942 = vmatpush3.msra.mxu1 %v7169_v61  ;;  %v7214_v58 = vld [vmem:[%s11489_s9 + $0x860] sm:$0xff]  ;;  %v7229_v60 = vld [vmem:[%s11489_s9 + $0x8d8] sm:$0xff] }
 0x3a4   :  { %7908 = vmatprep.subr.mxu0 %v7152_v62  ;;  %7943 = vmatprep.subr.mxu1 %v7184_v63  ;;  %v7246_v59 = vld [vmem:[%s11489_s9 + $0x960] sm:$0xff]  ;;  %v7261_v61 = vld [vmem:[%s11489_s9 + $0x9d8] sm:$0xff] }
 0x3a5   :  { %7909 = vmatpush3.msra.mxu0 %v7136_v0  ;;  %7944 = vmatpush3.msra.mxu1 %v7168_v2  ;;  %v7213_v62 = vld [vmem:[%s11489_s9 + $0x858] sm:$0xff]  ;;  %v7228_v0 = vld [vmem:[%s11489_s9 + $0x8d0] sm:$0xff] }
 0x3a6   :  { %7910 = vmatprep.subr.mxu0 %v7151_v3  ;;  %7945 = vmatprep.subr.mxu1 %v7183_v4  ;;  %v7245_v63 = vld [vmem:[%s11489_s9 + $0x958] sm:$0xff]  ;;  %v7260_v2 = vld [vmem:[%s11489_s9 + $0x9d0] sm:$0xff] }
 0x3a7   :  { %7911 = vmatpush3.msra.mxu0 %v7135_v5  ;;  %7946 = vmatpush3.msra.mxu1 %v7167_v6  ;;  %v7212_v3 = vld [vmem:[%s11489_s9 + $0x850] sm:$0xff]  ;;  %v7227_v5 = vld [vmem:[%s11489_s9 + $0x8c8] sm:$0xff] }
 0x3a8   :  { %7912 = vmatprep.subr.mxu0 %v7150_v7  ;;  %7947 = vmatprep.subr.mxu1 %v7182_v8  ;;  %v7244_v4 = vld [vmem:[%s11489_s9 + $0x950] sm:$0xff]  ;;  %v7259_v6 = vld [vmem:[%s11489_s9 + $0x9c8] sm:$0xff] }
 0x3a9   :  { %7913 = vmatpush3.msra.mxu0 %v7134_v9  ;;  %7948 = vmatpush3.msra.mxu1 %v7166_v10  ;;  %v7211_v7 = vld [vmem:[%s11489_s9 + $0x848] sm:$0xff]  ;;  %v7226_v9 = vld [vmem:[%s11489_s9 + $0x8c0] sm:$0xff] }
 0x3aa   :  { %7914 = vmatprep.subr.mxu0 %v7149_v11  ;;  %7949 = vmatprep.subr.mxu1 %v7181_v12  ;;  %v7243_v8 = vld [vmem:[%s11489_s9 + $0x948] sm:$0xff]  ;;  %v7258_v10 = vld [vmem:[%s11489_s9 + $0x9c0] sm:$0xff] }
 0x3ab   :  { %7915 = vmatpush3.msra.mxu0 %v7133_v13  ;;  %7950 = vmatpush3.msra.mxu1 %v7165_v14  ;;  %v7210_v11 = vld [vmem:[%s11489_s9 + $0x840] sm:$0xff]  ;;  %v7225_v13 = vld [vmem:[%s11489_s9 + $0x8b8] sm:$0xff] }
 0x3ac   :  { %7198 = vmatprep.subr.msk.bf16.mxu0 %vm512_vm3, %v9073_v16  ;;  %7200 = vmatprep.subr.msk.bf16.mxu1 %vm512_vm3, %v9075_v17  ;;  %v7242_v12 = vld [vmem:[%s11489_s9 + $0x940] sm:$0xff]  ;;  %v7257_v14 = vld [vmem:[%s11489_s9 + $0x9b8] sm:$0xff] }
 0x448   :  { %v7846_v15 = vpop.f32.mrf.mxu0  ;;  %v7881_v44 = vpop.f32.mrf.mxu1 }
 0x44a   :  { %v7847_v45 = vpop.f32.mrf.mxu0  ;;  %v7882_v18 = vpop.f32.mrf.mxu1 }
 0x44b   :  { %v7848_v19 = vadd.f32 %v7847_v45, %v7846_v15  ;;  %v7883_v22 = vadd.f32 %v7882_v18, %v7881_v44  ;;  %v7209_v15 = vld [vmem:[%s11489_s9 + $0x838] sm:$0xff]  ;;  %v7224_v45 = vld [vmem:[%s11489_s9 + $0x8b0] sm:$0xff] }
 0x44c   :  { %v1521_v23 = vpop.f32.mrf.mxu0  ;;  %v1562_v24 = vpop.f32.mrf.mxu1  ;;  %v7241_v44 = vld [vmem:[%s11489_s9 + $0x938] sm:$0xff]  ;;  %v7256_v18 = vld [vmem:[%s11489_s9 + $0x9b0] sm:$0xff] }
 0x44d   :  { %v1478_v25 = vadd.f32 %v7883_v22, %v7848_v19  ;;  %v7208_v19 = vld [vmem:[%s11489_s9 + $0x830] sm:$0xff] }
 0x44e   :  { %v1523_v26 = vpop.f32.mrf.mxu0  ;;  %v1564_v27 = vpop.f32.mrf.mxu1  ;;  %v7240_v22 = vld [vmem:[%s11489_s9 + $0x930] sm:$0xff] }
 0x44f   :  { %v9935_v28 = vadd.f32 %v1478_v25, %v9727_v54  ;;  %1698 = vmatprep.mubr.f32.mxu0 %v1523_v26  ;;  %1768 = vmatprep.mubr.f32.mxu1 %v1564_v27  ;;  %v7197_v54 = vld [vmem:[%s11488_s7 + $0x8] sm:$0x3]  ;;  %v7222_v27 = vld [vmem:[%s11489_s9 + $0x8a0] sm:$0xff] }
 0x450   :  { %v1525_v29 = vpop.f32.mrf.mxu0  ;;  %v1566_v30 = vpop.f32.mrf.mxu1  ;;  %1699 = vmatmul.mubr.f32.vlgmr.msra.gmra.mxu0 %v1521_v23  ;;  %1769 = vmatmul.mubr.f32.vlgmr.msra.gmra.mxu1 %v1562_v24  ;;  %v7223_v23 = vld [vmem:[%s11489_s9 + $0x8a8] sm:$0xff] }
 0x451   :  { %1795 = vmatpush1.bf16.msra.mxu0 %v9078_v20  ;;  %1836 = vmatpush1.bf16.msra.mxu1 %v9081_v21  ;;  %v7255_v24 = vld [vmem:[%s11489_s9 + $0x9a8] sm:$0xff]  ;;  %v7254_v29 = vld [vmem:[%s11489_s9 + $0x9a0] sm:$0xff] }
 0x452   :  { %v1526_v33 = vpop.f32.mrf.mxu0  ;;  %v1567_v34 = vpop.f32.mrf.mxu1  ;;  %1812 = vmatprep.mubr.bf16.mxu0 %v8811_v1  ;;  %1853 = vmatprep.mubr.bf16.mxu1 %v8811_v1  ;;  %v7207_v25 = vld [vmem:[%s11489_s9 + $0x828] sm:$0xff]  ;;  %v7206_v30 = vld [vmem:[%s11489_s9 + $0x820] sm:$0xff] }
 0x453   :  { %7954 = vmatprep.subr.mxu0 %v7233_v31  ;;  %7989 = vmatprep.subr.mxu1 %v7265_v32  ;;  %v7239_v26 = vld [vmem:[%s11489_s9 + $0x928] sm:$0xff]  ;;  %v7238_v31 = vld [vmem:[%s11489_s9 + $0x920] sm:$0xff]  ;;  %v7221_v32 = vld [vmem:[%s11489_s9 + $0x898] sm:$0xff] }
 0x454   :  { %7199 = vmatmul.mubr.msk.bf16.vlgmr.msra.gmra.mxu0 %vm508_vm4, %v7197_v54  ;;  %7201 = vmatmul.mubr.msk.bf16.vlgmr.msra.gmra.mxu1 %vm508_vm4, %v7197_v54  ;;  %v7253_v54 = vld [vmem:[%s11489_s9 + $0x998] sm:$0xff] }
 0x455   :  { %7955 = vmatpush3.msra.mxu0 %v7217_v35  ;;  %7990 = vmatpush3.msra.mxu1 %v7249_v40  ;;  %v7205_v33 = vld [vmem:[%s11489_s9 + $0x818] sm:$0xff]  ;;  %v7220_v35 = vld [vmem:[%s11489_s9 + $0x890] sm:$0xff] }
 0x456   :  { %7956 = vmatprep.subr.mxu0 %v7232_v41  ;;  %7991 = vmatprep.subr.mxu1 %v7264_v42  ;;  %v7237_v34 = vld [vmem:[%s11489_s9 + $0x918] sm:$0xff]  ;;  %v7252_v40 = vld [vmem:[%s11489_s9 + $0x990] sm:$0xff] }
 0x457   :  { %7957 = vmatpush3.msra.mxu0 %v7216_v43  ;;  %7992 = vmatpush3.msra.mxu1 %v7248_v46  ;;  %v7204_v41 = vld [vmem:[%s11489_s9 + $0x810] sm:$0xff]  ;;  %v7219_v43 = vld [vmem:[%s11489_s9 + $0x888] sm:$0xff] }
 0x458   :  { %7958 = vmatprep.subr.mxu0 %v7231_v47  ;;  %7993 = vmatprep.subr.mxu1 %v7263_v48  ;;  %v7236_v42 = vld [vmem:[%s11489_s9 + $0x910] sm:$0xff]  ;;  %v7251_v46 = vld [vmem:[%s11489_s9 + $0x988] sm:$0xff] }
 0x459   :  { %7959 = vmatpush3.msra.mxu0 %v7215_v51  ;;  %7994 = vmatpush3.msra.mxu1 %v7247_v52  ;;  %v7203_v47 = vld [vmem:[%s11489_s9 + $0x808] sm:$0xff]  ;;  %v7218_v51 = vld [vmem:[%s11489_s9 + $0x880] sm:$0xff] }
 0x45a   :  { %7960 = vmatprep.subr.mxu0 %v7230_v53  ;;  %7995 = vmatprep.subr.mxu1 %v7262_v57  ;;  %v7235_v48 = vld [vmem:[%s11489_s9 + $0x908] sm:$0xff]  ;;  %v7250_v52 = vld [vmem:[%s11489_s9 + $0x980] sm:$0xff] }
 0x45b   :  { %7961 = vmatpush3.msra.mxu0 %v7214_v58  ;;  %7996 = vmatpush3.msra.mxu1 %v7246_v59  ;;  %v7202_v53 = vld [vmem:[%s11489_s9 + $0x800] sm:$0xff] }
 0x45c   :  { %7962 = vmatprep.subr.mxu0 %v7229_v60  ;;  %7997 = vmatprep.subr.mxu1 %v7261_v61  ;;  %v7234_v57 = vld [vmem:[%s11489_s9 + $0x900] sm:$0xff] }
 0x45d   :  { %7963 = vmatpush3.msra.mxu0 %v7213_v62  ;;  %7998 = vmatpush3.msra.mxu1 %v7245_v63 }
 0x45e   :  { %7964 = vmatprep.subr.mxu0 %v7228_v0  ;;  %7999 = vmatprep.subr.mxu1 %v7260_v2 }
 0x45f   :  { %7965 = vmatpush3.msra.mxu0 %v7212_v3  ;;  %8000 = vmatpush3.msra.mxu1 %v7244_v4 }
 0x460   :  { %7966 = vmatprep.subr.mxu0 %v7227_v5  ;;  %8001 = vmatprep.subr.mxu1 %v7259_v6 }
 0x461   :  { %7967 = vmatpush3.msra.mxu0 %v7211_v7  ;;  %8002 = vmatpush3.msra.mxu1 %v7243_v8 }
 0x462   :  { %7968 = vmatprep.subr.mxu0 %v7226_v9  ;;  %8003 = vmatprep.subr.mxu1 %v7258_v10  ;;  %v7302_v9 = vld [vmem:[%s11489_s9 + $0xaf8] sm:$0xff] }
 0x463   :  { %7969 = vmatpush3.msra.mxu0 %v7210_v11  ;;  %8004 = vmatpush3.msra.mxu1 %v7242_v12  ;;  %v7334_v10 = vld [vmem:[%s11489_s9 + $0xbf8] sm:$0xff] }
 0x464   :  { %7970 = vmatprep.subr.mxu0 %v7225_v13  ;;  %8005 = vmatprep.subr.mxu1 %v7257_v14  ;;  %v7286_v13 = vld [vmem:[%s11489_s9 + $0xa78] sm:$0xff] }
 0x465   :  { %7971 = vmatpush3.msra.mxu0 %v7209_v15  ;;  %8006 = vmatpush3.msra.mxu1 %v7241_v44  ;;  %v7318_v14 = vld [vmem:[%s11489_s9 + $0xb78] sm:$0xff]  ;;  %v7301_v15 = vld [vmem:[%s11489_s9 + $0xaf0] sm:$0xff] }
 0x466   :  { %7972 = vmatprep.subr.mxu0 %v7224_v45  ;;  %8007 = vmatprep.subr.mxu1 %v7256_v18  ;;  %v7333_v44 = vld [vmem:[%s11489_s9 + $0xbf0] sm:$0xff] }
 0x467   :  { %7973 = vmatpush3.msra.mxu0 %v7208_v19  ;;  %8008 = vmatpush3.msra.mxu1 %v7240_v22  ;;  %v7285_v45 = vld [vmem:[%s11489_s9 + $0xa70] sm:$0xff]  ;;  %v7300_v19 = vld [vmem:[%s11489_s9 + $0xae8] sm:$0xff] }
 0x468   :  { %7974 = vmatprep.subr.mxu0 %v7223_v23  ;;  %8009 = vmatprep.subr.mxu1 %v7255_v24  ;;  %v7317_v18 = vld [vmem:[%s11489_s9 + $0xb70] sm:$0xff]  ;;  %v7332_v22 = vld [vmem:[%s11489_s9 + $0xbe8] sm:$0xff] }
 0x469   :  { %7975 = vmatpush3.msra.mxu0 %v7207_v25  ;;  %8010 = vmatpush3.msra.mxu1 %v7239_v26  ;;  %v7284_v23 = vld [vmem:[%s11489_s9 + $0xa68] sm:$0xff]  ;;  %v7299_v25 = vld [vmem:[%s11489_s9 + $0xae0] sm:$0xff] }
 0x46a   :  { %7976 = vmatprep.subr.mxu0 %v7222_v27  ;;  %8011 = vmatprep.subr.mxu1 %v7254_v29  ;;  %v7316_v24 = vld [vmem:[%s11489_s9 + $0xb68] sm:$0xff]  ;;  %v7331_v26 = vld [vmem:[%s11489_s9 + $0xbe0] sm:$0xff] }
 0x46b   :  { %7977 = vmatpush3.msra.mxu0 %v7206_v30  ;;  %8012 = vmatpush3.msra.mxu1 %v7238_v31  ;;  %v7283_v27 = vld [vmem:[%s11489_s9 + $0xa60] sm:$0xff]  ;;  %v7298_v30 = vld [vmem:[%s11489_s9 + $0xad8] sm:$0xff] }
 0x46c   :  { %7978 = vmatprep.subr.mxu0 %v7221_v32  ;;  %8013 = vmatprep.subr.mxu1 %v7253_v54  ;;  %v7315_v29 = vld [vmem:[%s11489_s9 + $0xb60] sm:$0xff]  ;;  %v7330_v31 = vld [vmem:[%s11489_s9 + $0xbd8] sm:$0xff] }
 0x46d   :  { %7979 = vmatpush3.msra.mxu0 %v7205_v33  ;;  %8014 = vmatpush3.msra.mxu1 %v7237_v34  ;;  %v7282_v32 = vld [vmem:[%s11489_s9 + $0xa58] sm:$0xff]  ;;  %v7297_v33 = vld [vmem:[%s11489_s9 + $0xad0] sm:$0xff] }
 0x46e   :  { %7980 = vmatprep.subr.mxu0 %v7220_v35  ;;  %8015 = vmatprep.subr.mxu1 %v7252_v40  ;;  %v7314_v54 = vld [vmem:[%s11489_s9 + $0xb58] sm:$0xff]  ;;  %v7329_v34 = vld [vmem:[%s11489_s9 + $0xbd0] sm:$0xff] }
 0x46f   :  { %7981 = vmatpush3.msra.mxu0 %v7204_v41  ;;  %8016 = vmatpush3.msra.mxu1 %v7236_v42  ;;  %v7281_v35 = vld [vmem:[%s11489_s9 + $0xa50] sm:$0xff]  ;;  %v7296_v41 = vld [vmem:[%s11489_s9 + $0xac8] sm:$0xff] }
 0x470   :  { %7982 = vmatprep.subr.mxu0 %v7219_v43  ;;  %8017 = vmatprep.subr.mxu1 %v7251_v46  ;;  %v7313_v40 = vld [vmem:[%s11489_s9 + $0xb50] sm:$0xff]  ;;  %v7328_v42 = vld [vmem:[%s11489_s9 + $0xbc8] sm:$0xff] }
 0x471   :  { %7983 = vmatpush3.msra.mxu0 %v7203_v47  ;;  %8018 = vmatpush3.msra.mxu1 %v7235_v48  ;;  %v7280_v43 = vld [vmem:[%s11489_s9 + $0xa48] sm:$0xff]  ;;  %v7295_v47 = vld [vmem:[%s11489_s9 + $0xac0] sm:$0xff] }
 0x472   :  { %7984 = vmatprep.subr.mxu0 %v7218_v51  ;;  %8019 = vmatprep.subr.mxu1 %v7250_v52  ;;  %v7312_v46 = vld [vmem:[%s11489_s9 + $0xb48] sm:$0xff]  ;;  %v7327_v48 = vld [vmem:[%s11489_s9 + $0xbc0] sm:$0xff] }
 0x473   :  { %7985 = vmatpush3.msra.mxu0 %v7202_v53  ;;  %8020 = vmatpush3.msra.mxu1 %v7234_v57  ;;  %v7279_v51 = vld [vmem:[%s11489_s9 + $0xa40] sm:$0xff]  ;;  %v7294_v53 = vld [vmem:[%s11489_s9 + $0xab8] sm:$0xff] }
 0x474   :  { %7267 = vmatprep.subr.msk.bf16.mxu0 %vm512_vm3, %v9073_v16  ;;  %7269 = vmatprep.subr.msk.bf16.mxu1 %vm512_vm3, %v9075_v17  ;;  %v7311_v52 = vld [vmem:[%s11489_s9 + $0xb40] sm:$0xff]  ;;  %v7326_v57 = vld [vmem:[%s11489_s9 + $0xbb8] sm:$0xff] }
 0x510   :  { %v7916_v58 = vpop.f32.mrf.mxu0  ;;  %v7951_v59 = vpop.f32.mrf.mxu1 }
 0x512   :  { %v7917_v60 = vpop.f32.mrf.mxu0  ;;  %v7952_v61 = vpop.f32.mrf.mxu1 }
 0x513   :  { %v7918_v62 = vadd.f32 %v7917_v60, %v7916_v58  ;;  %v7953_v63 = vadd.f32 %v7952_v61, %v7951_v59  ;;  %v7278_v58 = vld [vmem:[%s11489_s9 + $0xa38] sm:$0xff]  ;;  %v7293_v60 = vld [vmem:[%s11489_s9 + $0xab0] sm:$0xff] }
 0x514   :  { %v1814_v0 = vpop.f32.mrf.mxu0  ;;  %v1855_v2 = vpop.f32.mrf.mxu1  ;;  %v7310_v59 = vld [vmem:[%s11489_s9 + $0xb38] sm:$0xff]  ;;  %v7325_v61 = vld [vmem:[%s11489_s9 + $0xbb0] sm:$0xff] }
 0x515   :  { %v1771_v3 = vadd.f32 %v7953_v63, %v7918_v62  ;;  %v7277_v62 = vld [vmem:[%s11489_s9 + $0xa30] sm:$0xff] }
 0x516   :  { %v1816_v4 = vpop.f32.mrf.mxu0  ;;  %v1857_v5 = vpop.f32.mrf.mxu1  ;;  %v7309_v63 = vld [vmem:[%s11489_s9 + $0xb30] sm:$0xff] }
 0x517   :  { %v10143_v6 = vadd.f32 %v1771_v3, %v9935_v28  ;;  %1991 = vmatprep.mubr.f32.mxu0 %v1816_v4  ;;  %2061 = vmatprep.mubr.f32.mxu1 %v1857_v5  ;;  %v7266_v28 = vld [vmem:[%s11488_s7 + $0xa] sm:$0x3]  ;;  %v7291_v5 = vld [vmem:[%s11489_s9 + $0xaa0] sm:$0xff] }
 0x518   :  { %v1818_v7 = vpop.f32.mrf.mxu0  ;;  %v1859_v8 = vpop.f32.mrf.mxu1  ;;  %1992 = vmatmul.mubr.f32.vlgmr.msra.gmra.mxu0 %v1814_v0  ;;  %2062 = vmatmul.mubr.f32.vlgmr.msra.gmra.mxu1 %v1855_v2  ;;  %v7292_v0 = vld [vmem:[%s11489_s9 + $0xaa8] sm:$0xff] }
 0x519   :  { %2088 = vmatpush1.bf16.msra.mxu0 %v9078_v20  ;;  %2129 = vmatpush1.bf16.msra.mxu1 %v9081_v21  ;;  %v7324_v2 = vld [vmem:[%s11489_s9 + $0xba8] sm:$0xff]  ;;  %v7323_v7 = vld [vmem:[%s11489_s9 + $0xba0] sm:$0xff] }
 0x51a   :  { %v1819_v11 = vpop.f32.mrf.mxu0  ;;  %v1860_v12 = vpop.f32.mrf.mxu1  ;;  %2105 = vmatprep.mubr.bf16.mxu0 %v8811_v1  ;;  %2146 = vmatprep.mubr.bf16.mxu1 %v8811_v1  ;;  %v7276_v3 = vld [vmem:[%s11489_s9 + $0xa28] sm:$0xff]  ;;  %v7275_v8 = vld [vmem:[%s11489_s9 + $0xa20] sm:$0xff] }
 0x51b   :  { %8024 = vmatprep.subr.mxu0 %v7302_v9  ;;  %8059 = vmatprep.subr.mxu1 %v7334_v10  ;;  %v7308_v4 = vld [vmem:[%s11489_s9 + $0xb28] sm:$0xff]  ;;  %v7307_v9 = vld [vmem:[%s11489_s9 + $0xb20] sm:$0xff]  ;;  %v7290_v10 = vld [vmem:[%s11489_s9 + $0xa98] sm:$0xff] }
 0x51c   :  { %7268 = vmatmul.mubr.msk.bf16.vlgmr.msra.gmra.mxu0 %vm508_vm4, %v7266_v28  ;;  %7270 = vmatmul.mubr.msk.bf16.vlgmr.msra.gmra.mxu1 %vm508_vm4, %v7266_v28  ;;  %v7322_v28 = vld [vmem:[%s11489_s9 + $0xb98] sm:$0xff] }
 0x51d   :  { %8025 = vmatpush3.msra.mxu0 %v7286_v13  ;;  %8060 = vmatpush3.msra.mxu1 %v7318_v14  ;;  %v7274_v11 = vld [vmem:[%s11489_s9 + $0xa18] sm:$0xff]  ;;  %v7289_v13 = vld [vmem:[%s11489_s9 + $0xa90] sm:$0xff] }
 0x51e   :  { %8026 = vmatprep.subr.mxu0 %v7301_v15  ;;  %8061 = vmatprep.subr.mxu1 %v7333_v44  ;;  %v7306_v12 = vld [vmem:[%s11489_s9 + $0xb18] sm:$0xff]  ;;  %v7321_v14 = vld [vmem:[%s11489_s9 + $0xb90] sm:$0xff] }
 0x51f   :  { %8027 = vmatpush3.msra.mxu0 %v7285_v45  ;;  %8062 = vmatpush3.msra.mxu1 %v7317_v18  ;;  %v7273_v15 = vld [vmem:[%s11489_s9 + $0xa10] sm:$0xff]  ;;  %v7288_v45 = vld [vmem:[%s11489_s9 + $0xa88] sm:$0xff] }
 0x520   :  { %8028 = vmatprep.subr.mxu0 %v7300_v19  ;;  %8063 = vmatprep.subr.mxu1 %v7332_v22  ;;  %v7305_v44 = vld [vmem:[%s11489_s9 + $0xb10] sm:$0xff]  ;;  %v7320_v18 = vld [vmem:[%s11489_s9 + $0xb88] sm:$0xff] }
 0x521   :  { %8029 = vmatpush3.msra.mxu0 %v7284_v23  ;;  %8064 = vmatpush3.msra.mxu1 %v7316_v24  ;;  %v7272_v19 = vld [vmem:[%s11489_s9 + $0xa08] sm:$0xff]  ;;  %v7287_v23 = vld [vmem:[%s11489_s9 + $0xa80] sm:$0xff] }
 0x522   :  { %8030 = vmatprep.subr.mxu0 %v7299_v25  ;;  %8065 = vmatprep.subr.mxu1 %v7331_v26  ;;  %v7304_v22 = vld [vmem:[%s11489_s9 + $0xb08] sm:$0xff]  ;;  %v7319_v24 = vld [vmem:[%s11489_s9 + $0xb80] sm:$0xff] }
 0x523   :  { %8031 = vmatpush3.msra.mxu0 %v7283_v27  ;;  %8066 = vmatpush3.msra.mxu1 %v7315_v29  ;;  %v7271_v25 = vld [vmem:[%s11489_s9 + $0xa00] sm:$0xff] }
 0x524   :  { %8032 = vmatprep.subr.mxu0 %v7298_v30  ;;  %8067 = vmatprep.subr.mxu1 %v7330_v31  ;;  %v7303_v26 = vld [vmem:[%s11489_s9 + $0xb00] sm:$0xff] }
 0x525   :  { %8033 = vmatpush3.msra.mxu0 %v7282_v32  ;;  %8068 = vmatpush3.msra.mxu1 %v7314_v54 }
 0x526   :  { %8034 = vmatprep.subr.mxu0 %v7297_v33  ;;  %8069 = vmatprep.subr.mxu1 %v7329_v34 }
 0x527   :  { %8035 = vmatpush3.msra.mxu0 %v7281_v35  ;;  %8070 = vmatpush3.msra.mxu1 %v7313_v40 }
 0x528   :  { %8036 = vmatprep.subr.mxu0 %v7296_v41  ;;  %8071 = vmatprep.subr.mxu1 %v7328_v42 }
 0x529   :  { %8037 = vmatpush3.msra.mxu0 %v7280_v43  ;;  %8072 = vmatpush3.msra.mxu1 %v7312_v46 }
 0x52a   :  { %8038 = vmatprep.subr.mxu0 %v7295_v47  ;;  %8073 = vmatprep.subr.mxu1 %v7327_v48  ;;  %v7371_v47 = vld [vmem:[%s11489_s9 + $0xcf8] sm:$0xff] }
 0x52b   :  { %8039 = vmatpush3.msra.mxu0 %v7279_v51  ;;  %8074 = vmatpush3.msra.mxu1 %v7311_v52  ;;  %v7403_v48 = vld [vmem:[%s11489_s9 + $0xdf8] sm:$0xff] }
 0x52c   :  { %8040 = vmatprep.subr.mxu0 %v7294_v53  ;;  %8075 = vmatprep.subr.mxu1 %v7326_v57  ;;  %v7355_v53 = vld [vmem:[%s11489_s9 + $0xc78] sm:$0xff] }
 0x52d   :  { %8041 = vmatpush3.msra.mxu0 %v7278_v58  ;;  %8076 = vmatpush3.msra.mxu1 %v7310_v59  ;;  %v7387_v57 = vld [vmem:[%s11489_s9 + $0xd78] sm:$0xff]  ;;  %v7370_v58 = vld [vmem:[%s11489_s9 + $0xcf0] sm:$0xff] }
 0x52e   :  { %8042 = vmatprep.subr.mxu0 %v7293_v60  ;;  %8077 = vmatprep.subr.mxu1 %v7325_v61  ;;  %v7402_v59 = vld [vmem:[%s11489_s9 + $0xdf0] sm:$0xff] }
 0x52f   :  { %8043 = vmatpush3.msra.mxu0 %v7277_v62  ;;  %8078 = vmatpush3.msra.mxu1 %v7309_v63  ;;  %v7354_v60 = vld [vmem:[%s11489_s9 + $0xc70] sm:$0xff]  ;;  %v7369_v62 = vld [vmem:[%s11489_s9 + $0xce8] sm:$0xff] }
 0x530   :  { %8044 = vmatprep.subr.mxu0 %v7292_v0  ;;  %8079 = vmatprep.subr.mxu1 %v7324_v2  ;;  %v7386_v61 = vld [vmem:[%s11489_s9 + $0xd70] sm:$0xff]  ;;  %v7401_v63 = vld [vmem:[%s11489_s9 + $0xde8] sm:$0xff] }
 0x531   :  { %8045 = vmatpush3.msra.mxu0 %v7276_v3  ;;  %8080 = vmatpush3.msra.mxu1 %v7308_v4  ;;  %v7353_v0 = vld [vmem:[%s11489_s9 + $0xc68] sm:$0xff]  ;;  %v7368_v3 = vld [vmem:[%s11489_s9 + $0xce0] sm:$0xff] }
 0x532   :  { %8046 = vmatprep.subr.mxu0 %v7291_v5  ;;  %8081 = vmatprep.subr.mxu1 %v7323_v7  ;;  %v7385_v2 = vld [vmem:[%s11489_s9 + $0xd68] sm:$0xff]  ;;  %v7400_v4 = vld [vmem:[%s11489_s9 + $0xde0] sm:$0xff] }
 0x533   :  { %8047 = vmatpush3.msra.mxu0 %v7275_v8  ;;  %8082 = vmatpush3.msra.mxu1 %v7307_v9  ;;  %v7352_v5 = vld [vmem:[%s11489_s9 + $0xc60] sm:$0xff]  ;;  %v7367_v8 = vld [vmem:[%s11489_s9 + $0xcd8] sm:$0xff] }
 0x534   :  { %8048 = vmatprep.subr.mxu0 %v7290_v10  ;;  %8083 = vmatprep.subr.mxu1 %v7322_v28  ;;  %v7384_v7 = vld [vmem:[%s11489_s9 + $0xd60] sm:$0xff]  ;;  %v7399_v9 = vld [vmem:[%s11489_s9 + $0xdd8] sm:$0xff] }
 0x535   :  { %8049 = vmatpush3.msra.mxu0 %v7274_v11  ;;  %8084 = vmatpush3.msra.mxu1 %v7306_v12  ;;  %v7351_v10 = vld [vmem:[%s11489_s9 + $0xc58] sm:$0xff]  ;;  %v7366_v11 = vld [vmem:[%s11489_s9 + $0xcd0] sm:$0xff] }
 0x536   :  { %8050 = vmatprep.subr.mxu0 %v7289_v13  ;;  %8085 = vmatprep.subr.mxu1 %v7321_v14  ;;  %v7383_v28 = vld [vmem:[%s11489_s9 + $0xd58] sm:$0xff]  ;;  %v7398_v12 = vld [vmem:[%s11489_s9 + $0xdd0] sm:$0xff] }
 0x537   :  { %8051 = vmatpush3.msra.mxu0 %v7273_v15  ;;  %8086 = vmatpush3.msra.mxu1 %v7305_v44  ;;  %v7350_v13 = vld [vmem:[%s11489_s9 + $0xc50] sm:$0xff]  ;;  %v7365_v15 = vld [vmem:[%s11489_s9 + $0xcc8] sm:$0xff] }
 0x538   :  { %8052 = vmatprep.subr.mxu0 %v7288_v45  ;;  %8087 = vmatprep.subr.mxu1 %v7320_v18  ;;  %v7382_v14 = vld [vmem:[%s11489_s9 + $0xd50] sm:$0xff]  ;;  %v7397_v44 = vld [vmem:[%s11489_s9 + $0xdc8] sm:$0xff] }
 0x539   :  { %8053 = vmatpush3.msra.mxu0 %v7272_v19  ;;  %8088 = vmatpush3.msra.mxu1 %v7304_v22  ;;  %v7349_v45 = vld [vmem:[%s11489_s9 + $0xc48] sm:$0xff]  ;;  %v7364_v19 = vld [vmem:[%s11489_s9 + $0xcc0] sm:$0xff] }
 0x53a   :  { %8054 = vmatprep.subr.mxu0 %v7287_v23  ;;  %8089 = vmatprep.subr.mxu1 %v7319_v24  ;;  %v7381_v18 = vld [vmem:[%s11489_s9 + $0xd48] sm:$0xff]  ;;  %v7396_v22 = vld [vmem:[%s11489_s9 + $0xdc0] sm:$0xff] }
 0x53b   :  { %8055 = vmatpush3.msra.mxu0 %v7271_v25  ;;  %8090 = vmatpush3.msra.mxu1 %v7303_v26  ;;  %v7348_v23 = vld [vmem:[%s11489_s9 + $0xc40] sm:$0xff]  ;;  %v7363_v25 = vld [vmem:[%s11489_s9 + $0xcb8] sm:$0xff] }
 0x53c   :  { %7336 = vmatprep.subr.msk.bf16.mxu0 %vm512_vm3, %v9073_v16  ;;  %7338 = vmatprep.subr.msk.bf16.mxu1 %vm512_vm3, %v9075_v17  ;;  %v7380_v24 = vld [vmem:[%s11489_s9 + $0xd40] sm:$0xff]  ;;  %v7395_v26 = vld [vmem:[%s11489_s9 + $0xdb8] sm:$0xff] }
 0x5d8   :  { %v7986_v27 = vpop.f32.mrf.mxu0  ;;  %v8021_v29 = vpop.f32.mrf.mxu1 }
 0x5da   :  { %v7987_v30 = vpop.f32.mrf.mxu0  ;;  %v8022_v31 = vpop.f32.mrf.mxu1 }
 0x5db   :  { %v7988_v32 = vadd.f32 %v7987_v30, %v7986_v27  ;;  %v8023_v54 = vadd.f32 %v8022_v31, %v8021_v29  ;;  %v7347_v27 = vld [vmem:[%s11489_s9 + $0xc38] sm:$0xff]  ;;  %v7362_v30 = vld [vmem:[%s11489_s9 + $0xcb0] sm:$0xff] }
 0x5dc   :  { %v2107_v33 = vpop.f32.mrf.mxu0  ;;  %v2148_v34 = vpop.f32.mrf.mxu1  ;;  %v7379_v29 = vld [vmem:[%s11489_s9 + $0xd38] sm:$0xff]  ;;  %v7394_v31 = vld [vmem:[%s11489_s9 + $0xdb0] sm:$0xff] }
 0x5dd   :  { %v2064_v35 = vadd.f32 %v8023_v54, %v7988_v32  ;;  %v7346_v32 = vld [vmem:[%s11489_s9 + $0xc30] sm:$0xff] }
 0x5de   :  { %v2109_v40 = vpop.f32.mrf.mxu0  ;;  %v2150_v41 = vpop.f32.mrf.mxu1  ;;  %v7378_v54 = vld [vmem:[%s11489_s9 + $0xd30] sm:$0xff] }
 0x5df   :  { %v10351_v42 = vadd.f32 %v2064_v35, %v10143_v6  ;;  %2284 = vmatprep.mubr.f32.mxu0 %v2109_v40  ;;  %2354 = vmatprep.mubr.f32.mxu1 %v2150_v41  ;;  %v7335_v6 = vld [vmem:[%s11488_s7 + $0xc] sm:$0x3]  ;;  %v7360_v41 = vld [vmem:[%s11489_s9 + $0xca0] sm:$0xff] }
 0x5e0   :  { %v2111_v43 = vpop.f32.mrf.mxu0  ;;  %v2152_v46 = vpop.f32.mrf.mxu1  ;;  %2285 = vmatmul.mubr.f32.vlgmr.msra.gmra.mxu0 %v2107_v33  ;;  %2355 = vmatmul.mubr.f32.vlgmr.msra.gmra.mxu1 %v2148_v34  ;;  %v7361_v33 = vld [vmem:[%s11489_s9 + $0xca8] sm:$0xff] }
 0x5e1   :  { %2381 = vmatpush1.bf16.msra.mxu0 %v9078_v20  ;;  %2422 = vmatpush1.bf16.msra.mxu1 %v9081_v21  ;;  %v7393_v34 = vld [vmem:[%s11489_s9 + $0xda8] sm:$0xff]  ;;  %v7392_v43 = vld [vmem:[%s11489_s9 + $0xda0] sm:$0xff] }
 0x5e2   :  { %v2112_v51 = vpop.f32.mrf.mxu0  ;;  %v2153_v52 = vpop.f32.mrf.mxu1  ;;  %2398 = vmatprep.mubr.bf16.mxu0 %v8811_v1  ;;  %2439 = vmatprep.mubr.bf16.mxu1 %v8811_v1  ;;  %v7345_v35 = vld [vmem:[%s11489_s9 + $0xc28] sm:$0xff]  ;;  %v7344_v46 = vld [vmem:[%s11489_s9 + $0xc20] sm:$0xff] }
 0x5e3   :  { %8094 = vmatprep.subr.mxu0 %v7371_v47  ;;  %8129 = vmatprep.subr.mxu1 %v7403_v48  ;;  %v7377_v40 = vld [vmem:[%s11489_s9 + $0xd28] sm:$0xff]  ;;  %v7376_v47 = vld [vmem:[%s11489_s9 + $0xd20] sm:$0xff]  ;;  %v7359_v48 = vld [vmem:[%s11489_s9 + $0xc98] sm:$0xff] }
 0x5e4   :  { %7337 = vmatmul.mubr.msk.bf16.vlgmr.msra.gmra.mxu0 %vm508_vm4, %v7335_v6  ;;  %7339 = vmatmul.mubr.msk.bf16.vlgmr.msra.gmra.mxu1 %vm508_vm4, %v7335_v6  ;;  %v7391_v6 = vld [vmem:[%s11489_s9 + $0xd98] sm:$0xff] }
 0x5e5   :  { %8095 = vmatpush3.msra.mxu0 %v7355_v53  ;;  %8130 = vmatpush3.msra.mxu1 %v7387_v57  ;;  %v7343_v51 = vld [vmem:[%s11489_s9 + $0xc18] sm:$0xff]  ;;  %v7358_v53 = vld [vmem:[%s11489_s9 + $0xc90] sm:$0xff] }
 0x5e6   :  { %8096 = vmatprep.subr.mxu0 %v7370_v58  ;;  %8131 = vmatprep.subr.mxu1 %v7402_v59  ;;  %v7375_v52 = vld [vmem:[%s11489_s9 + $0xd18] sm:$0xff]  ;;  %v7390_v57 = vld [vmem:[%s11489_s9 + $0xd90] sm:$0xff] }
 0x5e7   :  { %8097 = vmatpush3.msra.mxu0 %v7354_v60  ;;  %8132 = vmatpush3.msra.mxu1 %v7386_v61  ;;  %v7342_v58 = vld [vmem:[%s11489_s9 + $0xc10] sm:$0xff]  ;;  %v7357_v60 = vld [vmem:[%s11489_s9 + $0xc88] sm:$0xff] }
 0x5e8   :  { %8098 = vmatprep.subr.mxu0 %v7369_v62  ;;  %8133 = vmatprep.subr.mxu1 %v7401_v63  ;;  %v7374_v59 = vld [vmem:[%s11489_s9 + $0xd10] sm:$0xff]  ;;  %v7389_v61 = vld [vmem:[%s11489_s9 + $0xd88] sm:$0xff] }
 0x5e9   :  { %8099 = vmatpush3.msra.mxu0 %v7353_v0  ;;  %8134 = vmatpush3.msra.mxu1 %v7385_v2  ;;  %v7341_v62 = vld [vmem:[%s11489_s9 + $0xc08] sm:$0xff]  ;;  %v7356_v0 = vld [vmem:[%s11489_s9 + $0xc80] sm:$0xff] }
 0x5ea   :  { %8100 = vmatprep.subr.mxu0 %v7368_v3  ;;  %8135 = vmatprep.subr.mxu1 %v7400_v4  ;;  %v7373_v63 = vld [vmem:[%s11489_s9 + $0xd08] sm:$0xff]  ;;  %v7388_v2 = vld [vmem:[%s11489_s9 + $0xd80] sm:$0xff] }
 0x5eb   :  { %8101 = vmatpush3.msra.mxu0 %v7352_v5  ;;  %8136 = vmatpush3.msra.mxu1 %v7384_v7  ;;  %v7340_v3 = vld [vmem:[%s11489_s9 + $0xc00] sm:$0xff] }
 0x5ec   :  { %8102 = vmatprep.subr.mxu0 %v7367_v8  ;;  %8137 = vmatprep.subr.mxu1 %v7399_v9  ;;  %v7372_v4 = vld [vmem:[%s11489_s9 + $0xd00] sm:$0xff] }
 0x5ed   :  { %8103 = vmatpush3.msra.mxu0 %v7351_v10  ;;  %8138 = vmatpush3.msra.mxu1 %v7383_v28 }
 0x5ee   :  { %8104 = vmatprep.subr.mxu0 %v7366_v11  ;;  %8139 = vmatprep.subr.mxu1 %v7398_v12 }
 0x5ef   :  { %8105 = vmatpush3.msra.mxu0 %v7350_v13  ;;  %8140 = vmatpush3.msra.mxu1 %v7382_v14 }
 0x5f0   :  { %8106 = vmatprep.subr.mxu0 %v7365_v15  ;;  %8141 = vmatprep.subr.mxu1 %v7397_v44 }
 0x5f1   :  { %8107 = vmatpush3.msra.mxu0 %v7349_v45  ;;  %8142 = vmatpush3.msra.mxu1 %v7381_v18 }
 0x5f2   :  { %8108 = vmatprep.subr.mxu0 %v7364_v19  ;;  %8143 = vmatprep.subr.mxu1 %v7396_v22  ;;  %v7440_v19 = vld [vmem:[%s11489_s9 + $0xef8] sm:$0xff] }
 0x5f3   :  { %8109 = vmatpush3.msra.mxu0 %v7348_v23  ;;  %8144 = vmatpush3.msra.mxu1 %v7380_v24  ;;  %v7472_v22 = vld [vmem:[%s11489_s9 + $0xff8] sm:$0xff] }
 0x5f4   :  { %8110 = vmatprep.subr.mxu0 %v7363_v25  ;;  %8145 = vmatprep.subr.mxu1 %v7395_v26  ;;  %v7424_v25 = vld [vmem:[%s11489_s9 + $0xe78] sm:$0xff] }
 0x5f5   :  { %8111 = vmatpush3.msra.mxu0 %v7347_v27  ;;  %8146 = vmatpush3.msra.mxu1 %v7379_v29  ;;  %v7456_v26 = vld [vmem:[%s11489_s9 + $0xf78] sm:$0xff]  ;;  %v7439_v27 = vld [vmem:[%s11489_s9 + $0xef0] sm:$0xff] }
 0x5f6   :  { %8112 = vmatprep.subr.mxu0 %v7362_v30  ;;  %8147 = vmatprep.subr.mxu1 %v7394_v31  ;;  %v7471_v29 = vld [vmem:[%s11489_s9 + $0xff0] sm:$0xff] }
 0x5f7   :  { %8113 = vmatpush3.msra.mxu0 %v7346_v32  ;;  %8148 = vmatpush3.msra.mxu1 %v7378_v54  ;;  %v7423_v30 = vld [vmem:[%s11489_s9 + $0xe70] sm:$0xff]  ;;  %v7438_v32 = vld [vmem:[%s11489_s9 + $0xee8] sm:$0xff] }
 0x5f8   :  { %8114 = vmatprep.subr.mxu0 %v7361_v33  ;;  %8149 = vmatprep.subr.mxu1 %v7393_v34  ;;  %v7455_v31 = vld [vmem:[%s11489_s9 + $0xf70] sm:$0xff]  ;;  %v7470_v54 = vld [vmem:[%s11489_s9 + $0xfe8] sm:$0xff] }
 0x5f9   :  { %8115 = vmatpush3.msra.mxu0 %v7345_v35  ;;  %8150 = vmatpush3.msra.mxu1 %v7377_v40  ;;  %v7422_v33 = vld [vmem:[%s11489_s9 + $0xe68] sm:$0xff]  ;;  %v7437_v35 = vld [vmem:[%s11489_s9 + $0xee0] sm:$0xff] }
 0x5fa   :  { %8116 = vmatprep.subr.mxu0 %v7360_v41  ;;  %8151 = vmatprep.subr.mxu1 %v7392_v43  ;;  %v7454_v34 = vld [vmem:[%s11489_s9 + $0xf68] sm:$0xff]  ;;  %v7469_v40 = vld [vmem:[%s11489_s9 + $0xfe0] sm:$0xff] }
 0x5fb   :  { %8117 = vmatpush3.msra.mxu0 %v7344_v46  ;;  %8152 = vmatpush3.msra.mxu1 %v7376_v47  ;;  %v7421_v41 = vld [vmem:[%s11489_s9 + $0xe60] sm:$0xff]  ;;  %v7436_v46 = vld [vmem:[%s11489_s9 + $0xed8] sm:$0xff] }
 0x5fc   :  { %8118 = vmatprep.subr.mxu0 %v7359_v48  ;;  %8153 = vmatprep.subr.mxu1 %v7391_v6  ;;  %v7453_v43 = vld [vmem:[%s11489_s9 + $0xf60] sm:$0xff]  ;;  %v7468_v47 = vld [vmem:[%s11489_s9 + $0xfd8] sm:$0xff] }
 0x5fd   :  { %8119 = vmatpush3.msra.mxu0 %v7343_v51  ;;  %8154 = vmatpush3.msra.mxu1 %v7375_v52  ;;  %v7420_v48 = vld [vmem:[%s11489_s9 + $0xe58] sm:$0xff]  ;;  %v7435_v51 = vld [vmem:[%s11489_s9 + $0xed0] sm:$0xff] }
 0x5fe   :  { %8120 = vmatprep.subr.mxu0 %v7358_v53  ;;  %8155 = vmatprep.subr.mxu1 %v7390_v57  ;;  %v7452_v6 = vld [vmem:[%s11489_s9 + $0xf58] sm:$0xff]  ;;  %v7467_v52 = vld [vmem:[%s11489_s9 + $0xfd0] sm:$0xff] }
 0x5ff   :  { %8121 = vmatpush3.msra.mxu0 %v7342_v58  ;;  %8156 = vmatpush3.msra.mxu1 %v7374_v59  ;;  %v7419_v53 = vld [vmem:[%s11489_s9 + $0xe50] sm:$0xff]  ;;  %v7434_v58 = vld [vmem:[%s11489_s9 + $0xec8] sm:$0xff] }
 0x600   :  { %8122 = vmatprep.subr.mxu0 %v7357_v60  ;;  %8157 = vmatprep.subr.mxu1 %v7389_v61  ;;  %v7451_v57 = vld [vmem:[%s11489_s9 + $0xf50] sm:$0xff]  ;;  %v7466_v59 = vld [vmem:[%s11489_s9 + $0xfc8] sm:$0xff] }
 0x601   :  { %8123 = vmatpush3.msra.mxu0 %v7341_v62  ;;  %8158 = vmatpush3.msra.mxu1 %v7373_v63  ;;  %v7418_v60 = vld [vmem:[%s11489_s9 + $0xe48] sm:$0xff]  ;;  %v7433_v62 = vld [vmem:[%s11489_s9 + $0xec0] sm:$0xff] }
 0x602   :  { %8124 = vmatprep.subr.mxu0 %v7356_v0  ;;  %8159 = vmatprep.subr.mxu1 %v7388_v2  ;;  %v7450_v61 = vld [vmem:[%s11489_s9 + $0xf48] sm:$0xff]  ;;  %v7465_v63 = vld [vmem:[%s11489_s9 + $0xfc0] sm:$0xff] }
 0x603   :  { %8125 = vmatpush3.msra.mxu0 %v7340_v3  ;;  %8160 = vmatpush3.msra.mxu1 %v7372_v4  ;;  %v7417_v0 = vld [vmem:[%s11489_s9 + $0xe40] sm:$0xff]  ;;  %v7432_v3 = vld [vmem:[%s11489_s9 + $0xeb8] sm:$0xff] }
 0x604   :  { %7405 = vmatprep.subr.msk.bf16.mxu0 %vm512_vm3, %v9073_v16  ;;  %7407 = vmatprep.subr.msk.bf16.mxu1 %vm512_vm3, %v9075_v17  ;;  %v7449_v2 = vld [vmem:[%s11489_s9 + $0xf40] sm:$0xff]  ;;  %v7464_v4 = vld [vmem:[%s11489_s9 + $0xfb8] sm:$0xff] }
 0x6a0   :  { %v8056_v5 = vpop.f32.mrf.mxu0  ;;  %v8091_v7 = vpop.f32.mrf.mxu1 }
 0x6a2   :  { %v8057_v8 = vpop.f32.mrf.mxu0  ;;  %v8092_v9 = vpop.f32.mrf.mxu1 }
 0x6a3   :  { %v8058_v10 = vadd.f32 %v8057_v8, %v8056_v5  ;;  %v8093_v28 = vadd.f32 %v8092_v9, %v8091_v7  ;;  %v7416_v5 = vld [vmem:[%s11489_s9 + $0xe38] sm:$0xff]  ;;  %v7431_v8 = vld [vmem:[%s11489_s9 + $0xeb0] sm:$0xff] }
 0x6a4   :  { %v2400_v11 = vpop.f32.mrf.mxu0  ;;  %v2441_v12 = vpop.f32.mrf.mxu1  ;;  %v7448_v7 = vld [vmem:[%s11489_s9 + $0xf38] sm:$0xff]  ;;  %v7463_v9 = vld [vmem:[%s11489_s9 + $0xfb0] sm:$0xff] }
 0x6a5   :  { %v2357_v13 = vadd.f32 %v8093_v28, %v8058_v10  ;;  %v7415_v10 = vld [vmem:[%s11489_s9 + $0xe30] sm:$0xff] }
 0x6a6   :  { %v2402_v14 = vpop.f32.mrf.mxu0  ;;  %v2443_v15 = vpop.f32.mrf.mxu1  ;;  %v7447_v28 = vld [vmem:[%s11489_s9 + $0xf30] sm:$0xff] }
 0x6a7   :  { %v10559_v44 = vadd.f32 %v2357_v13, %v10351_v42  ;;  %2577 = vmatprep.mubr.f32.mxu0 %v2402_v14  ;;  %2647 = vmatprep.mubr.f32.mxu1 %v2443_v15  ;;  %v7404_v42 = vld [vmem:[%s11488_s7 + $0xe] sm:$0x3]  ;;  %v7429_v15 = vld [vmem:[%s11489_s9 + $0xea0] sm:$0xff] }
 0x6a8   :  { %v2404_v45 = vpop.f32.mrf.mxu0  ;;  %v2445_v18 = vpop.f32.mrf.mxu1  ;;  %2578 = vmatmul.mubr.f32.vlgmr.msra.gmra.mxu0 %v2400_v11  ;;  %2648 = vmatmul.mubr.f32.vlgmr.msra.gmra.mxu1 %v2441_v12  ;;  %v7430_v11 = vld [vmem:[%s11489_s9 + $0xea8] sm:$0xff] }
 0x6a9   :  { %2674 = vmatpush1.bf16.msra.mxu0 %v9078_v20  ;;  %2715 = vmatpush1.bf16.msra.mxu1 %v9081_v21  ;;  %v7462_v12 = vld [vmem:[%s11489_s9 + $0xfa8] sm:$0xff]  ;;  %v7461_v45 = vld [vmem:[%s11489_s9 + $0xfa0] sm:$0xff] }
 0x6aa   :  { %v2405_v23 = vpop.f32.mrf.mxu0  ;;  %v2446_v24 = vpop.f32.mrf.mxu1  ;;  %2691 = vmatprep.mubr.bf16.mxu0 %v8811_v1  ;;  %2732 = vmatprep.mubr.bf16.mxu1 %v8811_v1  ;;  %v7414_v13 = vld [vmem:[%s11489_s9 + $0xe28] sm:$0xff]  ;;  %v7413_v18 = vld [vmem:[%s11489_s9 + $0xe20] sm:$0xff] }
 0x6ab   :  { %8164 = vmatprep.subr.mxu0 %v7440_v19  ;;  %8199 = vmatprep.subr.mxu1 %v7472_v22  ;;  %v7446_v14 = vld [vmem:[%s11489_s9 + $0xf28] sm:$0xff]  ;;  %v7445_v19 = vld [vmem:[%s11489_s9 + $0xf20] sm:$0xff]  ;;  %v7428_v22 = vld [vmem:[%s11489_s9 + $0xe98] sm:$0xff] }
 0x6ac   :  { %7406 = vmatmul.mubr.msk.bf16.vlgmr.msra.gmra.mxu0 %vm508_vm4, %v7404_v42  ;;  %7408 = vmatmul.mubr.msk.bf16.vlgmr.msra.gmra.mxu1 %vm508_vm4, %v7404_v42  ;;  %v7460_v42 = vld [vmem:[%s11489_s9 + $0xf98] sm:$0xff] }
 0x6ad   :  { %8165 = vmatpush3.msra.mxu0 %v7424_v25  ;;  %8200 = vmatpush3.msra.mxu1 %v7456_v26  ;;  %v7412_v23 = vld [vmem:[%s11489_s9 + $0xe18] sm:$0xff]  ;;  %v7427_v25 = vld [vmem:[%s11489_s9 + $0xe90] sm:$0xff] }
 0x6ae   :  { %8166 = vmatprep.subr.mxu0 %v7439_v27  ;;  %8201 = vmatprep.subr.mxu1 %v7471_v29  ;;  %v7444_v24 = vld [vmem:[%s11489_s9 + $0xf18] sm:$0xff]  ;;  %v7459_v26 = vld [vmem:[%s11489_s9 + $0xf90] sm:$0xff] }
 0x6af   :  { %8167 = vmatpush3.msra.mxu0 %v7423_v30  ;;  %8202 = vmatpush3.msra.mxu1 %v7455_v31  ;;  %v7411_v27 = vld [vmem:[%s11489_s9 + $0xe10] sm:$0xff]  ;;  %v7426_v30 = vld [vmem:[%s11489_s9 + $0xe88] sm:$0xff] }
 0x6b0   :  { %8168 = vmatprep.subr.mxu0 %v7438_v32  ;;  %8203 = vmatprep.subr.mxu1 %v7470_v54  ;;  %v7443_v29 = vld [vmem:[%s11489_s9 + $0xf10] sm:$0xff]  ;;  %v7458_v31 = vld [vmem:[%s11489_s9 + $0xf88] sm:$0xff] }
 0x6b1   :  { %8169 = vmatpush3.msra.mxu0 %v7422_v33  ;;  %8204 = vmatpush3.msra.mxu1 %v7454_v34  ;;  %v7410_v32 = vld [vmem:[%s11489_s9 + $0xe08] sm:$0xff]  ;;  %v7425_v33 = vld [vmem:[%s11489_s9 + $0xe80] sm:$0xff] }
 0x6b2   :  { %8170 = vmatprep.subr.mxu0 %v7437_v35  ;;  %8205 = vmatprep.subr.mxu1 %v7469_v40  ;;  %v7442_v54 = vld [vmem:[%s11489_s9 + $0xf08] sm:$0xff]  ;;  %v7457_v34 = vld [vmem:[%s11489_s9 + $0xf80] sm:$0xff] }
 0x6b3   :  { %8171 = vmatpush3.msra.mxu0 %v7421_v41  ;;  %8206 = vmatpush3.msra.mxu1 %v7453_v43  ;;  %v7409_v35 = vld [vmem:[%s11489_s9 + $0xe00] sm:$0xff] }
 0x6b4   :  { %8172 = vmatprep.subr.mxu0 %v7436_v46  ;;  %8207 = vmatprep.subr.mxu1 %v7468_v47  ;;  %v7441_v40 = vld [vmem:[%s11489_s9 + $0xf00] sm:$0xff] }
 0x6b5   :  { %8173 = vmatpush3.msra.mxu0 %v7420_v48  ;;  %8208 = vmatpush3.msra.mxu1 %v7452_v6 }
 0x6b6   :  { %8174 = vmatprep.subr.mxu0 %v7435_v51  ;;  %8209 = vmatprep.subr.mxu1 %v7467_v52 }
 0x6b7   :  { %8175 = vmatpush3.msra.mxu0 %v7419_v53  ;;  %8210 = vmatpush3.msra.mxu1 %v7451_v57 }
 0x6b8   :  { %8176 = vmatprep.subr.mxu0 %v7434_v58  ;;  %8211 = vmatprep.subr.mxu1 %v7466_v59 }
 0x6b9   :  { %8177 = vmatpush3.msra.mxu0 %v7418_v60  ;;  %8212 = vmatpush3.msra.mxu1 %v7450_v61  ;;  %v7541_v61 = vld [vmem:[%s11489_s9 + $0x11f8] sm:$0xff] }
 0x6ba   :  { %8178 = vmatprep.subr.mxu0 %v7433_v62  ;;  %8213 = vmatprep.subr.mxu1 %v7465_v63 }
 0x6bb   :  { %8179 = vmatpush3.msra.mxu0 %v7417_v0  ;;  %8214 = vmatpush3.msra.mxu1 %v7449_v2  ;;  %v7493_v0 = vld [vmem:[%s11489_s9 + $0x1078] sm:$0xff]  ;;  %v7540_v2 = vld [vmem:[%s11489_s9 + $0x11f0] sm:$0xff] }
 0x6bc   :  { %8180 = vmatprep.subr.mxu0 %v7432_v3  ;;  %8215 = vmatprep.subr.mxu1 %v7464_v4  ;;  %v7492_v3 = vld [vmem:[%s11489_s9 + $0x1070] sm:$0xff] }
 0x6bd   :  { %8181 = vmatpush3.msra.mxu0 %v7416_v5  ;;  %8216 = vmatpush3.msra.mxu1 %v7448_v7  ;;  %v7524_v4 = vld [vmem:[%s11489_s9 + $0x1170] sm:$0xff]  ;;  %v7507_v5 = vld [vmem:[%s11489_s9 + $0x10e8] sm:$0xff] }
 0x6be   :  { %8182 = vmatprep.subr.mxu0 %v7431_v8  ;;  %8217 = vmatprep.subr.mxu1 %v7463_v9  ;;  %v7539_v7 = vld [vmem:[%s11489_s9 + $0x11e8] sm:$0xff] }
 0x6bf   :  { %8183 = vmatpush3.msra.mxu0 %v7415_v10  ;;  %8218 = vmatpush3.msra.mxu1 %v7447_v28  ;;  %v7491_v8 = vld [vmem:[%s11489_s9 + $0x1068] sm:$0xff]  ;;  %v7506_v10 = vld [vmem:[%s11489_s9 + $0x10e0] sm:$0xff] }
 0x6c0   :  { %8184 = vmatprep.subr.mxu0 %v7430_v11  ;;  %8219 = vmatprep.subr.mxu1 %v7462_v12  ;;  %v7523_v9 = vld [vmem:[%s11489_s9 + $0x1168] sm:$0xff]  ;;  %v7538_v28 = vld [vmem:[%s11489_s9 + $0x11e0] sm:$0xff] }
 0x6c1   :  { %8185 = vmatpush3.msra.mxu0 %v7414_v13  ;;  %8220 = vmatpush3.msra.mxu1 %v7446_v14  ;;  %v7490_v11 = vld [vmem:[%s11489_s9 + $0x1060] sm:$0xff]  ;;  %v7505_v13 = vld [vmem:[%s11489_s9 + $0x10d8] sm:$0xff] }
 0x6c2   :  { %8186 = vmatprep.subr.mxu0 %v7429_v15  ;;  %8221 = vmatprep.subr.mxu1 %v7461_v45  ;;  %v7522_v12 = vld [vmem:[%s11489_s9 + $0x1160] sm:$0xff]  ;;  %v7537_v14 = vld [vmem:[%s11489_s9 + $0x11d8] sm:$0xff] }
 0x6c3   :  { %8187 = vmatpush3.msra.mxu0 %v7413_v18  ;;  %8222 = vmatpush3.msra.mxu1 %v7445_v19  ;;  %v7489_v15 = vld [vmem:[%s11489_s9 + $0x1058] sm:$0xff]  ;;  %v7504_v18 = vld [vmem:[%s11489_s9 + $0x10d0] sm:$0xff] }
 0x6c4   :  { %8188 = vmatprep.subr.mxu0 %v7428_v22  ;;  %8223 = vmatprep.subr.mxu1 %v7460_v42  ;;  %v7521_v45 = vld [vmem:[%s11489_s9 + $0x1158] sm:$0xff]  ;;  %v7536_v19 = vld [vmem:[%s11489_s9 + $0x11d0] sm:$0xff] }
 0x6c5   :  { %8189 = vmatpush3.msra.mxu0 %v7412_v23  ;;  %8224 = vmatpush3.msra.mxu1 %v7444_v24  ;;  %v7488_v22 = vld [vmem:[%s11489_s9 + $0x1050] sm:$0xff]  ;;  %v7503_v23 = vld [vmem:[%s11489_s9 + $0x10c8] sm:$0xff] }
 0x6c6   :  { %8190 = vmatprep.subr.mxu0 %v7427_v25  ;;  %8225 = vmatprep.subr.mxu1 %v7459_v26  ;;  %v7520_v42 = vld [vmem:[%s11489_s9 + $0x1150] sm:$0xff]  ;;  %v7535_v24 = vld [vmem:[%s11489_s9 + $0x11c8] sm:$0xff] }
 0x6c7   :  { %8191 = vmatpush3.msra.mxu0 %v7411_v27  ;;  %8226 = vmatpush3.msra.mxu1 %v7443_v29  ;;  %v7487_v25 = vld [vmem:[%s11489_s9 + $0x1048] sm:$0xff]  ;;  %v7502_v27 = vld [vmem:[%s11489_s9 + $0x10c0] sm:$0xff] }
 0x6c8   :  { %8192 = vmatprep.subr.mxu0 %v7426_v30  ;;  %8227 = vmatprep.subr.mxu1 %v7458_v31  ;;  %v7519_v26 = vld [vmem:[%s11489_s9 + $0x1148] sm:$0xff]  ;;  %v7534_v29 = vld [vmem:[%s11489_s9 + $0x11c0] sm:$0xff] }
 0x6c9   :  { %8193 = vmatpush3.msra.mxu0 %v7410_v32  ;;  %8228 = vmatpush3.msra.mxu1 %v7442_v54  ;;  %v7486_v30 = vld [vmem:[%s11489_s9 + $0x1040] sm:$0xff]  ;;  %v7501_v32 = vld [vmem:[%s11489_s9 + $0x10b8] sm:$0xff] }
 0x6ca   :  { %8194 = vmatprep.subr.mxu0 %v7425_v33  ;;  %8229 = vmatprep.subr.mxu1 %v7457_v34  ;;  %v7518_v31 = vld [vmem:[%s11489_s9 + $0x1140] sm:$0xff]  ;;  %v7533_v54 = vld [vmem:[%s11489_s9 + $0x11b8] sm:$0xff] }
 0x6cb   :  { %8195 = vmatpush3.msra.mxu0 %v7409_v35  ;;  %8230 = vmatpush3.msra.mxu1 %v7441_v40  ;;  %v7485_v33 = vld [vmem:[%s11489_s9 + $0x1038] sm:$0xff]  ;;  %v7500_v35 = vld [vmem:[%s11489_s9 + $0x10b0] sm:$0xff] }
 0x6cc   :  { %7474 = vmatprep.subr.msk.bf16.mxu0 %vm512_vm3, %v9073_v16  ;;  %7476 = vmatprep.subr.msk.bf16.mxu1 %vm512_vm3, %v9075_v17  ;;  %v7509_v17 = vld [vmem:[%s11489_s9 + $0x10f8] sm:$0xff]  ;;  %v7532_v40 = vld [vmem:[%s11489_s9 + $0x11b0] sm:$0xff] }
 0x6cd   :  { %v7517_v34 = vld [vmem:[%s11489_s9 + $0x1138] sm:$0xff] }
 0x768   :  { %v8126_v41 = vpop.f32.mrf.mxu0  ;;  %v8161_v43 = vpop.f32.mrf.mxu1 }
 0x76a   :  { %v8127_v46 = vpop.f32.mrf.mxu0  ;;  %v8162_v47 = vpop.f32.mrf.mxu1 }
 0x76b   :  { %v8128_v48 = vadd.f32 %v8127_v46, %v8126_v41  ;;  %v8163_v6 = vadd.f32 %v8162_v47, %v8161_v43  ;;  %v7484_v41 = vld [vmem:[%s11489_s9 + $0x1030] sm:$0xff]  ;;  %v7499_v46 = vld [vmem:[%s11489_s9 + $0x10a8] sm:$0xff] }
 0x76c   :  { %v2693_v51 = vpop.f32.mrf.mxu0  ;;  %v2734_v52 = vpop.f32.mrf.mxu1  ;;  %v7516_v43 = vld [vmem:[%s11489_s9 + $0x1130] sm:$0xff]  ;;  %v7531_v47 = vld [vmem:[%s11489_s9 + $0x11a8] sm:$0xff] }
 0x76d   :  { %v2650_v53 = vadd.f32 %v8163_v6, %v8128_v48  ;;  %v7483_v48 = vld [vmem:[%s11489_s9 + $0x1028] sm:$0xff] }
 0x76e   :  { %v2695_v57 = vpop.f32.mrf.mxu0  ;;  %v2736_v58 = vpop.f32.mrf.mxu1  ;;  %v7515_v6 = vld [vmem:[%s11489_s9 + $0x1128] sm:$0xff] }
 0x76f   :  { %v10767_v59 = vadd.f32 %v2650_v53, %v10559_v44  ;;  %2870 = vmatprep.mubr.f32.mxu0 %v2695_v57  ;;  %2940 = vmatprep.mubr.f32.mxu1 %v2736_v58  ;;  %v7473_v44 = vld [vmem:[%s11488_s7 + $0x10] sm:$0x3]  ;;  %v7482_v53 = vld [vmem:[%s11489_s9 + $0x1020] sm:$0xff]  ;;  %v7497_v58 = vld [vmem:[%s11489_s9 + $0x1098] sm:$0xff] }
 0x770   :  { %v2697_v16 = vpop.f32.mrf.mxu0  ;;  %v2738_v60 = vpop.f32.mrf.mxu1  ;;  %2871 = vmatmul.mubr.f32.vlgmr.msra.gmra.mxu0 %v2693_v51  ;;  %2941 = vmatmul.mubr.f32.vlgmr.msra.gmra.mxu1 %v2734_v52  ;;  %v7498_v51 = vld [vmem:[%s11489_s9 + $0x10a0] sm:$0xff] }
 0x771   :  { %2967 = vmatpush1.bf16.msra.mxu0 %v9078_v20  ;;  %3008 = vmatpush1.bf16.msra.mxu1 %v9081_v21  ;;  %v7525_v20 = vld [vmem:[%s11489_s9 + $0x1178] sm:$0xff]  ;;  %v7508_v21 = vld [vmem:[%s11489_s9 + $0x10f0] sm:$0xff]  ;;  %v7530_v52 = vld [vmem:[%s11489_s9 + $0x11a0] sm:$0xff] }
 0x772   :  { %v2698_v62 = vpop.f32.mrf.mxu0  ;;  %v2739_v63 = vpop.f32.mrf.mxu1  ;;  %2984 = vmatprep.mubr.bf16.mxu0 %v8811_v1  ;;  %3025 = vmatprep.mubr.bf16.mxu1 %v8811_v1  ;;  %v7514_v57 = vld [vmem:[%s11489_s9 + $0x1120] sm:$0xff]  ;;  %v7529_v16 = vld [vmem:[%s11489_s9 + $0x1198] sm:$0xff] }
 0x773   :  { %8234 = vmatprep.subr.mxu0 %v7509_v17  ;;  %8269 = vmatprep.subr.mxu1 %v7541_v61  ;;  %v7481_v60 = vld [vmem:[%s11489_s9 + $0x1018] sm:$0xff]  ;;  %v7496_v61 = vld [vmem:[%s11489_s9 + $0x1090] sm:$0xff] }
 0x774   :  { %7475 = vmatmul.mubr.msk.bf16.vlgmr.msra.gmra.mxu0 %vm508_vm4, %v7473_v44  ;;  %7477 = vmatmul.mubr.msk.bf16.vlgmr.msra.gmra.mxu1 %vm508_vm4, %v7473_v44  ;;  %v7513_v17 = vld [vmem:[%s11489_s9 + $0x1118] sm:$0xff]  ;;  %v7528_v44 = vld [vmem:[%s11489_s9 + $0x1190] sm:$0xff] }
 0x775   :  { %8235 = vmatpush3.msra.mxu0 %v7493_v0  ;;  %8270 = vmatpush3.msra.mxu1 %v7525_v20  ;;  %v7480_v62 = vld [vmem:[%s11489_s9 + $0x1010] sm:$0xff]  ;;  %v7495_v0 = vld [vmem:[%s11489_s9 + $0x1088] sm:$0xff] }
 0x776   :  { %8236 = vmatprep.subr.mxu0 %v7508_v21  ;;  %8271 = vmatprep.subr.mxu1 %v7540_v2  ;;  %v7512_v63 = vld [vmem:[%s11489_s9 + $0x1110] sm:$0xff]  ;;  %v7527_v20 = vld [vmem:[%s11489_s9 + $0x1188] sm:$0xff] }
 0x777   :  { %8237 = vmatpush3.msra.mxu0 %v7492_v3  ;;  %8272 = vmatpush3.msra.mxu1 %v7524_v4  ;;  %v7479_v21 = vld [vmem:[%s11489_s9 + $0x1008] sm:$0xff]  ;;  %v7494_v3 = vld [vmem:[%s11489_s9 + $0x1080] sm:$0xff] }
 0x778   :  { %8238 = vmatprep.subr.mxu0 %v7507_v5  ;;  %8273 = vmatprep.subr.mxu1 %v7539_v7  ;;  %v7511_v2 = vld [vmem:[%s11489_s9 + $0x1108] sm:$0xff]  ;;  %v7526_v4 = vld [vmem:[%s11489_s9 + $0x1180] sm:$0xff] }
 0x779   :  { %8239 = vmatpush3.msra.mxu0 %v7491_v8  ;;  %8274 = vmatpush3.msra.mxu1 %v7523_v9  ;;  %v7478_v5 = vld [vmem:[%s11489_s9 + $0x1000] sm:$0xff] }
 0x77a   :  { %8240 = vmatprep.subr.mxu0 %v7506_v10  ;;  %8275 = vmatprep.subr.mxu1 %v7538_v28  ;;  %v7510_v7 = vld [vmem:[%s11489_s9 + $0x1100] sm:$0xff]  ;;  %s8813_s9 = smov 121  }
 0x77b   :  { %8241 = vmatpush3.msra.mxu0 %v7490_v11  ;;  %8276 = vmatpush3.msra.mxu1 %v7522_v12  ;;  %v3240_v8 = vld [vmem:[%s11490_s8] sm:$0xf]  ;;  %s8812_s8 = smov 114  }
 0x77c   :  { %8242 = vmatprep.subr.mxu0 %v7505_v13  ;;  %8277 = vmatprep.subr.mxu1 %v7537_v14 }
 0x77d   :  { %8243 = vmatpush3.msra.mxu0 %v7489_v15  ;;  %8278 = vmatpush3.msra.mxu1 %v7521_v45 }
 0x77e   :  { %8244 = vmatprep.subr.mxu0 %v7504_v18  ;;  %8279 = vmatprep.subr.mxu1 %v7536_v19 }
 0x77f   :  { %8245 = vmatpush3.msra.mxu0 %v7488_v22  ;;  %8280 = vmatpush3.msra.mxu1 %v7520_v42 }
 0x780   :  { %8246 = vmatprep.subr.mxu0 %v7503_v23  ;;  %8281 = vmatprep.subr.mxu1 %v7535_v24 }
 0x781   :  { %8247 = vmatpush3.msra.mxu0 %v7487_v25  ;;  %8282 = vmatpush3.msra.mxu1 %v7519_v26 }
 0x782   :  { %8248 = vmatprep.subr.mxu0 %v7502_v27  ;;  %8283 = vmatprep.subr.mxu1 %v7534_v29 }
 0x783   :  { %8249 = vmatpush3.msra.mxu0 %v7486_v30  ;;  %8284 = vmatpush3.msra.mxu1 %v7518_v31 }
 0x784   :  { %8250 = vmatprep.subr.mxu0 %v7501_v32  ;;  %8285 = vmatprep.subr.mxu1 %v7533_v54 }
 0x785   :  { %8251 = vmatpush3.msra.mxu0 %v7485_v33  ;;  %8286 = vmatpush3.msra.mxu1 %v7517_v34 }
 0x786   :  { %8252 = vmatprep.subr.mxu0 %v7500_v35  ;;  %8287 = vmatprep.subr.mxu1 %v7532_v40 }
 0x787   :  { %8253 = vmatpush3.msra.mxu0 %v7484_v41  ;;  %8288 = vmatpush3.msra.mxu1 %v7516_v43 }
 0x788   :  { %8254 = vmatprep.subr.mxu0 %v7499_v46  ;;  %8289 = vmatprep.subr.mxu1 %v7531_v47 }
 0x789   :  { %8255 = vmatpush3.msra.mxu0 %v7483_v48  ;;  %8290 = vmatpush3.msra.mxu1 %v7515_v6 }
 0x78a   :  { %8256 = vmatprep.subr.mxu0 %v7498_v51  ;;  %8291 = vmatprep.subr.mxu1 %v7530_v52 }
 0x78b   :  { %8257 = vmatpush3.msra.mxu0 %v7482_v53  ;;  %8292 = vmatpush3.msra.mxu1 %v7514_v57 }
 0x78c   :  { %8258 = vmatprep.subr.mxu0 %v7497_v58  ;;  %8293 = vmatprep.subr.mxu1 %v7529_v16 }
 0x78d   :  { %8259 = vmatpush3.msra.mxu0 %v7481_v60  ;;  %8294 = vmatpush3.msra.mxu1 %v7513_v17  ;;  %v5479_v60 = vld [vmem:[%s11491_s13] sm:$0xf]  ;;  %v8818_v17 = vmov 0.0  }
 0x78e   :  { %8260 = vmatprep.subr.mxu0 %v7496_v61  ;;  %8295 = vmatprep.subr.mxu1 %v7528_v44  ;;  %v6559_v61 = vld [vmem:[%s11492_s15] sm:$0xf] }
 0x78f   :  { %8261 = vmatpush3.msra.mxu0 %v7480_v62  ;;  %8296 = vmatpush3.msra.mxu1 %v7512_v63  ;;  %v4399_v44 = vld [vmem:[%s11493_s11] sm:$0xf] }
 0x790   :  { %8262 = vmatprep.subr.mxu0 %v7495_v0  ;;  %8297 = vmatprep.subr.mxu1 %v7527_v20  ;;  %v6744_v62 = vld [vmem:[%s11494_s18] sm:$0xff]  ;;  %v6745_v0 = vld [vmem:[%s11494_s18 + $0x8] sm:$0xff] }
 0x791   :  { %8263 = vmatpush3.msra.mxu0 %v7479_v21  ;;  %8298 = vmatpush3.msra.mxu1 %v7511_v2  ;;  %v502_v63 = vld [vmem:[%s11495_s6] sm:$0xf] }
 0x792   :  { %8264 = vmatprep.subr.mxu0 %v7494_v3  ;;  %8299 = vmatprep.subr.mxu1 %v7526_v4 }
 0x793   :  { %8265 = vmatpush3.msra.mxu0 %v7478_v5  ;;  %8300 = vmatpush3.msra.mxu1 %v7510_v7  ;;  %v3283_v5 = vld [vmem:[%s11496_s10] sm:$0x3]  ;;  %v7543_v7 = vld [vmem:[%s11496_s10 + $0x2] sm:$0x3] }
 0x794   :  { %3243 = vperm.xlu1 %8720, %v3240_v8   ;;  %8412 = vmatprep.subr.bf16.mxu0 %v8818_v17  ;;  %v11013_v8 = vld [vmem:[%s11497_s16 + $0x2] sm:$0x3] }
 0x795   :  { %8418 = vmatprep.subr.bf16.mxu1 %v8818_v17 }
 0x80f   :  { %v3244_v33 = vpop.permute.xlu1 %3243 }
 0x830   :  { %v8196_v9 = vpop.f32.mrf.mxu0  ;;  %v8231_v10 = vpop.f32.mrf.mxu1 }
 0x832   :  { %v8197_v28 = vpop.f32.mrf.mxu0  ;;  %v8232_v11 = vpop.f32.mrf.mxu1 }
 0x833   :  { %v8198_v12 = vadd.f32 %v8197_v28, %v8196_v9  ;;  %v8233_v13 = vadd.f32 %v8232_v11, %v8231_v10  ;;  %v11028_v9 = vld [vmem:[%s11497_s16] sm:$0x3] }
 0x834   :  { %v2986_v14 = vpop.f32.mrf.mxu0  ;;  %v3027_v15 = vpop.f32.mrf.mxu1 }
 0x835   :  { %v2943_v45 = vadd.f32 %v8233_v13, %v8198_v12  ;;  %v7550_v12 = vld [vmem:[%s11496_s10 + $0x4] sm:$0x3] }
 0x836   :  { %v2988_v18 = vpop.f32.mrf.mxu0  ;;  %v3029_v19 = vpop.f32.mrf.mxu1 }
 0x837   :  { %3163 = vmatprep.mubr.f32.mxu0 %v2988_v18  ;;  %3233 = vmatprep.mubr.f32.mxu1 %v3029_v19  ;;  %v2946_v22 = vadd.f32 %v2943_v45, %v10767_v59  ;;  %v11050_v19 = vld [vmem:[%s11497_s16 + $0x4] sm:$0x3] }
 0x838   :  { %v2990_v42 = vpop.f32.mrf.mxu0  ;;  %v3031_v23 = vpop.f32.mrf.mxu1  ;;  %3164 = vmatmul.mubr.f32.vlgmr.msra.gmra.mxu0 %v2986_v14  ;;  %3234 = vmatmul.mubr.f32.vlgmr.msra.gmra.mxu1 %v3027_v15 }
 0x839   :  { %8414 = vmatprep.mubr.msk.bf16.mxu0 %vm8819_vm7, %v8818_v17  ;;  %8420 = vmatprep.mubr.msk.bf16.mxu1 %vm8819_vm7, %v8818_v17 }
 0x83a   :  { %v2991_v24 = vpop.f32.mrf.mxu0  ;;  %v3032_v25 = vpop.f32.mrf.mxu1 }
 0x8f8   :  { %v8266_v26 = vpop.f32.mrf.mxu0  ;;  %v8301_v27 = vpop.f32.mrf.mxu1 }
 0x8fa   :  { %v8267_v29 = vpop.f32.mrf.mxu0  ;;  %v8302_v30 = vpop.f32.mrf.mxu1 }
 0x8fb   :  { %v8268_v31 = vadd.f32 %v8267_v29, %v8266_v26  ;;  %v8303_v32 = vadd.f32 %v8302_v30, %v8301_v27  ;;  %v7555_v29 = vld [vmem:[%s11496_s10 + $0x6] sm:$0x3] }
 0x8fd   :  { %v3236_v54 = vadd.f32 %v8303_v32, %v8268_v31  ;;  %v11069_v32 = vld [vmem:[%s11497_s16 + $0x6] sm:$0x3] }
 0x8ff   :  { %v3239_v34 = vadd.f32 %v3236_v54, %v2946_v22 }
 0x901   :  { %v3246_v35 = vadd.f32 %v3244_v33, %v3239_v34 }
 0x903   :  { %3252 = vrot.lane.b32.xlu0 %v3246_v35, %s8812_s8  ;;  %3248 = vrot.lane.b32.xlu1 %v3246_v35, %s8813_s9 }
 0x907   :  { %3260 = vrot.lane.b32.xlu0 %v3246_v35, %s8814_s26  ;;  %3256 = vrot.lane.b32.xlu1 %v3246_v35, %s8815_s23 }
 0x90b   :  { %3268 = vrot.lane.b32.xlu0 %v3246_v35, %s8816_s1  ;;  %3264 = vrot.lane.b32.xlu1 %v3246_v35, %s8817_s24 }
 0x975   :  { %v3253_v59 = vpop.permute.xlu0 %3252  ;;  %v3249_v40 = vpop.permute.xlu1 %3248 }
 0x976   :  { %v3251_v41 = vmax.f32 %v3246_v35, %v3249_v40  ;;  %v7560_v40 = vld [vmem:[%s11496_s10 + $0x8] sm:$0x3] }
 0x978   :  { %v3255_v43 = vmax.f32 %v3251_v41, %v3253_v59 }
 0x979   :  { %v3261_v46 = vpop.permute.xlu0 %3260  ;;  %v3257_v47 = vpop.permute.xlu1 %3256 }
 0x97a   :  { %v3259_v48 = vmax.f32 %v3255_v43, %v3257_v47 }
 0x97c   :  { %v3263_v6 = vmax.f32 %v3259_v48, %v3261_v46  ;;  %v11088_v46 = vld [vmem:[%s11497_s16 + $0x8] sm:$0x3] }
 0x97d   :  { %v3265_v51 = vpop.permute.xlu1 %3264  ;;  %v3269_v53 = vpop.permute.xlu0 %3268 }
 0x97e   :  { %v3267_v52 = vmax.f32 %v3263_v6, %v3265_v51 }
 0x980   :  { %v3271_v57 = vmax.f32 %v3267_v52, %v3269_v53  ;;  %v7565_v53 = vld [vmem:[%s11496_s10 + $0xa] sm:$0x3] }
 0x982   :  { %v3277_v58 = vsel %vm3276_vm5, %v3271_v57, -inf  ;;  %v3273_v16 = vsel %vm3272_vm6, %v3271_v57, -inf }
 0x983   :  { %3278 = vmax.xlane.f32.xlu0 %v3277_v58  ;;  %3274 = vmax.xlane.f32.xlu1 %v3273_v16  ;;  %v11107_v16 = vld [vmem:[%s11497_s16 + $0xa] sm:$0x3] }
 0x994   :  { %5482 = vperm.xlu1 %8720, %v5479_v60  }
 0x998   :  { %6562 = vperm.xlu1 %8720, %v6559_v61  }
 0x999   :  { %4402 = vperm.xlu0 %8719, %v4399_v44  }
 0x99c   :  { %6748 = vperm.xlu1 %8720, %v6744_v62  }
 0x99d   :  { %505 = vperm.xlu0 %8719, %v502_v63  }
 0x9a1   :  { %6753 = vperm.xlu0 %8719, %v6745_v0   ;;  %v7570_v0 = vld [vmem:[%s11496_s10 + $0xc] sm:$0x3] }
 0xa0c   :  { %v3279_v20 = vpop.xlane.xlu0 %3278  ;;  %v3275_v21 = vpop.xlane.xlu1 %3274 }
 0xa0d   :  { %v3281_v2 = vsel %vm3280_vm8, %v3275_v21, %v3279_v20 }
 0xa0e   :  { %v3282_v3 = vpack.c.bf16 %v3281_v2, %v3281_v2  ;;  %v11126_v2 = vld [vmem:[%s11497_s16 + $0xc] sm:$0x3] }
 0xa10   :  { %v10999_v4 = vsel %vm512_vm3, %v3282_v3, 0 }
 0xa11   :  { %8413 = vmatpush3.bf16.msra.mxu0 %v10999_v4  ;;  %8419 = vmatpush3.bf16.msra.mxu1 %v10999_v4 }
 0xa12   :  { %8424 = vmatprep.subr.mxu0 %v8818_v17  ;;  %8429 = vmatprep.subr.mxu1 %v8818_v17 }
 0xa14   :  { %8415 = vmatmul.mubr.msk.bf16.vlgmr.msra.gmra.mxu0 %vm508_vm4, %v3283_v5  ;;  %8421 = vmatmul.mubr.msk.bf16.vlgmr.msra.gmra.mxu1 %vm508_vm4, %v7543_v7 }
 0xa15   :  { %8425 = vmatpush3.msk.msra.mxu0 %vm512_vm3, %v11013_v8  ;;  %8426 = vmatprep.mubr.msk.f32.mxu0 %vm8819_vm7, %v8818_v17 }
 0xa16   :  { %8431 = vmatprep.mubr.msk.f32.mxu1 %vm8819_vm7, %v8818_v17  ;;  %8434 = vmatprep.subr.bf16.mxu0 %v8818_v17 }
 0xa17   :  { %8430 = vmatpush3.msk.msra.mxu1 %vm512_vm3, %v11028_v9 }
 0xa18   :  { %8440 = vmatprep.subr.mxu1 %v8818_v17 }
 0xad4   :  { %v3324_v10 = vpop.f32.mrf.mxu0  ;;  %v3370_v28 = vpop.f32.mrf.mxu1 }
 0xad5   :  { %8427 = vmatmul.mubr.msk.f32.vlgmr.msra.gmra.mxu0 %vm3378_vm9, %v3370_v28  ;;  %8432 = vmatmul.mubr.msk.f32.vlgmr.msra.gmra.mxu1 %vm3378_vm9, %v3324_v10 }
 0xad6   :  { %8435 = vmatpush3.bf16.msra.mxu0 %v10999_v4  ;;  %v8422_v11 = vpop.f32.mrf.mxu1  ;;  %8436 = vmatprep.mubr.msk.bf16.mxu0 %vm8819_vm7, %v8818_v17  ;;  %v8416_v13 = vpop.f32.mrf.mxu0 }
 0xad7   :  { %8442 = vmatprep.mubr.msk.f32.mxu1 %vm8819_vm7, %v8818_v17  ;;  %8451 = vmatprep.subr.mxu0 %v8818_v17  ;;  %v7575_v11 = vld [vmem:[%s11496_s10 + $0xe] sm:$0x3] }
 0xad8   :  { %v3373_v14 = vpop.f32.mrf.mxu1  ;;  %v3327_v15 = vpop.f32.mrf.mxu0  ;;  %8441 = vmatpush3.msk.msra.mxu1 %vm512_vm3, %v11050_v19 }
 0xad9   :  { %8437 = vmatmul.mubr.msk.bf16.vlgmr.msra.gmra.mxu0 %vm508_vm4, %v7550_v12  ;;  %8445 = vmatprep.subr.bf16.mxu1 %v8818_v17  ;;  %v11145_v14 = vld [vmem:[%s11497_s16 + $0xe] sm:$0x3] }
 0xada   :  { %v8423_v45 = vpop.f32.mrf.mxu1  ;;  %v8417_v18 = vpop.f32.mrf.mxu0  ;;  %8453 = vmatprep.mubr.msk.f32.mxu0 %vm8819_vm7, %v8818_v17  ;;  %8452 = vmatpush3.msk.msra.mxu0 %vm512_vm3, %v11069_v32 }
 0xadb   :  { %8456 = vmatprep.subr.bf16.mxu0 %v8818_v17 }
 0xb95   :  { %v3451_v22 = vpop.f32.mrf.mxu0  ;;  %v3527_v42 = vpop.f32.mrf.mxu1 }
 0xb96   :  { %v3528_v23 = vadd.f32 %v3527_v42, %v3451_v22 }
 0xb97   :  { %v8428_v24 = vpop.f32.mrf.mxu0  ;;  %v8433_v25 = vpop.f32.mrf.mxu1 }
 0xb99   :  { %v3570_v26 = vpop.f32.mrf.mxu0 }
 0xb9a   :  { %8443 = vmatmul.mubr.msk.f32.vlgmr.msra.gmra.mxu1 %vm3378_vm9, %v3570_v26 }
 0xb9b   :  { %8446 = vmatpush3.bf16.msra.mxu1 %v10999_v4  ;;  %v8438_v27 = vpop.f32.mrf.mxu0  ;;  %8447 = vmatprep.mubr.msk.bf16.mxu1 %vm8819_vm7, %v8818_v17 }
 0xb9c   :  { %8462 = vmatprep.subr.mxu1 %v8818_v17 }
 0xb9d   :  { %v3573_v30 = vpop.f32.mrf.mxu0 }
 0xb9e   :  { %8448 = vmatmul.mubr.msk.bf16.vlgmr.msra.gmra.mxu1 %vm508_vm4, %v7555_v29 }
 0xb9f   :  { %v8439_v31 = vpop.f32.mrf.mxu0  ;;  %8464 = vmatprep.mubr.msk.f32.mxu1 %vm8819_vm7, %v8818_v17  ;;  %8463 = vmatpush3.msk.msra.mxu1 %vm512_vm3, %v11088_v46 }
 0xba0   :  { %8467 = vmatprep.subr.bf16.mxu1 %v8818_v17 }
 0xc5a   :  { %v3650_v54 = vpop.f32.mrf.mxu1 }
 0xc5b   :  { %v3654_v33 = vadd.f32 %v3650_v54, %v3528_v23  ;;  %v7580_v23 = vld [vmem:[%s11496_s10 + $0x10] sm:$0x3] }
 0xc5c   :  { %v8444_v34 = vpop.f32.mrf.mxu1 }
 0xc5e   :  { %v3694_v35 = vpop.f32.mrf.mxu1 }
 0xc5f   :  { %8454 = vmatmul.mubr.msk.f32.vlgmr.msra.gmra.mxu0 %vm3378_vm9, %v3694_v35 }
 0xc60   :  { %8457 = vmatpush3.bf16.msra.mxu0 %v10999_v4  ;;  %v8449_v59 = vpop.f32.mrf.mxu1  ;;  %8458 = vmatprep.mubr.msk.bf16.mxu0 %vm8819_vm7, %v8818_v17 }
 0xc61   :  { %8473 = vmatprep.subr.mxu0 %v8818_v17  ;;  %v4403_v59 = vpop.permute.xlu0 %4402 }
 0xc62   :  { %v3697_v41 = vpop.f32.mrf.mxu1 }
 0xc63   :  { %8459 = vmatmul.mubr.msk.bf16.vlgmr.msra.gmra.mxu0 %vm508_vm4, %v7560_v40 }
 0xc64   :  { %v8450_v43 = vpop.f32.mrf.mxu1  ;;  %8475 = vmatprep.mubr.msk.f32.mxu0 %vm8819_vm7, %v8818_v17  ;;  %8474 = vmatpush3.msk.msra.mxu0 %vm512_vm3, %v11107_v16 }
 0xc65   :  { %8478 = vmatprep.subr.bf16.mxu0 %v8818_v17 }
 0xd1f   :  { %v3774_v47 = vpop.f32.mrf.mxu0 }
 0xd20   :  { %v3778_v48 = vadd.f32 %v3774_v47, %v3654_v33 }
 0xd21   :  { %v8455_v6 = vpop.f32.mrf.mxu0 }
 0xd22   :  { %v4408_v6 = vld [vmem:[%s11498_s12] sm:$0x3] }
 0xd23   :  { %v3818_v51 = vpop.f32.mrf.mxu0 }
 0xd24   :  { %8465 = vmatmul.mubr.msk.f32.vlgmr.msra.gmra.mxu1 %vm3378_vm9, %v3818_v51  ;;  %v7586_v51 = vld [vmem:[%s11498_s12 + $0x2] sm:$0x3] }
 0xd25   :  { %8468 = vmatpush3.bf16.msra.mxu1 %v10999_v4  ;;  %v8460_v52 = vpop.f32.mrf.mxu0  ;;  %8469 = vmatprep.mubr.msk.bf16.mxu1 %vm8819_vm7, %v8818_v17 }
 0xd26   :  { %8484 = vmatprep.subr.mxu1 %v8818_v17 }
 0xd27   :  { %v3821_v57 = vpop.f32.mrf.mxu0 }
 0xd28   :  { %8470 = vmatmul.mubr.msk.bf16.vlgmr.msra.gmra.mxu1 %vm508_vm4, %v7565_v53 }
 0xd29   :  { %v8461_v58 = vpop.f32.mrf.mxu0  ;;  %8486 = vmatprep.mubr.msk.f32.mxu1 %vm8819_vm7, %v8818_v17  ;;  %8485 = vmatpush3.msk.msra.mxu1 %vm512_vm3, %v11126_v2 }
 0xd2a   :  { %8489 = vmatprep.subr.bf16.mxu1 %v8818_v17  ;;  %v7592_v58 = vld [vmem:[%s11498_s12 + $0x4] sm:$0x3] }
 0xde4   :  { %v3898_v60 = vpop.f32.mrf.mxu1 }
 0xde5   :  { %v3902_v61 = vadd.f32 %v3898_v60, %v3778_v48 }
 0xde6   :  { %v8466_v44 = vpop.f32.mrf.mxu1 }
 0xde8   :  { %v3942_v62 = vpop.f32.mrf.mxu1 }
 0xde9   :  { %8476 = vmatmul.mubr.msk.f32.vlgmr.msra.gmra.mxu0 %vm3378_vm9, %v3942_v62 }
 0xdea   :  { %8479 = vmatpush3.bf16.msra.mxu0 %v10999_v4  ;;  %v8471_v63 = vpop.f32.mrf.mxu1  ;;  %8480 = vmatprep.mubr.msk.bf16.mxu0 %vm8819_vm7, %v8818_v17 }
 0xdeb   :  { %8495 = vmatprep.subr.mxu0 %v8818_v17 }
 0xdec   :  { %v3945_v20 = vpop.f32.mrf.mxu1 }
 0xded   :  { %8481 = vmatmul.mubr.msk.bf16.vlgmr.msra.gmra.mxu0 %vm508_vm4, %v7570_v0 }
 0xdee   :  { %v8472_v21 = vpop.f32.mrf.mxu1  ;;  %8497 = vmatprep.mubr.msk.f32.mxu0 %vm8819_vm7, %v8818_v17  ;;  %8496 = vmatpush3.msk.msra.mxu0 %vm512_vm3, %v11145_v14 }
 0xdef   :  { %8500 = vmatprep.subr.bf16.mxu0 %v8818_v17 }
 0xea9   :  { %v4022_v3 = vpop.f32.mrf.mxu0 }
 0xeaa   :  { %v4026_v5 = vadd.f32 %v4022_v3, %v3902_v61 }
 0xeab   :  { %v8477_v7 = vpop.f32.mrf.mxu0 }
 0xead   :  { %v4066_v10 = vpop.f32.mrf.mxu0 }
 0xeae   :  { %8487 = vmatmul.mubr.msk.f32.vlgmr.msra.gmra.mxu1 %vm3378_vm9, %v4066_v10 }
 0xeaf   :  { %8490 = vmatpush3.bf16.msra.mxu1 %v10999_v4  ;;  %v8482_v28 = vpop.f32.mrf.mxu0  ;;  %8491 = vmatprep.mubr.msk.bf16.mxu1 %vm8819_vm7, %v8818_v17 }
 0xeb0   :  { %8506 = vmatprep.subr.mxu1 %v8818_v17  ;;  %v7596_v28 = vld [vmem:[%s11498_s12 + $0x6] sm:$0x3] }
 0xeb1   :  { %v4069_v12 = vpop.f32.mrf.mxu0 }
 0xeb2   :  { %8492 = vmatmul.mubr.msk.bf16.vlgmr.msra.gmra.mxu1 %vm508_vm4, %v7575_v11 }
 0xeb3   :  { %v8483_v13 = vpop.f32.mrf.mxu0  ;;  %8508 = vmatprep.mubr.msk.f32.mxu1 %vm8819_vm7, %v8818_v17 }
 0xf6e   :  { %v4146_v15 = vpop.f32.mrf.mxu1 }
 0xf6f   :  { %v4150_v45 = vadd.f32 %v4146_v15, %v4026_v5 }
 0xf70   :  { %v8488_v18 = vpop.f32.mrf.mxu1 }
 0xf72   :  { %v4190_v22 = vpop.f32.mrf.mxu1 }
 0xf73   :  { %8498 = vmatmul.mubr.msk.f32.vlgmr.msra.gmra.mxu0 %vm3378_vm9, %v4190_v22 }
 0xf74   :  { %8501 = vmatpush3.bf16.msra.mxu0 %v10999_v4  ;;  %v8493_v42 = vpop.f32.mrf.mxu1  ;;  %8502 = vmatprep.mubr.msk.bf16.mxu0 %vm8819_vm7, %v8818_v17  ;;  %v11164_v4 = vld [vmem:[%s11497_s16 + $0x10] sm:$0x3] }
 0xf75   :  { %8517 = vmatprep.subr.bf16.mxu0 %v8818_v17  ;;  %8507 = vmatpush3.msk.msra.mxu1 %vm512_vm3, %v11164_v4  ;;  %v7600_v42 = vld [vmem:[%s11498_s12 + $0x8] sm:$0x3] }
 0xf76   :  { %v4193_v24 = vpop.f32.mrf.mxu1  ;;  %8511 = vmatprep.subr.bf16.mxu1 %v8818_v17 }
 0xf77   :  { %8503 = vmatmul.mubr.msk.bf16.vlgmr.msra.gmra.mxu0 %vm508_vm4, %v7580_v23 }
 0xf78   :  { %v8494_v25 = vpop.f32.mrf.mxu1  ;;  %8519 = vmatprep.mubr.msk.bf16.mxu0 %vm8819_vm7, %v8818_v17 }
0x1033   :  { %v4270_v26 = vpop.f32.mrf.mxu0 }
0x1034   :  { %v4274_v27 = vadd.f32 %v4270_v26, %v4150_v45 }
0x1035   :  { %v8499_v29 = vpop.f32.mrf.mxu0 }
0x1037   :  { %v4314_v30 = vpop.f32.mrf.mxu0 }
0x1038   :  { %8509 = vmatmul.mubr.msk.f32.vlgmr.msra.gmra.mxu1 %vm3378_vm9, %v4314_v30 }
0x1039   :  { %v8504_v31 = vpop.f32.mrf.mxu0  ;;  %8513 = vmatprep.mubr.msk.bf16.mxu1 %vm8819_vm7, %v8818_v17 }
0x103a   :  { %v7604_v31 = vld [vmem:[%s11498_s12 + $0xa] sm:$0x3] }
0x103b   :  { %v4317_v54 = vpop.f32.mrf.mxu0 }
0x103d   :  { %v8505_v33 = vpop.f32.mrf.mxu0 }
0x10f8   :  { %v4394_v34 = vpop.f32.mrf.mxu1 }
0x10f9   :  { %v4398_v35 = vadd.f32 %v4394_v34, %v4274_v27 }
0x10fa   :  { %v8510_v40 = vpop.f32.mrf.mxu1 }
0x10fb   :  { %v4405_v41 = vadd.f32 %v4403_v59, %v4398_v35 }
0x10fd   :  { %v4406_v43 = vmax.f32 %v4405_v41, 0.0 }
0x10ff   :  { %v4407_v47 = vpack.c.bf16 %v4406_v43, %v4406_v43  ;;  %v7608_v43 = vld [vmem:[%s11498_s12 + $0xc] sm:$0x3] }
0x1101   :  { %v11173_v48 = vsel %vm512_vm3, %v4407_v47, 0 }
0x1102   :  { %8512 = vmatpush3.bf16.msra.mxu1 %v11173_v48  ;;  %8518 = vmatpush3.bf16.msra.mxu0 %v11173_v48 }
0x1103   :  { %8523 = vmatprep.subr.mxu1 %v8818_v17  ;;  %8528 = vmatprep.subr.mxu0 %v8818_v17 }
0x1105   :  { %8514 = vmatmul.mubr.msk.bf16.vlgmr.msra.gmra.mxu1 %vm508_vm4, %v4408_v6  ;;  %8520 = vmatmul.mubr.msk.bf16.vlgmr.msra.gmra.mxu0 %vm508_vm4, %v7586_v51 }
0x1106   :  { %8524 = vmatpush3.msk.msra.mxu1 %vm512_vm3, %v11013_v8  ;;  %8525 = vmatprep.mubr.msk.f32.mxu1 %vm8819_vm7, %v8818_v17 }
0x1107   :  { %8529 = vmatpush3.msk.msra.mxu0 %vm512_vm3, %v11028_v9  ;;  %8530 = vmatprep.mubr.msk.f32.mxu0 %vm8819_vm7, %v8818_v17 }
0x1108   :  { %8533 = vmatprep.subr.bf16.mxu1 %v8818_v17  ;;  %8539 = vmatprep.subr.mxu0 %v8818_v17 }
0x11c5   :  { %v4449_v52 = vpop.f32.mrf.mxu1  ;;  %v4494_v53 = vpop.f32.mrf.mxu0 }
0x11c6   :  { %8526 = vmatmul.mubr.msk.f32.vlgmr.msra.gmra.mxu1 %vm3378_vm9, %v4494_v53  ;;  %8531 = vmatmul.mubr.msk.f32.vlgmr.msra.gmra.mxu0 %vm3378_vm9, %v4449_v52 }
0x11c7   :  { %8534 = vmatpush3.bf16.msra.mxu1 %v11173_v48  ;;  %v8521_v57 = vpop.f32.mrf.mxu0  ;;  %8535 = vmatprep.mubr.msk.bf16.mxu1 %vm8819_vm7, %v8818_v17  ;;  %v8515_v60 = vpop.f32.mrf.mxu1 }
0x11c8   :  { %8540 = vmatpush3.msk.msra.mxu0 %vm512_vm3, %v11050_v19  ;;  %8541 = vmatprep.mubr.msk.f32.mxu0 %vm8819_vm7, %v8818_v17  ;;  %v7612_v60 = vld [vmem:[%s11498_s12 + $0xe] sm:$0x3] }
0x11c9   :  { %v4497_v61 = vpop.f32.mrf.mxu0  ;;  %v4452_v44 = vpop.f32.mrf.mxu1  ;;  %8544 = vmatprep.subr.bf16.mxu0 %v8818_v17  ;;  %8550 = vmatprep.subr.mxu1 %v8818_v17 }
0x11ca   :  { %8536 = vmatmul.mubr.msk.bf16.vlgmr.msra.gmra.mxu1 %vm508_vm4, %v7592_v58 }
0x11cb   :  { %v8522_v62 = vpop.f32.mrf.mxu0  ;;  %v8516_v63 = vpop.f32.mrf.mxu1  ;;  %8551 = vmatpush3.msk.msra.mxu1 %vm512_vm3, %v11069_v32  ;;  %8552 = vmatprep.mubr.msk.f32.mxu1 %vm8819_vm7, %v8818_v17 }
0x11cc   :  { %8555 = vmatprep.subr.bf16.mxu1 %v8818_v17 }
0x1286   :  { %v4569_v0 = vpop.f32.mrf.mxu1  ;;  %v4642_v20 = vpop.f32.mrf.mxu0 }
0x1287   :  { %v4643_v21 = vadd.f32 %v4642_v20, %v4569_v0 }
0x1288   :  { %v8527_v3 = vpop.f32.mrf.mxu1  ;;  %v8532_v5 = vpop.f32.mrf.mxu0 }
0x1289   :  { %v7616_v3 = vld [vmem:[%s11498_s12 + $0x10] sm:$0x3] }
0x128a   :  { %v4685_v7 = vpop.f32.mrf.mxu1 }
0x128b   :  { %8542 = vmatmul.mubr.msk.f32.vlgmr.msra.gmra.mxu0 %vm3378_vm9, %v4685_v7 }
0x128c   :  { %8545 = vmatpush3.bf16.msra.mxu0 %v11173_v48  ;;  %v8537_v10 = vpop.f32.mrf.mxu1  ;;  %8546 = vmatprep.mubr.msk.bf16.mxu0 %vm8819_vm7, %v8818_v17 }
0x128d   :  { %8561 = vmatprep.subr.mxu0 %v8818_v17 }
0x128e   :  { %v4688_v11 = vpop.f32.mrf.mxu1 }
0x128f   :  { %8547 = vmatmul.mubr.msk.bf16.vlgmr.msra.gmra.mxu0 %vm508_vm4, %v7596_v28 }
0x1290   :  { %v8538_v12 = vpop.f32.mrf.mxu1  ;;  %8562 = vmatpush3.msk.msra.mxu0 %vm512_vm3, %v11088_v46  ;;  %8563 = vmatprep.mubr.msk.f32.mxu0 %vm8819_vm7, %v8818_v17 }
0x1291   :  { %8566 = vmatprep.subr.bf16.mxu0 %v8818_v17 }
0x134b   :  { %v4760_v13 = vpop.f32.mrf.mxu0 }
0x134c   :  { %v4764_v15 = vadd.f32 %v4760_v13, %v4643_v21 }
0x134d   :  { %v8543_v45 = vpop.f32.mrf.mxu0 }
0x134f   :  { %v4804_v18 = vpop.f32.mrf.mxu0 }
0x1350   :  { %8553 = vmatmul.mubr.msk.f32.vlgmr.msra.gmra.mxu1 %vm3378_vm9, %v4804_v18 }
0x1351   :  { %8556 = vmatpush3.bf16.msra.mxu1 %v11173_v48  ;;  %v8548_v22 = vpop.f32.mrf.mxu0  ;;  %8557 = vmatprep.mubr.msk.bf16.mxu1 %vm8819_vm7, %v8818_v17 }
0x1352   :  { %8572 = vmatprep.subr.mxu1 %v8818_v17  ;;  %v5483_v22 = vpop.permute.xlu1 %5482 }
0x1353   :  { %v4807_v23 = vpop.f32.mrf.mxu0 }
0x1354   :  { %8558 = vmatmul.mubr.msk.bf16.vlgmr.msra.gmra.mxu1 %vm508_vm4, %v7600_v42 }
0x1355   :  { %v8549_v24 = vpop.f32.mrf.mxu0  ;;  %8573 = vmatpush3.msk.msra.mxu1 %vm512_vm3, %v11107_v16  ;;  %8574 = vmatprep.mubr.msk.f32.mxu1 %vm8819_vm7, %v8818_v17 }
0x1356   :  { %8577 = vmatprep.subr.bf16.mxu1 %v8818_v17 }
0x1410   :  { %v4879_v25 = vpop.f32.mrf.mxu1 }
0x1411   :  { %v4883_v26 = vadd.f32 %v4879_v25, %v4764_v15 }
0x1412   :  { %v8554_v27 = vpop.f32.mrf.mxu1 }
0x1413   :  { %v7621_v27 = vld [vmem:[%s11499_s14 + $0x2] sm:$0x3] }
0x1414   :  { %v4923_v29 = vpop.f32.mrf.mxu1 }
0x1415   :  { %8564 = vmatmul.mubr.msk.f32.vlgmr.msra.gmra.mxu0 %vm3378_vm9, %v4923_v29  ;;  %v5488_v29 = vld [vmem:[%s11499_s14] sm:$0x3] }
0x1416   :  { %8567 = vmatpush3.bf16.msra.mxu0 %v11173_v48  ;;  %v8559_v30 = vpop.f32.mrf.mxu1  ;;  %8568 = vmatprep.mubr.msk.bf16.mxu0 %vm8819_vm7, %v8818_v17 }
0x1417   :  { %8583 = vmatprep.subr.mxu0 %v8818_v17 }
0x1418   :  { %v4926_v54 = vpop.f32.mrf.mxu1 }
0x1419   :  { %8569 = vmatmul.mubr.msk.bf16.vlgmr.msra.gmra.mxu0 %vm508_vm4, %v7604_v31 }
0x141a   :  { %v8560_v33 = vpop.f32.mrf.mxu1  ;;  %8584 = vmatpush3.msk.msra.mxu0 %vm512_vm3, %v11126_v2  ;;  %8585 = vmatprep.mubr.msk.f32.mxu0 %vm8819_vm7, %v8818_v17 }
0x141b   :  { %8588 = vmatprep.subr.bf16.mxu0 %v8818_v17 }
0x14d5   :  { %v4998_v34 = vpop.f32.mrf.mxu0 }
0x14d6   :  { %v5002_v35 = vadd.f32 %v4998_v34, %v4883_v26 }
0x14d7   :  { %v8565_v59 = vpop.f32.mrf.mxu0 }
0x14d9   :  { %v5042_v40 = vpop.f32.mrf.mxu0 }
0x14da   :  { %8575 = vmatmul.mubr.msk.f32.vlgmr.msra.gmra.mxu1 %vm3378_vm9, %v5042_v40 }
0x14db   :  { %8578 = vmatpush3.bf16.msra.mxu1 %v11173_v48  ;;  %v8570_v41 = vpop.f32.mrf.mxu0  ;;  %8579 = vmatprep.mubr.msk.bf16.mxu1 %vm8819_vm7, %v8818_v17 }
0x14dc   :  { %8594 = vmatprep.subr.mxu1 %v8818_v17 }
0x14dd   :  { %v5045_v47 = vpop.f32.mrf.mxu0 }
0x14de   :  { %8580 = vmatmul.mubr.msk.bf16.vlgmr.msra.gmra.mxu1 %vm508_vm4, %v7608_v43 }
0x14df   :  { %v8571_v6 = vpop.f32.mrf.mxu0  ;;  %8595 = vmatpush3.msk.msra.mxu1 %vm512_vm3, %v11145_v14  ;;  %8596 = vmatprep.mubr.msk.f32.mxu1 %vm8819_vm7, %v8818_v17 }
0x14e0   :  { %8599 = vmatprep.subr.bf16.mxu1 %v8818_v17 }
0x159a   :  { %v5117_v51 = vpop.f32.mrf.mxu1 }
0x159b   :  { %v5121_v52 = vadd.f32 %v5117_v51, %v5002_v35 }
0x159c   :  { %v8576_v53 = vpop.f32.mrf.mxu1 }
0x159e   :  { %v5161_v57 = vpop.f32.mrf.mxu1 }
0x159f   :  { %8586 = vmatmul.mubr.msk.f32.vlgmr.msra.gmra.mxu0 %vm3378_vm9, %v5161_v57 }
0x15a0   :  { %8589 = vmatpush3.bf16.msra.mxu0 %v11173_v48  ;;  %v8581_v58 = vpop.f32.mrf.mxu1  ;;  %8590 = vmatprep.mubr.msk.bf16.mxu0 %vm8819_vm7, %v8818_v17 }
0x15a1   :  { %8605 = vmatprep.subr.mxu0 %v8818_v17 }
0x15a2   :  { %v5164_v61 = vpop.f32.mrf.mxu1 }
0x15a3   :  { %8591 = vmatmul.mubr.msk.bf16.vlgmr.msra.gmra.mxu0 %vm508_vm4, %v7612_v60 }
0x15a4   :  { %v8582_v44 = vpop.f32.mrf.mxu1  ;;  %8606 = vmatpush3.msk.msra.mxu0 %vm512_vm3, %v11164_v4  ;;  %8607 = vmatprep.mubr.msk.f32.mxu0 %vm8819_vm7, %v8818_v17 }
0x15a5   :  { %8610 = vmatprep.subr.bf16.mxu0 %v8818_v17 }
0x165f   :  { %v5236_v62 = vpop.f32.mrf.mxu0 }
0x1660   :  { %v5240_v63 = vadd.f32 %v5236_v62, %v5121_v52 }
0x1661   :  { %v8587_v0 = vpop.f32.mrf.mxu0 }
0x1663   :  { %v5280_v20 = vpop.f32.mrf.mxu0 }
0x1664   :  { %8597 = vmatmul.mubr.msk.f32.vlgmr.msra.gmra.mxu1 %vm3378_vm9, %v5280_v20 }
0x1665   :  { %8600 = vmatpush3.bf16.msra.mxu1 %v11173_v48  ;;  %v8592_v21 = vpop.f32.mrf.mxu0  ;;  %8601 = vmatprep.mubr.msk.bf16.mxu1 %vm8819_vm7, %v8818_v17 }
0x1666   :  { %8616 = vmatprep.subr.bf16.mxu1 %v8818_v17 }
0x1667   :  { %v5283_v5 = vpop.f32.mrf.mxu0 }
0x1668   :  { %8602 = vmatmul.mubr.msk.bf16.vlgmr.msra.gmra.mxu1 %vm508_vm4, %v7616_v3 }
0x1669   :  { %v8593_v7 = vpop.f32.mrf.mxu0  ;;  %8618 = vmatprep.mubr.msk.bf16.mxu1 %vm8819_vm7, %v8818_v17 }
0x1724   :  { %v5355_v10 = vpop.f32.mrf.mxu1 }
0x1725   :  { %v5359_v28 = vadd.f32 %v5355_v10, %v5240_v63 }
0x1726   :  { %v8598_v48 = vpop.f32.mrf.mxu1 }
0x1728   :  { %v5399_v11 = vpop.f32.mrf.mxu1 }
0x1729   :  { %8608 = vmatmul.mubr.msk.f32.vlgmr.msra.gmra.mxu0 %vm3378_vm9, %v5399_v11 }
0x172a   :  { %v8603_v12 = vpop.f32.mrf.mxu1  ;;  %8612 = vmatprep.mubr.msk.bf16.mxu0 %vm8819_vm7, %v8818_v17 }
0x172c   :  { %v5402_v13 = vpop.f32.mrf.mxu1 }
0x172e   :  { %v8604_v15 = vpop.f32.mrf.mxu1 }
0x17e9   :  { %v5474_v45 = vpop.f32.mrf.mxu0 }
0x17ea   :  { %v5478_v18 = vadd.f32 %v5474_v45, %v5359_v28 }
0x17eb   :  { %v8609_v42 = vpop.f32.mrf.mxu0 }
0x17ec   :  { %v5485_v23 = vadd.f32 %v5483_v22, %v5478_v18 }
0x17ee   :  { %v5486_v24 = vmax.f32 %v5485_v23, 0.0 }
0x17f0   :  { %v5487_v25 = vpack.c.bf16 %v5486_v24, %v5486_v24 }
0x17f2   :  { %v11302_v26 = vsel %vm512_vm3, %v5487_v25, 0 }
0x17f3   :  { %8611 = vmatpush3.bf16.msra.mxu0 %v11302_v26  ;;  %8617 = vmatpush3.bf16.msra.mxu1 %v11302_v26 }
0x17f4   :  { %8622 = vmatprep.subr.mxu0 %v8818_v17  ;;  %8627 = vmatprep.subr.mxu1 %v8818_v17 }
0x17f6   :  { %8619 = vmatmul.mubr.msk.bf16.vlgmr.msra.gmra.mxu1 %vm508_vm4, %v7621_v27  ;;  %8613 = vmatmul.mubr.msk.bf16.vlgmr.msra.gmra.mxu0 %vm508_vm4, %v5488_v29 }
0x17f7   :  { %8623 = vmatpush3.msk.msra.mxu0 %vm512_vm3, %v11013_v8  ;;  %8624 = vmatprep.mubr.msk.f32.mxu0 %vm8819_vm7, %v8818_v17 }
0x17f8   :  { %8632 = vmatprep.subr.bf16.mxu0 %v8818_v17  ;;  %8628 = vmatpush3.msk.msra.mxu1 %vm512_vm3, %v11028_v9  ;;  %v7627_v9 = vld [vmem:[%s11499_s14 + $0x4] sm:$0x3] }
0x17f9   :  { %8629 = vmatprep.mubr.msk.f32.mxu1 %vm8819_vm7, %v8818_v17  ;;  %8638 = vmatprep.subr.mxu1 %v8818_v17 }
0x18b6   :  { %v5574_v30 = vpop.f32.mrf.mxu1  ;;  %v5529_v31 = vpop.f32.mrf.mxu0 }
0x18b7   :  { %8625 = vmatmul.mubr.msk.f32.vlgmr.msra.gmra.mxu0 %vm3378_vm9, %v5574_v30  ;;  %8630 = vmatmul.mubr.msk.f32.vlgmr.msra.gmra.mxu1 %vm3378_vm9, %v5529_v31 }
0x18b8   :  { %8633 = vmatpush3.bf16.msra.mxu0 %v11302_v26  ;;  %v8620_v8 = vpop.f32.mrf.mxu1  ;;  %8634 = vmatprep.mubr.msk.bf16.mxu0 %vm8819_vm7, %v8818_v17  ;;  %v8614_v54 = vpop.f32.mrf.mxu0 }
0x18b9   :  { %8639 = vmatpush3.msk.msra.mxu1 %vm512_vm3, %v11050_v19  ;;  %8640 = vmatprep.mubr.msk.f32.mxu1 %vm8819_vm7, %v8818_v17  ;;  %v7651_v54 = vld [vmem:[%s11499_s14 + $0x10] sm:$0x3] }
0x18ba   :  { %v5577_v33 = vpop.f32.mrf.mxu1  ;;  %v5532_v34 = vpop.f32.mrf.mxu0  ;;  %8643 = vmatprep.subr.bf16.mxu1 %v8818_v17  ;;  %8649 = vmatprep.subr.mxu0 %v8818_v17 }
0x18bb   :  { %8635 = vmatmul.mubr.msk.bf16.vlgmr.msra.gmra.mxu0 %vm508_vm4, %v7627_v9 }
0x18bc   :  { %v8621_v35 = vpop.f32.mrf.mxu1  ;;  %v8615_v59 = vpop.f32.mrf.mxu0  ;;  %8650 = vmatpush3.msk.msra.mxu0 %vm512_vm3, %v11069_v32  ;;  %8651 = vmatprep.mubr.msk.f32.mxu0 %vm8819_vm7, %v8818_v17  ;;  %v7631_v32 = vld [vmem:[%s11499_s14 + $0x6] sm:$0x3] }
0x18bd   :  { %8654 = vmatprep.subr.bf16.mxu0 %v8818_v17 }
0x1977   :  { %v5649_v19 = vpop.f32.mrf.mxu0  ;;  %v5722_v40 = vpop.f32.mrf.mxu1 }
0x1978   :  { %v5723_v41 = vadd.f32 %v5722_v40, %v5649_v19 }
0x1979   :  { %v8626_v43 = vpop.f32.mrf.mxu0  ;;  %v8631_v47 = vpop.f32.mrf.mxu1 }
0x197a   :  { %v8820_v43 = vmov 1983009808  }
0x197b   :  { %v5765_v6 = vpop.f32.mrf.mxu0  ;;  %v6570_v47 = vunpack.c.l.s4 %v8820_v43 }
0x197c   :  { %8641 = vmatmul.mubr.msk.f32.vlgmr.msra.gmra.mxu1 %vm3378_vm9, %v5765_v6  ;;  %v6572_v6 = vlaneseq }
0x197d   :  { %8644 = vmatpush3.bf16.msra.mxu1 %v11302_v26  ;;  %v8636_v51 = vpop.f32.mrf.mxu0  ;;  %8645 = vmatprep.mubr.msk.bf16.mxu1 %vm8819_vm7, %v8818_v17 }
0x197e   :  { %8660 = vmatprep.subr.mxu1 %v8818_v17  ;;  %v6571_v51 = vunpack.c.0.s8 %v6570_v47 }
0x197f   :  { %v5768_v52 = vpop.f32.mrf.mxu0 }
0x1980   :  { %8646 = vmatmul.mubr.msk.bf16.vlgmr.msra.gmra.mxu1 %vm508_vm4, %v7631_v32  ;;  %v6573_v32 = vshrl.u32 %v6572_v6, 7  ;;  %v6566_v52 = vld [vmem:[%s11500_s19] sm:$0xff] }
0x1981   :  { %v8637_v53 = vpop.f32.mrf.mxu0  ;;  %8661 = vmatpush3.msk.msra.mxu1 %vm512_vm3, %v11088_v46  ;;  %8662 = vmatprep.mubr.msk.f32.mxu1 %vm8819_vm7, %v8818_v17  ;;  %v7635_v46 = vld [vmem:[%s11499_s14 + $0x8] sm:$0x3] }
0x1982   :  { %8665 = vmatprep.subr.bf16.mxu1 %v8818_v17  ;;  %v6568_v53 = vcombine.high %v6566_v52, %v6566_v52 }
0x1a3c   :  { %v5840_v57 = vpop.f32.mrf.mxu1 }
0x1a3d   :  { %v5844_v58 = vadd.f32 %v5840_v57, %v5723_v41  ;;  %v6574_v57 = vsub.s32 %v6571_v51, %v6573_v32 }
0x1a3e   :  { %v8642_v60 = vpop.f32.mrf.mxu1 }
0x1a3f   :  { %v6575_v60 = vrot.slane %v6566_v52, %v6574_v57 }
0x1a40   :  { %v5884_v61 = vpop.f32.mrf.mxu1 }
0x1a41   :  { %8652 = vmatmul.mubr.msk.f32.vlgmr.msra.gmra.mxu0 %vm3378_vm9, %v5884_v61 }
0x1a42   :  { %8655 = vmatpush3.bf16.msra.mxu0 %v11302_v26  ;;  %v8647_v44 = vpop.f32.mrf.mxu1  ;;  %8656 = vmatprep.mubr.msk.bf16.mxu0 %vm8819_vm7, %v8818_v17 }
0x1a43   :  { %8671 = vmatprep.subr.mxu0 %v8818_v17  ;;  %v6583_v44 = vcombine.high %v6575_v60, %v6575_v60 }
0x1a44   :  { %v5887_v62 = vpop.f32.mrf.mxu1 }
0x1a45   :  { %8657 = vmatmul.mubr.msk.bf16.vlgmr.msra.gmra.mxu0 %vm508_vm4, %v7635_v46  ;;  %v6563_v62 = vpop.permute.xlu1 %6562 }
0x1a46   :  { %v8648_v63 = vpop.f32.mrf.mxu1  ;;  %8672 = vmatpush3.msk.msra.mxu0 %vm512_vm3, %v11107_v16  ;;  %8673 = vmatprep.mubr.msk.f32.mxu0 %vm8819_vm7, %v8818_v17  ;;  %v7639_v16 = vld [vmem:[%s11499_s14 + $0xa] sm:$0x3] }
0x1a47   :  { %8676 = vmatprep.subr.bf16.mxu0 %v8818_v17 }
0x1b01   :  { %v5959_v0 = vpop.f32.mrf.mxu0 }
0x1b02   :  { %v5963_v20 = vadd.f32 %v5959_v0, %v5844_v58  ;;  %v6582_v58 = vrot.slane %v6568_v53, %v6574_v57 }
0x1b03   :  { %v8653_v21 = vpop.f32.mrf.mxu0 }
0x1b04   :  { %v6584_v61 = vcombine.high %v6582_v58, %v6582_v58 }
0x1b05   :  { %v6003_v3 = vpop.f32.mrf.mxu0 }
0x1b06   :  { %8663 = vmatmul.mubr.msk.f32.vlgmr.msra.gmra.mxu1 %vm3378_vm9, %v6003_v3 }
0x1b07   :  { %8666 = vmatpush3.bf16.msra.mxu1 %v11302_v26  ;;  %v8658_v5 = vpop.f32.mrf.mxu0  ;;  %8667 = vmatprep.mubr.msk.bf16.mxu1 %vm8819_vm7, %v8818_v17 }
0x1b08   :  { %8682 = vmatprep.subr.mxu1 %v8818_v17 }
0x1b09   :  { %v6006_v7 = vpop.f32.mrf.mxu0 }
0x1b0a   :  { %8668 = vmatmul.mubr.msk.bf16.vlgmr.msra.gmra.mxu1 %vm508_vm4, %v7639_v16 }
0x1b0b   :  { %v8659_v10 = vpop.f32.mrf.mxu0  ;;  %8683 = vmatpush3.msk.msra.mxu1 %vm512_vm3, %v11126_v2  ;;  %8684 = vmatprep.mubr.msk.f32.mxu1 %vm8819_vm7, %v8818_v17  ;;  %v7643_v2 = vld [vmem:[%s11499_s14 + $0xc] sm:$0x3] }
0x1b0c   :  { %8687 = vmatprep.subr.bf16.mxu1 %v8818_v17 }
0x1bc6   :  { %v6078_v28 = vpop.f32.mrf.mxu1 }
0x1bc7   :  { %v6082_v48 = vadd.f32 %v6078_v28, %v5963_v20  ;;  %v506_v20 = vpop.permute.xlu0 %505 }
0x1bc8   :  { %v8664_v11 = vpop.f32.mrf.mxu1  ;;  %v560_v21 = vadd.f32 %v9318_v36, %v506_v20  ;;  %v601_v3 = vadd.f32 %v9320_v37, %v506_v20  ;;  %v562_v28 = vadd.f32 %v9322_v38, %v506_v20  ;;  %v8778_v38 = vld [vmem:[%s11501_s17] sm:$0xff]  }
0x1bca   :  { %v6122_v12 = vpop.f32.mrf.mxu1 }
0x1bcb   :  { %8674 = vmatmul.mubr.msk.f32.vlgmr.msra.gmra.mxu0 %vm3378_vm9, %v6122_v12 }
0x1bcc   :  { %8677 = vmatpush3.bf16.msra.mxu0 %v11302_v26  ;;  %v8669_v13 = vpop.f32.mrf.mxu1  ;;  %8678 = vmatprep.mubr.msk.bf16.mxu0 %vm8819_vm7, %v8818_v17 }
0x1bcd   :  { %8693 = vmatprep.subr.mxu0 %v8818_v17 }
0x1bce   :  { %v6125_v15 = vpop.f32.mrf.mxu1 }
0x1bcf   :  { %8679 = vmatmul.mubr.msk.bf16.vlgmr.msra.gmra.mxu0 %vm508_vm4, %v7643_v2 }
0x1bd0   :  { %v8670_v45 = vpop.f32.mrf.mxu1  ;;  %8694 = vmatpush3.msk.msra.mxu0 %vm512_vm3, %v11145_v14  ;;  %8695 = vmatprep.mubr.msk.f32.mxu0 %vm8819_vm7, %v8818_v17  ;;  %v7647_v14 = vld [vmem:[%s11499_s14 + $0xe] sm:$0x3] }
0x1bd1   :  { %8698 = vmatprep.subr.bf16.mxu0 %v8818_v17 }
0x1c8b   :  { %v6197_v18 = vpop.f32.mrf.mxu0 }
0x1c8c   :  { %v6201_v22 = vadd.f32 %v6197_v18, %v6082_v48  ;;  %v603_v48 = vadd.f32 %v9324_v39, %v506_v20  ;;  %v6749_v39 = vpop.permute.xlu1 %6748 }
0x1c8d   :  { %v8675_v42 = vpop.f32.mrf.mxu0 }
0x1c8f   :  { %v6241_v23 = vpop.f32.mrf.mxu0 }
0x1c90   :  { %8685 = vmatmul.mubr.msk.f32.vlgmr.msra.gmra.mxu1 %vm3378_vm9, %v6241_v23 }
0x1c91   :  { %8688 = vmatpush3.bf16.msra.mxu1 %v11302_v26  ;;  %v8680_v24 = vpop.f32.mrf.mxu0  ;;  %8689 = vmatprep.mubr.msk.bf16.mxu1 %vm8819_vm7, %v8818_v17 }
0x1c92   :  { %8704 = vmatprep.subr.mxu1 %v8818_v17 }
0x1c93   :  { %v6244_v25 = vpop.f32.mrf.mxu0 }
0x1c94   :  { %8690 = vmatmul.mubr.msk.bf16.vlgmr.msra.gmra.mxu1 %vm508_vm4, %v7647_v14 }
0x1c95   :  { %v8681_v27 = vpop.f32.mrf.mxu0  ;;  %8705 = vmatpush3.msk.msra.mxu1 %vm512_vm3, %v11164_v4  ;;  %8706 = vmatprep.mubr.msk.f32.mxu1 %vm8819_vm7, %v8818_v17 }
0x1c96   :  { %7655 = vmatprep.subr.msk.mxu1 %vm512_vm3, %v6583_v44  ;;  %v6754_v27 = vpop.permute.xlu0 %6753 }
0x1d50   :  { %v6316_v29 = vpop.f32.mrf.mxu1 }
0x1d51   :  { %v6320_v30 = vadd.f32 %v6316_v29, %v6201_v22 }
0x1d52   :  { %v8686_v31 = vpop.f32.mrf.mxu1 }
0x1d54   :  { %v6360_v8 = vpop.f32.mrf.mxu1 }
0x1d55   :  { %8696 = vmatmul.mubr.msk.f32.vlgmr.msra.gmra.mxu0 %vm3378_vm9, %v6360_v8 }
0x1d56   :  { %8699 = vmatpush3.bf16.msra.mxu0 %v11302_v26  ;;  %v8691_v9 = vpop.f32.mrf.mxu1  ;;  %8700 = vmatprep.mubr.msk.bf16.mxu0 %vm8819_vm7, %v8818_v17 }
0x1d57   :  { %7658 = vmatprep.subr.msk.mxu0 %vm512_vm3, %v6584_v61 }
0x1d58   :  { %v6363_v4 = vpop.f32.mrf.mxu1 }
0x1d59   :  { %8701 = vmatmul.mubr.msk.bf16.vlgmr.msra.gmra.mxu0 %vm508_vm4, %v7651_v54 }
0x1d5a   :  { %v8692_v33 = vpop.f32.mrf.mxu1  ;;  %6731 = vmatprep.mubr.f32.mxu0 %v8818_v17  ;;  %7659 = vmatpush1.msk.msra.mxu0 %vm512_vm3, %v6582_v58 }
0x1e15   :  { %v6435_v34 = vpop.f32.mrf.mxu0 }
0x1e16   :  { %v6439_v35 = vadd.f32 %v6435_v34, %v6320_v30 }
0x1e17   :  { %v8697_v59 = vpop.f32.mrf.mxu0 }
0x1e19   :  { %v6479_v19 = vpop.f32.mrf.mxu0 }
0x1e1a   :  { %8707 = vmatmul.mubr.msk.f32.vlgmr.msra.gmra.mxu1 %vm3378_vm9, %v6479_v19 }
0x1e1b   :  { %v8702_v26 = vpop.f32.mrf.mxu0  ;;  %6660 = vmatprep.mubr.f32.mxu1 %v8818_v17  ;;  %7656 = vmatpush1.msk.msra.mxu1 %vm512_vm3, %v6575_v60 }
0x1e1d   :  { %v6482_v40 = vpop.f32.mrf.mxu0 }
0x1e1f   :  { %v8703_v41 = vpop.f32.mrf.mxu0 }
0x1eda   :  { %v6554_v17 = vpop.f32.mrf.mxu1 }
0x1edb   :  { %v6558_v46 = vadd.f32 %v6554_v17, %v6439_v35 }
0x1edc   :  { %v8708_v63 = vpop.f32.mrf.mxu1 }
0x1edd   :  { %v6565_v0 = vadd.f32 %v6563_v62, %v6558_v46 }
0x1edf   :  { %7657 = vmatmul.mubr.msk.f32.vlgmr.msra.gmra.mxu1 %vm3378_vm9, %v6565_v0  ;;  %7660 = vmatmul.mubr.msk.f32.vlgmr.msra.gmra.mxu0 %vm3378_vm9, %v6565_v0 }
0x1ee0   :  { %6808 = vmatprep.mubr.bf16.mxu1 %v8811_v1  ;;  %6851 = vmatprep.mubr.bf16.mxu0 %v8811_v1 }
0x1f9f   :  { %v6662_v5 = vpop.f32.mrf.mxu1  ;;  %v6733_v16 = vpop.f32.mrf.mxu0 }
0x1fa0   :  { %v6663_v7 = vadd.f32 %v6662_v5, %v560_v21  ;;  %v6734_v10 = vadd.f32 %v6733_v16, %v601_v3 }
0x1fa1   :  { %v6664_v11 = vpop.f32.mrf.mxu1  ;;  %v6735_v12 = vpop.f32.mrf.mxu0 }
0x1fa2   :  { %v6738_v13 = vpack.c.bf16 %v6663_v7, %v6663_v7  ;;  %v6740_v2 = vpack.c.bf16 %v6734_v10, %v6734_v10  ;;  %v6665_v15 = vadd.f32 %v6664_v11, %v562_v28  ;;  %v6736_v45 = vadd.f32 %v6735_v12, %v603_v48 }
0x1fa3   :  { %v6918_v48 = vrot.slane %v9052_v49, 4 }
0x1fa4   :  { %v6739_v1 = vpack.c.bf16 %v6665_v15, %v6665_v15  ;;  %v6741_v18 = vpack.c.bf16 %v6736_v45, %v6736_v45  ;;  %v6765_v36 = vsel %vm512_vm3, %v6738_v13, 0  ;;  %v6771_v37 = vsel %vm512_vm3, %v6740_v2, 0 }
0x1fa5   :  { %v6920_v13 = vrot.slane %v9054_v50, 4  ;;  %v6919_v45 = vrot.slane %v9056_v55, 4 }
0x1fa6   :  { %7662 = vmatprep.subr.msk.bf16.mxu1 %vm512_vm3, %v6739_v1  ;;  %7664 = vmatprep.subr.msk.bf16.mxu0 %vm512_vm3, %v6741_v18  ;;  %v6921_v18 = vrot.slane %v9058_v56, 4 }
0x1fa7   :  { %6791 = vmatpush1.bf16.msra.mxu1 %v6765_v36  ;;  %6834 = vmatpush1.bf16.msra.mxu0 %v6771_v37 }
0x1faa   :  { %7663 = vmatmul.mubr.msk.bf16.vlgmr.msra.gmra.mxu1 %vm508_vm4, %v8778_v38  ;;  %7665 = vmatmul.mubr.msk.bf16.vlgmr.msra.gmra.mxu0 %vm508_vm4, %v8778_v38 }
0x206a   :  { %v6810_v22 = vpop.f32.mrf.mxu1  ;;  %v6853_v42 = vpop.f32.mrf.mxu0 }
0x206b   :  { %v6811_v23 = vadd.f32 %v6810_v22, %v6749_v39  ;;  %v6854_v24 = vadd.f32 %v6853_v42, %v6749_v39 }
0x206c   :  { %v6812_v14 = vpop.f32.mrf.mxu1  ;;  %v6855_v25 = vpop.f32.mrf.mxu0 }
0x206d   :  { %v7666_v29 = vmul.f32 -1.442695, %v6811_v23  ;;  %v7668_v30 = vmul.f32 -1.442695, %v6854_v24  ;;  %v6813_v31 = vadd.f32 %v6812_v14, %v6749_v39  ;;  %v6856_v8 = vadd.f32 %v6855_v25, %v6749_v39 }
0x206e   :  { %v6814_v9 = vpop.f32.mrf.mxu1  ;;  %v6857_v54 = vpop.f32.mrf.mxu0 }
0x206f   :  { %8779 = vpow2.f32 %v7666_v29  ;;  %v7667_v4 = vmul.f32 -1.442695, %v6813_v31  ;;  %v7669_v33 = vmul.f32 -1.442695, %v6856_v8  ;;  %v6815_v34 = vadd.f32 %v6814_v9, %v6754_v27 }
0x2070   :  { %8781 = vpow2.f32 %v7668_v30  ;;  %v6858_v35 = vadd.f32 %v6857_v54, %v6754_v27  ;;  %v6816_v59 = vpop.f32.mrf.mxu1  ;;  %v6859_v19 = vpop.f32.mrf.mxu0 }
0x2071   :  { %8783 = vpow2.f32 %v7667_v4  ;;  %v7670_v26 = vmul.f32 -1.442695, %v6815_v34  ;;  %v6817_v40 = vadd.f32 %v6816_v59, %v6754_v27  ;;  %v6860_v41 = vadd.f32 %v6859_v19, %v6754_v27 }
0x2072   :  { %8785 = vpow2.f32 %v7669_v33  ;;  %v7672_v43 = vmul.f32 -1.442695, %v6858_v35 }
0x2073   :  { %8787 = vpow2.f32 %v7670_v26  ;;  %v7671_v47 = vmul.f32 -1.442695, %v6817_v40  ;;  %v7673_v6 = vmul.f32 -1.442695, %v6860_v41 }
0x2074   :  { %8789 = vpow2.f32 %v7672_v43 }
0x2075   :  { %8791 = vpow2.f32 %v7671_v47 }
0x2076   :  { %8793 = vpow2.f32 %v7673_v6 }
0x207c   :  { %v8780_v51 = vpop.eup %8779 }
0x207d   :  { %v8782_v32 = vpop.eup %8781  ;;  %v6886_v52 = vadd.f32 1.0, %v8780_v51 }
0x207e   :  { %v8784_v53 = vpop.eup %8783  ;;  %v6888_v57 = vadd.f32 1.0, %v8782_v32 }
0x207f   :  { %v8786_v58 = vpop.eup %8785  ;;  %8795 = vrcp.f32 %v6886_v52  ;;  %v6887_v60 = vadd.f32 1.0, %v8784_v53 }
0x2080   :  { %v8788_v61 = vpop.eup %8787  ;;  %8797 = vrcp.f32 %v6888_v57  ;;  %v6889_v44 = vadd.f32 1.0, %v8786_v58 }
0x2081   :  { %v8790_v17 = vpop.eup %8789  ;;  %8799 = vrcp.f32 %v6887_v60  ;;  %v6890_v46 = vadd.f32 1.0, %v8788_v61 }
0x2082   :  { %v8792_v62 = vpop.eup %8791  ;;  %8801 = vrcp.f32 %v6889_v44  ;;  %v6892_v63 = vadd.f32 1.0, %v8790_v17 }
0x2083   :  { %v8794_v0 = vpop.eup %8793  ;;  %8803 = vrcp.f32 %v6890_v46  ;;  %v6891_v20 = vadd.f32 1.0, %v8792_v62 }
0x2084   :  { %8805 = vrcp.f32 %v6892_v63  ;;  %v6893_v21 = vadd.f32 1.0, %v8794_v0 }
0x2085   :  { %8807 = vrcp.f32 %v6891_v20 }
0x2086   :  { %8809 = vrcp.f32 %v6893_v21 }
0x208c   :  { %v8796_v3 = vpop.eup %8795 }
0x208d   :  { %v8798_v5 = vpop.eup %8797  ;;  %v6910_v16 = vmul.f32 %v8796_v3, %v9052_v49 }
0x208e   :  { %v8800_v7 = vpop.eup %8799  ;;  %v6912_v10 = vmul.f32 %v8798_v5, %v9054_v50 }
0x208f   :  { %v8802_v28 = vpop.eup %8801  ;;  %6914 = vst [vmem:[%s11502_s20] sm:$0xff] %v6910_v16  ;;  %v6911_v11 = vmul.f32 %v8800_v7, %v9056_v55 }
0x2090   :  { %v8804_v12 = vpop.eup %8803  ;;  %6916 = vst [vmem:[%s11502_s20 + $0x10] sm:$0xff] %v6912_v10  ;;  %v6913_v2 = vmul.f32 %v8802_v28, %v9058_v56 }
0x2091   :  { %v8806_v15 = vpop.eup %8805  ;;  %6915 = vst [vmem:[%s11502_s20 + $0x8] sm:$0xff] %v6911_v11  ;;  %v6922_v49 = vmul.f32 %v8804_v12, %v6918_v48 }
0x2092   :  { %v8808_v1 = vpop.eup %8807  ;;  %6917 = vst [vmem:[%s11502_s20 + $0x18] sm:$0xff] %v6913_v2  ;;  %v6924_v50 = vmul.f32 %v8806_v15, %v6920_v13 }
0x2093   :  { %v8810_v36 = vpop.eup %8809  ;;  %6926 = vst [vmem:[%s11503_s21] sm:$0xff] %v6922_v49  ;;  %v6923_v37 = vmul.f32 %v8808_v1, %v6919_v45 }
0x2094   :  { %6928 = vst [vmem:[%s11503_s21 + $0x10] sm:$0xff] %v6924_v50  ;;  %v6925_v55 = vmul.f32 %v8810_v36, %v6921_v18 }
0x2095   :  { %6927 = vst [vmem:[%s11503_s21 + $0x8] sm:$0xff] %v6923_v37 }
0x2096   :  { %6929 = vst [vmem:[%s11503_s21 + $0x18] sm:$0xff] %v6925_v55 }

</bundles_post_ra>
